<compile_context>
chip_gen: v7x
topology: tpu7x:2x2x1
jax: 0.10.0
libtpu: 0.0.40
codegen_flags: <defaults>
</compile_context>

<pallas_src>
import functools

import jax
import jax.numpy as jnp
import numpy as np
from jax import lax
from jax.experimental import pallas as pl
from jax.experimental.pallas import tpu as pltpu


# ----------------------------------------------------------------------------
# Fused BasicBlock kernel (one image per grid step, channel-major layout)
# ----------------------------------------------------------------------------
def _basic_block_kernel(x_ref, w1_ref, b1_ref, w2_ref, b2_ref,
                        wca1_ref, wca2t_ref, wsa_ref, o_ref, patch_ref,
                        *, H, W, C, K):
    f32 = jnp.float32
    HW = H * W
    pad = K // 2

    # Flat pixel index (lane dim) and x-coordinate (no integer division when W
    # is a power of two, which is the case here).
    lane = lax.broadcasted_iota(jnp.int32, (1, HW), 1)
    xcoord = jnp.bitwise_and(lane, W - 1) if (W & (W - 1)) == 0 else lane % W

    def border_mask(dyo, dxo):
        # Valid iff the sampled input pixel (y+dyo, x+dxo) lies inside the image.
        conds = []
        if dxo < 0:
            conds.append(xcoord >= -dxo)
        elif dxo > 0:
            conds.append(xcoord < W - dxo)
        if dyo < 0:
            conds.append(lane >= (-dyo) * W)
        elif dyo > 0:
            conds.append(lane < (H - dyo) * W)
        if not conds:
            return None
        m = conds[0]
        for c in conds[1:]:
            m = jnp.logical_and(m, c)
        return m

    def shift(v, dyo, dxo):
        # shifted[:, p] = v[:, p + dyo*W + dxo]  (lane roll; out-of-image lanes
        # wrap and must be masked by the caller via border_mask).
        d = dyo * W + dxo
        return v if d % HW == 0 else pltpu.roll(v, (-d) % HW, axis=1)

    x = x_ref[0].astype(f32)                          # (C, HW) residual, channel-major

    def conv3x3_bn(act, w_ref, b_ref):
        # im2col patch (9C, HW): 9 sublane-aligned, full-lane bf16 stores, then
        # a single MXU matmul out(C, HW) = W(C, 9C) @ patch(9C, HW).
        for dy in range(3):
            for dx in range(3):
                t = dy * 3 + dx
                v = shift(act, dy - 1, dx - 1)
                m = border_mask(dy - 1, dx - 1)
                if m is not None:
                    v = jnp.where(m, v, 0.0)          # SAME zero padding
                patch_ref[t * C:(t + 1) * C, :] = v.astype(patch_ref.dtype)
        y = jnp.dot(w_ref[...], patch_ref[...], preferred_element_type=f32)
        return y + b_ref[...]                         # bias (C, 1) over lanes

    # ---- conv1 + bn1 (scale folded into weights) + relu ----------------------
    act1 = jnp.maximum(conv3x3_bn(x, w1_ref, b1_ref), 0.0)     # (C, HW)
    # ---- conv2 + bn2 ---------------------------------------------------------
    y = conv3x3_bn(act1, w2_ref, b2_ref)                       # (C, HW)

    # ---- channel attention (shared 2-layer FC on avg & max pooled vectors) ---
    # Tiny (Cr = C//16) FCs are done on the VPU/XLU instead of the MXU.
    wca1 = wca1_ref[...]                               # (C, Cr)
    wca2t = wca2t_ref[...]                             # (C, Cr)

    def ca_fc(v):                                      # v: (C, 1)
        h = jnp.maximum(jnp.sum(wca1 * v, axis=0, keepdims=True), 0.0)   # (1, Cr)
        return jnp.sum(wca2t * h, axis=1, keepdims=True)                 # (C, 1)

    att_c = jax.nn.sigmoid(ca_fc(jnp.mean(y, axis=1, keepdims=True))
                           + ca_fc(jnp.max(y, axis=1, keepdims=True)))   # (C, 1)
    y = y * att_c                                      # (C, HW)

    # ---- spatial attention: 7x7 conv over [avg; max] channel maps ------------
    amap = jnp.mean(y, axis=0, keepdims=True)          # (1, HW)
    mmap = jnp.max(y, axis=0, keepdims=True)           # (1, HW)
    accs = [jnp.zeros((1, HW), f32) for _ in range(4)]  # 4 independent partial sums
    for ky in range(K):
        for kx in range(K):
            t = ky * K + kx
            dyo, dxo = ky - pad, kx - pad
            contrib = (shift(amap, dyo, dxo) * wsa_ref[t]
                       + shift(mmap, dyo, dxo) * wsa_ref[K * K + t])
            m = border_mask(dyo, dxo)
            if m is not None:
                contrib = jnp.where(m, contrib, 0.0)
            accs[t % 4] = accs[t % 4] + contrib
    att_s = jax.nn.sigmoid((accs[0] + accs[1]) + (accs[2] + accs[3]))    # (1, HW)

    # ---- scale + residual add + relu ------------------------------------------
    o_ref[0] = jnp.maximum(y * att_s + x, 0.0).astype(o_ref.dtype)


def basic_block_forward(x, p, K=7):
    """x: (N, C, H, W) float32 (NCHW, like PyTorch)."""
    N, C, H, W = x.shape
    HW = H * W
    Cr = p["w_ca1"].shape[0]

    def fold_conv(w, scale):
        # (O, I, 3, 3) -> (O, 9*I), tap-major (ky, kx) then cin, BN scale folded,
        # cast to bf16 for the MXU (f32 accumulation in-kernel).
        wf = (w * scale[:, None, None, None]).transpose(0, 2, 3, 1).reshape(C, 9 * C)
        return wf.astype(jnp.bfloat16)

    w1 = fold_conv(p["w_conv1"], p["scale1"])
    w2 = fold_conv(p["w_conv2"], p["scale2"])
    b1 = p["bias1"].reshape(C, 1)
    b2 = p["bias2"].reshape(C, 1)
    wca1 = p["w_ca1"].T                              # (C, Cr): h_j = sum_c wca1[c,j]*v[c]
    wca2t = p["w_ca2"]                               # (C, Cr): z_c = sum_j wca2t[c,j]*h[j]
    wsa = jnp.concatenate([p["w_sa"][0].reshape(-1),
                           p["w_sa"][1].reshape(-1)])  # (98,): [avg taps | max taps]

    kern = functools.partial(_basic_block_kernel, H=H, W=W, C=C, K=K)
    out = pl.pallas_call(
        kern,
        out_shape=jax.ShapeDtypeStruct((N, C, HW), jnp.float32),
        grid=(N,),
        in_specs=[
            pl.BlockSpec((1, C, HW), lambda n: (n, 0, 0)),           # x (channel-major)
            pl.BlockSpec((C, 9 * C), lambda n: (0, 0)),              # conv1 weight (bf16)
            pl.BlockSpec((C, 1), lambda n: (0, 0)),                  # bn1 bias
            pl.BlockSpec((C, 9 * C), lambda n: (0, 0)),              # conv2 weight (bf16)
            pl.BlockSpec((C, 1), lambda n: (0, 0)),                  # bn2 bias
            pl.BlockSpec((C, Cr), lambda n: (0, 0)),                 # ca fc1 (transposed)
            pl.BlockSpec((C, Cr), lambda n: (0, 0)),                 # ca fc2
            pl.BlockSpec(memory_space=pltpu.MemorySpace.SMEM),       # sa taps (98,)
        ],
        out_specs=pl.BlockSpec((1, C, HW), lambda n: (n, 0, 0)),
        scratch_shapes=[pltpu.VMEM((9 * C, HW), jnp.bfloat16)],      # im2col patch
        compiler_params=pltpu.CompilerParams(dimension_semantics=("parallel",)),
    )(x.reshape(N, C, HW), w1, b1, w2, b2, wca1, wca2t, wsa)
    return out.reshape(N, C, H, W)


# ----------------------------------------------------------------------------
# Pure-JAX reference (same math, XLA convs, NCHW like PyTorch) for validation
# ----------------------------------------------------------------------------
def reference(x, p):
    def conv(inp, w, pad):
        return lax.conv_general_dilated(
            inp, w, (1, 1), [(pad, pad), (pad, pad)],
            dimension_numbers=("NCHW", "OIHW", "NCHW"))

    out = conv(x, p["w_conv1"], 1)
    out = out * p["scale1"][None, :, None, None] + p["bias1"][None, :, None, None]
    out = jnp.maximum(out, 0.0)
    out = conv(out, p["w_conv2"], 1)
    out = out * p["scale2"][None, :, None, None] + p["bias2"][None, :, None, None]

    avg = jnp.mean(out, axis=(2, 3))
    mx = jnp.max(out, axis=(2, 3))
    fc = lambda v: jnp.maximum(v @ p["w_ca1"].T, 0.0) @ p["w_ca2"].T
    att_c = jax.nn.sigmoid(fc(avg) + fc(mx))
    out = out * att_c[:, :, None, None]

    smap = jnp.concatenate([jnp.mean(out, axis=1, keepdims=True),
                            jnp.max(out, axis=1, keepdims=True)], axis=1)
    att_s = jax.nn.sigmoid(conv(smap, p["w_sa"][None], 3))
    out = out * att_s + x
    return jnp.maximum(out, 0.0)


def make_params(key, C, ratio=16, eps=1e-5):
    Cr = max(C // ratio, 1)
    ks = jax.random.split(key, 13)

    def bn_fold(kg, kb, km, kv):
        gamma = 1.0 + 0.1 * jax.random.normal(kg, (C,), jnp.float32)
        beta = 0.1 * jax.random.normal(kb, (C,), jnp.float32)
        mean = 0.1 * jax.random.normal(km, (C,), jnp.float32)
        var = 1.0 + 0.2 * jax.random.uniform(kv, (C,), jnp.float32)
        scale = gamma / jnp.sqrt(var + eps)
        bias = beta - mean * scale
        return scale, bias

    scale1, bias1 = bn_fold(ks[2], ks[3], ks[4], ks[5])
    scale2, bias2 = bn_fold(ks[6], ks[7], ks[8], ks[9])
    return {
        "w_conv1": 0.1 * jax.random.normal(ks[0], (C, C, 3, 3), jnp.float32),  # OIHW
        "w_conv2": 0.1 * jax.random.normal(ks[1], (C, C, 3, 3), jnp.float32),
        "scale1": scale1, "bias1": bias1,
        "scale2": scale2, "bias2": bias2,
        "w_ca1": 0.2 * jax.random.normal(ks[10], (Cr, C), jnp.float32),
        "w_ca2": 0.2 * jax.random.normal(ks[11], (C, Cr), jnp.float32),
        "w_sa": 0.1 * jax.random.normal(ks[12], (2, 7, 7), jnp.float32),
    }


if __name__ == "__main__":
    N, C, H, W = 2, 32, 16, 16   # inplanes = planes = 32 (ratio 16 -> hidden 2)
    key = jax.random.PRNGKey(0)
    kx, kp = jax.random.split(key)
    x = jax.random.normal(kx, (N, C, H, W), jnp.float32)   # NCHW, like PyTorch
    params = make_params(kp, C)

    out = jax.block_until_ready(basic_block_forward(x, params))
    ref = jax.block_until_ready(reference(x, params))

    # bf16 MXU operands (f32 accumulation) across two chained 3x3 convs ->
    # slightly looser tolerance than a pure-f32 comparison.
    np.testing.assert_allclose(np.asarray(out), np.asarray(ref), rtol=3e-2, atol=3e-2)
    print("KERNEL_OK")
</pallas_src>

<mosaic_0001>
module attributes {stable_mosaic.version = 11 : i64} {
  func.func @_basic_block_kernel(%arg0: i32, %arg1: memref<1x32x256xf32, #tpu.memory_space<vmem>>, %arg2: memref<32x288xbf16, #tpu.memory_space<vmem>>, %arg3: memref<32x1xf32, #tpu.memory_space<vmem>>, %arg4: memref<32x288xbf16, #tpu.memory_space<vmem>>, %arg5: memref<32x1xf32, #tpu.memory_space<vmem>>, %arg6: memref<32x2xf32, #tpu.memory_space<vmem>>, %arg7: memref<32x2xf32, #tpu.memory_space<vmem>>, %arg8: memref<98xf32, #tpu.memory_space<smem>>, %arg9: memref<1x32x256xf32, #tpu.memory_space<vmem>>, %arg10: memref<288x256xbf16, #tpu.memory_space<vmem>>) attributes {dimension_semantics = [#tpu.dimension_semantics<parallel>], iteration_bounds = array<i64: 2>, scalar_prefetch = 0 : i64, scratch_operands = 1 : i64, tpu.core_type = #tpu.core_type<tc>, window_params = [{transform_indices = @transform_0, window_bounds = array<i64: 1, 32, 256>}, {pipeline_mode = #tpu.pipeline_mode<synchronous>, transform_indices = @transform_1, window_bounds = array<i64: 32, 288>}, {pipeline_mode = #tpu.pipeline_mode<synchronous>, transform_indices = @transform_2, window_bounds = array<i64: 32, 1>}, {pipeline_mode = #tpu.pipeline_mode<synchronous>, transform_indices = @transform_3, window_bounds = array<i64: 32, 288>}, {pipeline_mode = #tpu.pipeline_mode<synchronous>, transform_indices = @transform_4, window_bounds = array<i64: 32, 1>}, {pipeline_mode = #tpu.pipeline_mode<synchronous>, transform_indices = @transform_5, window_bounds = array<i64: 32, 2>}, {pipeline_mode = #tpu.pipeline_mode<synchronous>, transform_indices = @transform_6, window_bounds = array<i64: 32, 2>}, {transform_indices = @transform_7, window_bounds = array<i64: 98>}, {transform_indices = @transform_8, window_bounds = array<i64: 1, 32, 256>}]} {
    %0 = tpu.iota {dimensions = array<i32: 1>} : vector<1x256xi32>
    %c15_i32 = arith.constant 15 : i32
    %1 = vector.broadcast %c15_i32 : i32 to vector<1x256xi32>
    %2 = arith.andi %0, %1 : vector<1x256xi32>
    %c0 = arith.constant 0 : index
    %c0_0 = arith.constant 0 : index
    %c0_1 = arith.constant 0 : index
    %3 = vector.load %arg1[%c0, %c0_0, %c0_1] : memref<1x32x256xf32, #tpu.memory_space<vmem>>, vector<1x32x256xf32>
    %4 = vector.shape_cast %3 : vector<1x32x256xf32> to vector<32x256xf32>
    %c17_i32 = arith.constant 17 : i32
    %5 = tpu.dynamic_rotate %4 by %c17_i32 dim 1 : vector<32x256xf32>, i32 -> vector<32x256xf32>
    %c1_i32 = arith.constant 1 : i32
    %6 = vector.broadcast %c1_i32 : i32 to vector<1x256xi32>
    %7 = arith.cmpi sge, %2, %6 : vector<1x256xi32>
    %c16_i32 = arith.constant 16 : i32
    %8 = vector.broadcast %c16_i32 : i32 to vector<1x256xi32>
    %9 = arith.cmpi sge, %0, %8 : vector<1x256xi32>
    %10 = arith.andi %7, %9 : vector<1x256xi1>
    %cst = arith.constant 0.000000e+00 : f32
    %11 = vector.shape_cast %10 : vector<1x256xi1> to vector<1x256xi1>
    %12 = vector.broadcast %11 : vector<1x256xi1> to vector<32x256xi1>
    %13 = vector.broadcast %cst : f32 to vector<32x256xf32>
    %14 = arith.select %12, %5, %13 : vector<32x256xi1>, vector<32x256xf32>
    %15 = arith.truncf %14 : vector<32x256xf32> to vector<32x256xbf16>
    %c0_2 = arith.constant 0 : index
    %c0_3 = arith.constant 0 : index
    %16 = vector.load %arg10[%c0_2, %c0_3] : memref<288x256xbf16, #tpu.memory_space<vmem>>, vector<32x256xbf16>
    tpu.vector_store %arg10[%c0_2, %c0_3], %15 {strides = array<i32>} : memref<288x256xbf16, #tpu.memory_space<vmem>>, vector<32x256xbf16>,
    %c16_i32_4 = arith.constant 16 : i32
    %17 = tpu.dynamic_rotate %4 by %c16_i32_4 dim 1 : vector<32x256xf32>, i32 -> vector<32x256xf32>
    %c16_i32_5 = arith.constant 16 : i32
    %18 = vector.broadcast %c16_i32_5 : i32 to vector<1x256xi32>
    %19 = arith.cmpi sge, %0, %18 : vector<1x256xi32>
    %cst_6 = arith.constant 0.000000e+00 : f32
    %20 = vector.shape_cast %19 : vector<1x256xi1> to vector<1x256xi1>
    %21 = vector.broadcast %20 : vector<1x256xi1> to vector<32x256xi1>
    %22 = vector.broadcast %cst_6 : f32 to vector<32x256xf32>
    %23 = arith.select %21, %17, %22 : vector<32x256xi1>, vector<32x256xf32>
    %24 = arith.truncf %23 : vector<32x256xf32> to vector<32x256xbf16>
    %c32 = arith.constant 32 : index
    %c0_7 = arith.constant 0 : index
    %25 = vector.load %arg10[%c32, %c0_7] : memref<288x256xbf16, #tpu.memory_space<vmem>>, vector<32x256xbf16>
    tpu.vector_store %arg10[%c32, %c0_7], %24 {strides = array<i32>} : memref<288x256xbf16, #tpu.memory_space<vmem>>, vector<32x256xbf16>,
    %c15_i32_8 = arith.constant 15 : i32
    %26 = tpu.dynamic_rotate %4 by %c15_i32_8 dim 1 : vector<32x256xf32>, i32 -> vector<32x256xf32>
    %c15_i32_9 = arith.constant 15 : i32
    %27 = vector.broadcast %c15_i32_9 : i32 to vector<1x256xi32>
    %28 = arith.cmpi slt, %2, %27 : vector<1x256xi32>
    %c16_i32_10 = arith.constant 16 : i32
    %29 = vector.broadcast %c16_i32_10 : i32 to vector<1x256xi32>
    %30 = arith.cmpi sge, %0, %29 : vector<1x256xi32>
    %31 = arith.andi %28, %30 : vector<1x256xi1>
    %cst_11 = arith.constant 0.000000e+00 : f32
    %32 = vector.shape_cast %31 : vector<1x256xi1> to vector<1x256xi1>
    %33 = vector.broadcast %32 : vector<1x256xi1> to vector<32x256xi1>
    %34 = vector.broadcast %cst_11 : f32 to vector<32x256xf32>
    %35 = arith.select %33, %26, %34 : vector<32x256xi1>, vector<32x256xf32>
    %36 = arith.truncf %35 : vector<32x256xf32> to vector<32x256xbf16>
    %c64 = arith.constant 64 : index
    %c0_12 = arith.constant 0 : index
    %37 = vector.load %arg10[%c64, %c0_12] : memref<288x256xbf16, #tpu.memory_space<vmem>>, vector<32x256xbf16>
    tpu.vector_store %arg10[%c64, %c0_12], %36 {strides = array<i32>} : memref<288x256xbf16, #tpu.memory_space<vmem>>, vector<32x256xbf16>,
    %c1_i32_13 = arith.constant 1 : i32
    %38 = tpu.dynamic_rotate %4 by %c1_i32_13 dim 1 : vector<32x256xf32>, i32 -> vector<32x256xf32>
    %c1_i32_14 = arith.constant 1 : i32
    %39 = vector.broadcast %c1_i32_14 : i32 to vector<1x256xi32>
    %40 = arith.cmpi sge, %2, %39 : vector<1x256xi32>
    %cst_15 = arith.constant 0.000000e+00 : f32
    %41 = vector.shape_cast %40 : vector<1x256xi1> to vector<1x256xi1>
    %42 = vector.broadcast %41 : vector<1x256xi1> to vector<32x256xi1>
    %43 = vector.broadcast %cst_15 : f32 to vector<32x256xf32>
    %44 = arith.select %42, %38, %43 : vector<32x256xi1>, vector<32x256xf32>
    %45 = arith.truncf %44 : vector<32x256xf32> to vector<32x256xbf16>
    %c96 = arith.constant 96 : index
    %c0_16 = arith.constant 0 : index
    %46 = vector.load %arg10[%c96, %c0_16] : memref<288x256xbf16, #tpu.memory_space<vmem>>, vector<32x256xbf16>
    tpu.vector_store %arg10[%c96, %c0_16], %45 {strides = array<i32>} : memref<288x256xbf16, #tpu.memory_space<vmem>>, vector<32x256xbf16>,
    %47 = arith.truncf %4 : vector<32x256xf32> to vector<32x256xbf16>
    %c128 = arith.constant 128 : index
    %c0_17 = arith.constant 0 : index
    %48 = vector.load %arg10[%c128, %c0_17] : memref<288x256xbf16, #tpu.memory_space<vmem>>, vector<32x256xbf16>
    tpu.vector_store %arg10[%c128, %c0_17], %47 {strides = array<i32>} : memref<288x256xbf16, #tpu.memory_space<vmem>>, vector<32x256xbf16>,
    %c255_i32 = arith.constant 255 : i32
    %49 = tpu.dynamic_rotate %4 by %c255_i32 dim 1 : vector<32x256xf32>, i32 -> vector<32x256xf32>
    %c15_i32_18 = arith.constant 15 : i32
    %50 = vector.broadcast %c15_i32_18 : i32 to vector<1x256xi32>
    %51 = arith.cmpi slt, %2, %50 : vector<1x256xi32>
    %cst_19 = arith.constant 0.000000e+00 : f32
    %52 = vector.shape_cast %51 : vector<1x256xi1> to vector<1x256xi1>
    %53 = vector.broadcast %52 : vector<1x256xi1> to vector<32x256xi1>
    %54 = vector.broadcast %cst_19 : f32 to vector<32x256xf32>
    %55 = arith.select %53, %49, %54 : vector<32x256xi1>, vector<32x256xf32>
    %56 = arith.truncf %55 : vector<32x256xf32> to vector<32x256xbf16>
    %c160 = arith.constant 160 : index
    %c0_20 = arith.constant 0 : index
    %57 = vector.load %arg10[%c160, %c0_20] : memref<288x256xbf16, #tpu.memory_space<vmem>>, vector<32x256xbf16>
    tpu.vector_store %arg10[%c160, %c0_20], %56 {strides = array<i32>} : memref<288x256xbf16, #tpu.memory_space<vmem>>, vector<32x256xbf16>,
    %c241_i32 = arith.constant 241 : i32
    %58 = tpu.dynamic_rotate %4 by %c241_i32 dim 1 : vector<32x256xf32>, i32 -> vector<32x256xf32>
    %c1_i32_21 = arith.constant 1 : i32
    %59 = vector.broadcast %c1_i32_21 : i32 to vector<1x256xi32>
    %60 = arith.cmpi sge, %2, %59 : vector<1x256xi32>
    %c240_i32 = arith.constant 240 : i32
    %61 = vector.broadcast %c240_i32 : i32 to vector<1x256xi32>
    %62 = arith.cmpi slt, %0, %61 : vector<1x256xi32>
    %63 = arith.andi %60, %62 : vector<1x256xi1>
    %cst_22 = arith.constant 0.000000e+00 : f32
    %64 = vector.shape_cast %63 : vector<1x256xi1> to vector<1x256xi1>
    %65 = vector.broadcast %64 : vector<1x256xi1> to vector<32x256xi1>
    %66 = vector.broadcast %cst_22 : f32 to vector<32x256xf32>
    %67 = arith.select %65, %58, %66 : vector<32x256xi1>, vector<32x256xf32>
    %68 = arith.truncf %67 : vector<32x256xf32> to vector<32x256xbf16>
    %c192 = arith.constant 192 : index
    %c0_23 = arith.constant 0 : index
    %69 = vector.load %arg10[%c192, %c0_23] : memref<288x256xbf16, #tpu.memory_space<vmem>>, vector<32x256xbf16>
    tpu.vector_store %arg10[%c192, %c0_23], %68 {strides = array<i32>} : memref<288x256xbf16, #tpu.memory_space<vmem>>, vector<32x256xbf16>,
    %c240_i32_24 = arith.constant 240 : i32
    %70 = tpu.dynamic_rotate %4 by %c240_i32_24 dim 1 : vector<32x256xf32>, i32 -> vector<32x256xf32>
    %c240_i32_25 = arith.constant 240 : i32
    %71 = vector.broadcast %c240_i32_25 : i32 to vector<1x256xi32>
    %72 = arith.cmpi slt, %0, %71 : vector<1x256xi32>
    %cst_26 = arith.constant 0.000000e+00 : f32
    %73 = vector.shape_cast %72 : vector<1x256xi1> to vector<1x256xi1>
    %74 = vector.broadcast %73 : vector<1x256xi1> to vector<32x256xi1>
    %75 = vector.broadcast %cst_26 : f32 to vector<32x256xf32>
    %76 = arith.select %74, %70, %75 : vector<32x256xi1>, vector<32x256xf32>
    %77 = arith.truncf %76 : vector<32x256xf32> to vector<32x256xbf16>
    %c224 = arith.constant 224 : index
    %c0_27 = arith.constant 0 : index
    %78 = vector.load %arg10[%c224, %c0_27] : memref<288x256xbf16, #tpu.memory_space<vmem>>, vector<32x256xbf16>
    tpu.vector_store %arg10[%c224, %c0_27], %77 {strides = array<i32>} : memref<288x256xbf16, #tpu.memory_space<vmem>>, vector<32x256xbf16>,
    %c239_i32 = arith.constant 239 : i32
    %79 = tpu.dynamic_rotate %4 by %c239_i32 dim 1 : vector<32x256xf32>, i32 -> vector<32x256xf32>
    %c15_i32_28 = arith.constant 15 : i32
    %80 = vector.broadcast %c15_i32_28 : i32 to vector<1x256xi32>
    %81 = arith.cmpi slt, %2, %80 : vector<1x256xi32>
    %c240_i32_29 = arith.constant 240 : i32
    %82 = vector.broadcast %c240_i32_29 : i32 to vector<1x256xi32>
    %83 = arith.cmpi slt, %0, %82 : vector<1x256xi32>
    %84 = arith.andi %81, %83 : vector<1x256xi1>
    %cst_30 = arith.constant 0.000000e+00 : f32
    %85 = vector.shape_cast %84 : vector<1x256xi1> to vector<1x256xi1>
    %86 = vector.broadcast %85 : vector<1x256xi1> to vector<32x256xi1>
    %87 = vector.broadcast %cst_30 : f32 to vector<32x256xf32>
    %88 = arith.select %86, %79, %87 : vector<32x256xi1>, vector<32x256xf32>
    %89 = arith.truncf %88 : vector<32x256xf32> to vector<32x256xbf16>
    %c256 = arith.constant 256 : index
    %c0_31 = arith.constant 0 : index
    %90 = vector.load %arg10[%c256, %c0_31] : memref<288x256xbf16, #tpu.memory_space<vmem>>, vector<32x256xbf16>
    tpu.vector_store %arg10[%c256, %c0_31], %89 {strides = array<i32>} : memref<288x256xbf16, #tpu.memory_space<vmem>>, vector<32x256xbf16>,
    %c0_32 = arith.constant 0 : index
    %c0_33 = arith.constant 0 : index
    %91 = vector.load %arg2[%c0_32, %c0_33] : memref<32x288xbf16, #tpu.memory_space<vmem>>, vector<32x288xbf16>
    %c0_34 = arith.constant 0 : index
    %c0_35 = arith.constant 0 : index
    %92 = vector.load %arg10[%c0_34, %c0_35] : memref<288x256xbf16, #tpu.memory_space<vmem>>, vector<288x256xbf16>
    %cst_36 = arith.constant dense<0.000000e+00> : vector<32x256xf32>
    %93 = tpu.matmul %91, %92, %cst_36 {dimension_numbers = #tpu.dot_dimension_numbers<[1], [0], [0], [1], [0, 0, 1, 1], [], []>} : vector<32x288xbf16>, vector<288x256xbf16>, vector<32x256xf32> -> vector<32x256xf32>
    %c0_37 = arith.constant 0 : index
    %c0_38 = arith.constant 0 : index
    %94 = vector.load %arg3[%c0_37, %c0_38] : memref<32x1xf32, #tpu.memory_space<vmem>>, vector<32x1xf32>
    %95 = vector.broadcast %94 : vector<32x1xf32> to vector<32x256xf32>
    %96 = arith.addf %93, %95 : vector<32x256xf32>
    %cst_39 = arith.constant 0.000000e+00 : f32
    %97 = vector.broadcast %cst_39 : f32 to vector<32x256xf32>
    %98 = arith.maximumf %96, %97 : vector<32x256xf32>
    %c17_i32_40 = arith.constant 17 : i32
    %99 = tpu.dynamic_rotate %98 by %c17_i32_40 dim 1 : vector<32x256xf32>, i32 -> vector<32x256xf32>
    %c1_i32_41 = arith.constant 1 : i32
    %100 = vector.broadcast %c1_i32_41 : i32 to vector<1x256xi32>
    %101 = arith.cmpi sge, %2, %100 : vector<1x256xi32>
    %c16_i32_42 = arith.constant 16 : i32
    %102 = vector.broadcast %c16_i32_42 : i32 to vector<1x256xi32>
    %103 = arith.cmpi sge, %0, %102 : vector<1x256xi32>
    %104 = arith.andi %101, %103 : vector<1x256xi1>
    %cst_43 = arith.constant 0.000000e+00 : f32
    %105 = vector.shape_cast %104 : vector<1x256xi1> to vector<1x256xi1>
    %106 = vector.broadcast %105 : vector<1x256xi1> to vector<32x256xi1>
    %107 = vector.broadcast %cst_43 : f32 to vector<32x256xf32>
    %108 = arith.select %106, %99, %107 : vector<32x256xi1>, vector<32x256xf32>
    %109 = arith.truncf %108 : vector<32x256xf32> to vector<32x256xbf16>
    %c0_44 = arith.constant 0 : index
    %c0_45 = arith.constant 0 : index
    %110 = vector.load %arg10[%c0_44, %c0_45] : memref<288x256xbf16, #tpu.memory_space<vmem>>, vector<32x256xbf16>
    tpu.vector_store %arg10[%c0_44, %c0_45], %109 {strides = array<i32>} : memref<288x256xbf16, #tpu.memory_space<vmem>>, vector<32x256xbf16>,
    %c16_i32_46 = arith.constant 16 : i32
    %111 = tpu.dynamic_rotate %98 by %c16_i32_46 dim 1 : vector<32x256xf32>, i32 -> vector<32x256xf32>
    %c16_i32_47 = arith.constant 16 : i32
    %112 = vector.broadcast %c16_i32_47 : i32 to vector<1x256xi32>
    %113 = arith.cmpi sge, %0, %112 : vector<1x256xi32>
    %cst_48 = arith.constant 0.000000e+00 : f32
    %114 = vector.shape_cast %113 : vector<1x256xi1> to vector<1x256xi1>
    %115 = vector.broadcast %114 : vector<1x256xi1> to vector<32x256xi1>
    %116 = vector.broadcast %cst_48 : f32 to vector<32x256xf32>
    %117 = arith.select %115, %111, %116 : vector<32x256xi1>, vector<32x256xf32>
    %118 = arith.truncf %117 : vector<32x256xf32> to vector<32x256xbf16>
    %c32_49 = arith.constant 32 : index
    %c0_50 = arith.constant 0 : index
    %119 = vector.load %arg10[%c32_49, %c0_50] : memref<288x256xbf16, #tpu.memory_space<vmem>>, vector<32x256xbf16>
    tpu.vector_store %arg10[%c32_49, %c0_50], %118 {strides = array<i32>} : memref<288x256xbf16, #tpu.memory_space<vmem>>, vector<32x256xbf16>,
    %c15_i32_51 = arith.constant 15 : i32
    %120 = tpu.dynamic_rotate %98 by %c15_i32_51 dim 1 : vector<32x256xf32>, i32 -> vector<32x256xf32>
    %c15_i32_52 = arith.constant 15 : i32
    %121 = vector.broadcast %c15_i32_52 : i32 to vector<1x256xi32>
    %122 = arith.cmpi slt, %2, %121 : vector<1x256xi32>
    %c16_i32_53 = arith.constant 16 : i32
    %123 = vector.broadcast %c16_i32_53 : i32 to vector<1x256xi32>
    %124 = arith.cmpi sge, %0, %123 : vector<1x256xi32>
    %125 = arith.andi %122, %124 : vector<1x256xi1>
    %cst_54 = arith.constant 0.000000e+00 : f32
    %126 = vector.shape_cast %125 : vector<1x256xi1> to vector<1x256xi1>
    %127 = vector.broadcast %126 : vector<1x256xi1> to vector<32x256xi1>
    %128 = vector.broadcast %cst_54 : f32 to vector<32x256xf32>
    %129 = arith.select %127, %120, %128 : vector<32x256xi1>, vector<32x256xf32>
    %130 = arith.truncf %129 : vector<32x256xf32> to vector<32x256xbf16>
    %c64_55 = arith.constant 64 : index
    %c0_56 = arith.constant 0 : index
    %131 = vector.load %arg10[%c64_55, %c0_56] : memref<288x256xbf16, #tpu.memory_space<vmem>>, vector<32x256xbf16>
    tpu.vector_store %arg10[%c64_55, %c0_56], %130 {strides = array<i32>} : memref<288x256xbf16, #tpu.memory_space<vmem>>, vector<32x256xbf16>,
    %c1_i32_57 = arith.constant 1 : i32
    %132 = tpu.dynamic_rotate %98 by %c1_i32_57 dim 1 : vector<32x256xf32>, i32 -> vector<32x256xf32>
    %c1_i32_58 = arith.constant 1 : i32
    %133 = vector.broadcast %c1_i32_58 : i32 to vector<1x256xi32>
    %134 = arith.cmpi sge, %2, %133 : vector<1x256xi32>
    %cst_59 = arith.constant 0.000000e+00 : f32
    %135 = vector.shape_cast %134 : vector<1x256xi1> to vector<1x256xi1>
    %136 = vector.broadcast %135 : vector<1x256xi1> to vector<32x256xi1>
    %137 = vector.broadcast %cst_59 : f32 to vector<32x256xf32>
    %138 = arith.select %136, %132, %137 : vector<32x256xi1>, vector<32x256xf32>
    %139 = arith.truncf %138 : vector<32x256xf32> to vector<32x256xbf16>
    %c96_60 = arith.constant 96 : index
    %c0_61 = arith.constant 0 : index
    %140 = vector.load %arg10[%c96_60, %c0_61] : memref<288x256xbf16, #tpu.memory_space<vmem>>, vector<32x256xbf16>
    tpu.vector_store %arg10[%c96_60, %c0_61], %139 {strides = array<i32>} : memref<288x256xbf16, #tpu.memory_space<vmem>>, vector<32x256xbf16>,
    %141 = arith.truncf %98 : vector<32x256xf32> to vector<32x256xbf16>
    %c128_62 = arith.constant 128 : index
    %c0_63 = arith.constant 0 : index
    %142 = vector.load %arg10[%c128_62, %c0_63] : memref<288x256xbf16, #tpu.memory_space<vmem>>, vector<32x256xbf16>
    tpu.vector_store %arg10[%c128_62, %c0_63], %141 {strides = array<i32>} : memref<288x256xbf16, #tpu.memory_space<vmem>>, vector<32x256xbf16>,
    %c255_i32_64 = arith.constant 255 : i32
    %143 = tpu.dynamic_rotate %98 by %c255_i32_64 dim 1 : vector<32x256xf32>, i32 -> vector<32x256xf32>
    %c15_i32_65 = arith.constant 15 : i32
    %144 = vector.broadcast %c15_i32_65 : i32 to vector<1x256xi32>
    %145 = arith.cmpi slt, %2, %144 : vector<1x256xi32>
    %cst_66 = arith.constant 0.000000e+00 : f32
    %146 = vector.shape_cast %145 : vector<1x256xi1> to vector<1x256xi1>
    %147 = vector.broadcast %146 : vector<1x256xi1> to vector<32x256xi1>
    %148 = vector.broadcast %cst_66 : f32 to vector<32x256xf32>
    %149 = arith.select %147, %143, %148 : vector<32x256xi1>, vector<32x256xf32>
    %150 = arith.truncf %149 : vector<32x256xf32> to vector<32x256xbf16>
    %c160_67 = arith.constant 160 : index
    %c0_68 = arith.constant 0 : index
    %151 = vector.load %arg10[%c160_67, %c0_68] : memref<288x256xbf16, #tpu.memory_space<vmem>>, vector<32x256xbf16>
    tpu.vector_store %arg10[%c160_67, %c0_68], %150 {strides = array<i32>} : memref<288x256xbf16, #tpu.memory_space<vmem>>, vector<32x256xbf16>,
    %c241_i32_69 = arith.constant 241 : i32
    %152 = tpu.dynamic_rotate %98 by %c241_i32_69 dim 1 : vector<32x256xf32>, i32 -> vector<32x256xf32>
    %c1_i32_70 = arith.constant 1 : i32
    %153 = vector.broadcast %c1_i32_70 : i32 to vector<1x256xi32>
    %154 = arith.cmpi sge, %2, %153 : vector<1x256xi32>
    %c240_i32_71 = arith.constant 240 : i32
    %155 = vector.broadcast %c240_i32_71 : i32 to vector<1x256xi32>
    %156 = arith.cmpi slt, %0, %155 : vector<1x256xi32>
    %157 = arith.andi %154, %156 : vector<1x256xi1>
    %cst_72 = arith.constant 0.000000e+00 : f32
    %158 = vector.shape_cast %157 : vector<1x256xi1> to vector<1x256xi1>
    %159 = vector.broadcast %158 : vector<1x256xi1> to vector<32x256xi1>
    %160 = vector.broadcast %cst_72 : f32 to vector<32x256xf32>
    %161 = arith.select %159, %152, %160 : vector<32x256xi1>, vector<32x256xf32>
    %162 = arith.truncf %161 : vector<32x256xf32> to vector<32x256xbf16>
    %c192_73 = arith.constant 192 : index
    %c0_74 = arith.constant 0 : index
    %163 = vector.load %arg10[%c192_73, %c0_74] : memref<288x256xbf16, #tpu.memory_space<vmem>>, vector<32x256xbf16>
    tpu.vector_store %arg10[%c192_73, %c0_74], %162 {strides = array<i32>} : memref<288x256xbf16, #tpu.memory_space<vmem>>, vector<32x256xbf16>,
    %c240_i32_75 = arith.constant 240 : i32
    %164 = tpu.dynamic_rotate %98 by %c240_i32_75 dim 1 : vector<32x256xf32>, i32 -> vector<32x256xf32>
    %c240_i32_76 = arith.constant 240 : i32
    %165 = vector.broadcast %c240_i32_76 : i32 to vector<1x256xi32>
    %166 = arith.cmpi slt, %0, %165 : vector<1x256xi32>
    %cst_77 = arith.constant 0.000000e+00 : f32
    %167 = vector.shape_cast %166 : vector<1x256xi1> to vector<1x256xi1>
    %168 = vector.broadcast %167 : vector<1x256xi1> to vector<32x256xi1>
    %169 = vector.broadcast %cst_77 : f32 to vector<32x256xf32>
    %170 = arith.select %168, %164, %169 : vector<32x256xi1>, vector<32x256xf32>
    %171 = arith.truncf %170 : vector<32x256xf32> to vector<32x256xbf16>
    %c224_78 = arith.constant 224 : index
    %c0_79 = arith.constant 0 : index
    %172 = vector.load %arg10[%c224_78, %c0_79] : memref<288x256xbf16, #tpu.memory_space<vmem>>, vector<32x256xbf16>
    tpu.vector_store %arg10[%c224_78, %c0_79], %171 {strides = array<i32>} : memref<288x256xbf16, #tpu.memory_space<vmem>>, vector<32x256xbf16>,
    %c239_i32_80 = arith.constant 239 : i32
    %173 = tpu.dynamic_rotate %98 by %c239_i32_80 dim 1 : vector<32x256xf32>, i32 -> vector<32x256xf32>
    %c15_i32_81 = arith.constant 15 : i32
    %174 = vector.broadcast %c15_i32_81 : i32 to vector<1x256xi32>
    %175 = arith.cmpi slt, %2, %174 : vector<1x256xi32>
    %c240_i32_82 = arith.constant 240 : i32
    %176 = vector.broadcast %c240_i32_82 : i32 to vector<1x256xi32>
    %177 = arith.cmpi slt, %0, %176 : vector<1x256xi32>
    %178 = arith.andi %175, %177 : vector<1x256xi1>
    %cst_83 = arith.constant 0.000000e+00 : f32
    %179 = vector.shape_cast %178 : vector<1x256xi1> to vector<1x256xi1>
    %180 = vector.broadcast %179 : vector<1x256xi1> to vector<32x256xi1>
    %181 = vector.broadcast %cst_83 : f32 to vector<32x256xf32>
    %182 = arith.select %180, %173, %181 : vector<32x256xi1>, vector<32x256xf32>
    %183 = arith.truncf %182 : vector<32x256xf32> to vector<32x256xbf16>
    %c256_84 = arith.constant 256 : index
    %c0_85 = arith.constant 0 : index
    %184 = vector.load %arg10[%c256_84, %c0_85] : memref<288x256xbf16, #tpu.memory_space<vmem>>, vector<32x256xbf16>
    tpu.vector_store %arg10[%c256_84, %c0_85], %183 {strides = array<i32>} : memref<288x256xbf16, #tpu.memory_space<vmem>>, vector<32x256xbf16>,
    %c0_86 = arith.constant 0 : index
    %c0_87 = arith.constant 0 : index
    %185 = vector.load %arg4[%c0_86, %c0_87] : memref<32x288xbf16, #tpu.memory_space<vmem>>, vector<32x288xbf16>
    %c0_88 = arith.constant 0 : index
    %c0_89 = arith.constant 0 : index
    %186 = vector.load %arg10[%c0_88, %c0_89] : memref<288x256xbf16, #tpu.memory_space<vmem>>, vector<288x256xbf16>
    %cst_90 = arith.constant dense<0.000000e+00> : vector<32x256xf32>
    %187 = tpu.matmul %185, %186, %cst_90 {dimension_numbers = #tpu.dot_dimension_numbers<[1], [0], [0], [1], [0, 0, 1, 1], [], []>} : vector<32x288xbf16>, vector<288x256xbf16>, vector<32x256xf32> -> vector<32x256xf32>
    %c0_91 = arith.constant 0 : index
    %c0_92 = arith.constant 0 : index
    %188 = vector.load %arg5[%c0_91, %c0_92] : memref<32x1xf32, #tpu.memory_space<vmem>>, vector<32x1xf32>
    %189 = vector.broadcast %188 : vector<32x1xf32> to vector<32x256xf32>
    %190 = arith.addf %187, %189 : vector<32x256xf32>
    %c0_93 = arith.constant 0 : index
    %c0_94 = arith.constant 0 : index
    %191 = vector.load %arg6[%c0_93, %c0_94] : memref<32x2xf32, #tpu.memory_space<vmem>>, vector<32x2xf32>
    %c0_95 = arith.constant 0 : index
    %c0_96 = arith.constant 0 : index
    %192 = vector.load %arg7[%c0_95, %c0_96] : memref<32x2xf32, #tpu.memory_space<vmem>>, vector<32x2xf32>
    %cst_97 = arith.constant dense<0.000000e+00> : vector<32xf32>
    %193 = vector.multi_reduction <add>, %190, %cst_97 [1] : vector<32x256xf32> to vector<32xf32>
    %194 = vector.shape_cast %193 : vector<32xf32> to vector<32x1xf32>
    %cst_98 = arith.constant 2.560000e+02 : f32
    %195 = vector.broadcast %cst_98 : f32 to vector<32x1xf32>
    %196 = arith.divf %194, %195 : vector<32x1xf32>
    %197 = vector.broadcast %196 : vector<32x1xf32> to vector<32x2xf32>
    %198 = arith.mulf %191, %197 : vector<32x2xf32>
    %cst_99 = arith.constant dense<0.000000e+00> : vector<2xf32>
    %199 = vector.multi_reduction <add>, %198, %cst_99 [0] : vector<32x2xf32> to vector<2xf32>
    %200 = vector.shape_cast %199 : vector<2xf32> to vector<1x2xf32>
    %cst_100 = arith.constant 0.000000e+00 : f32
    %201 = vector.broadcast %cst_100 : f32 to vector<1x2xf32>
    %202 = arith.maximumf %200, %201 : vector<1x2xf32>
    %203 = vector.broadcast %202 : vector<1x2xf32> to vector<32x2xf32>
    %204 = arith.mulf %192, %203 : vector<32x2xf32>
    %cst_101 = arith.constant dense<0.000000e+00> : vector<32xf32>
    %205 = vector.multi_reduction <add>, %204, %cst_101 [1] : vector<32x2xf32> to vector<32xf32>
    %206 = vector.shape_cast %205 : vector<32xf32> to vector<32x1xf32>
    %cst_102 = arith.constant dense<0xFF800000> : vector<32xf32>
    %207 = vector.multi_reduction <maximumf>, %190, %cst_102 [1] : vector<32x256xf32> to vector<32xf32>
    %208 = vector.shape_cast %207 : vector<32xf32> to vector<32x1xf32>
    %209 = vector.broadcast %208 : vector<32x1xf32> to vector<32x2xf32>
    %210 = arith.mulf %191, %209 : vector<32x2xf32>
    %cst_103 = arith.constant dense<0.000000e+00> : vector<2xf32>
    %211 = vector.multi_reduction <add>, %210, %cst_103 [0] : vector<32x2xf32> to vector<2xf32>
    %212 = vector.shape_cast %211 : vector<2xf32> to vector<1x2xf32>
    %cst_104 = arith.constant 0.000000e+00 : f32
    %213 = vector.broadcast %cst_104 : f32 to vector<1x2xf32>
    %214 = arith.maximumf %212, %213 : vector<1x2xf32>
    %215 = vector.broadcast %214 : vector<1x2xf32> to vector<32x2xf32>
    %216 = arith.mulf %192, %215 : vector<32x2xf32>
    %cst_105 = arith.constant dense<0.000000e+00> : vector<32xf32>
    %217 = vector.multi_reduction <add>, %216, %cst_105 [1] : vector<32x2xf32> to vector<32xf32>
    %218 = vector.shape_cast %217 : vector<32xf32> to vector<32x1xf32>
    %219 = arith.addf %206, %218 : vector<32x1xf32>
    %220 = arith.negf %219 : vector<32x1xf32>
    %221 = math.exp %220 : vector<32x1xf32>
    %cst_106 = arith.constant 1.000000e+00 : f32
    %222 = vector.broadcast %cst_106 : f32 to vector<32x1xf32>
    %223 = arith.addf %222, %221 : vector<32x1xf32>
    %224 = arith.divf %222, %223 : vector<32x1xf32>
    %225 = vector.broadcast %224 : vector<32x1xf32> to vector<32x256xf32>
    %226 = arith.mulf %190, %225 : vector<32x256xf32>
    %cst_107 = arith.constant dense<0.000000e+00> : vector<256xf32>
    %227 = vector.multi_reduction <add>, %226, %cst_107 [0] : vector<32x256xf32> to vector<256xf32>
    %228 = vector.shape_cast %227 : vector<256xf32> to vector<1x256xf32>
    %cst_108 = arith.constant 3.200000e+01 : f32
    %229 = vector.broadcast %cst_108 : f32 to vector<1x256xf32>
    %230 = arith.divf %228, %229 : vector<1x256xf32>
    %cst_109 = arith.constant dense<0xFF800000> : vector<256xf32>
    %231 = vector.multi_reduction <maximumf>, %226, %cst_109 [0] : vector<32x256xf32> to vector<256xf32>
    %232 = vector.shape_cast %231 : vector<256xf32> to vector<1x256xf32>
    %cst_110 = arith.constant 0.000000e+00 : f32
    %233 = vector.broadcast %cst_110 : f32 to vector<1x256xf32>
    %cst_111 = arith.constant 0.000000e+00 : f32
    %234 = vector.broadcast %cst_111 : f32 to vector<1x256xf32>
    %cst_112 = arith.constant 0.000000e+00 : f32
    %235 = vector.broadcast %cst_112 : f32 to vector<1x256xf32>
    %cst_113 = arith.constant 0.000000e+00 : f32
    %236 = vector.broadcast %cst_113 : f32 to vector<1x256xf32>
    %c51_i32 = arith.constant 51 : i32
    %237 = tpu.dynamic_rotate %230 by %c51_i32 dim 1 : vector<1x256xf32>, i32 -> vector<1x256xf32>
    %c0_114 = arith.constant 0 : index
    %238 = memref.load %arg8[%c0_114] : memref<98xf32, #tpu.memory_space<smem>>
    %239 = vector.broadcast %238 : f32 to vector<1x256xf32>
    %240 = arith.mulf %237, %239 : vector<1x256xf32>
    %c51_i32_115 = arith.constant 51 : i32
    %241 = tpu.dynamic_rotate %232 by %c51_i32_115 dim 1 : vector<1x256xf32>, i32 -> vector<1x256xf32>
    %c49 = arith.constant 49 : index
    %242 = memref.load %arg8[%c49] : memref<98xf32, #tpu.memory_space<smem>>
    %243 = vector.broadcast %242 : f32 to vector<1x256xf32>
    %244 = arith.mulf %241, %243 : vector<1x256xf32>
    %245 = arith.addf %240, %244 : vector<1x256xf32>
    %c3_i32 = arith.constant 3 : i32
    %246 = vector.broadcast %c3_i32 : i32 to vector<1x256xi32>
    %247 = arith.cmpi sge, %2, %246 : vector<1x256xi32>
    %c48_i32 = arith.constant 48 : i32
    %248 = vector.broadcast %c48_i32 : i32 to vector<1x256xi32>
    %249 = arith.cmpi sge, %0, %248 : vector<1x256xi32>
    %250 = arith.andi %247, %249 : vector<1x256xi1>
    %cst_116 = arith.constant 0.000000e+00 : f32
    %251 = vector.broadcast %cst_116 : f32 to vector<1x256xf32>
    %252 = arith.select %250, %245, %251 : vector<1x256xi1>, vector<1x256xf32>
    %253 = arith.addf %233, %252 : vector<1x256xf32>
    %c50_i32 = arith.constant 50 : i32
    %254 = tpu.dynamic_rotate %230 by %c50_i32 dim 1 : vector<1x256xf32>, i32 -> vector<1x256xf32>
    %c1 = arith.constant 1 : index
    %255 = memref.load %arg8[%c1] : memref<98xf32, #tpu.memory_space<smem>>
    %256 = vector.broadcast %255 : f32 to vector<1x256xf32>
    %257 = arith.mulf %254, %256 : vector<1x256xf32>
    %c50_i32_117 = arith.constant 50 : i32
    %258 = tpu.dynamic_rotate %232 by %c50_i32_117 dim 1 : vector<1x256xf32>, i32 -> vector<1x256xf32>
    %c50 = arith.constant 50 : index
    %259 = memref.load %arg8[%c50] : memref<98xf32, #tpu.memory_space<smem>>
    %260 = vector.broadcast %259 : f32 to vector<1x256xf32>
    %261 = arith.mulf %258, %260 : vector<1x256xf32>
    %262 = arith.addf %257, %261 : vector<1x256xf32>
    %c2_i32 = arith.constant 2 : i32
    %263 = vector.broadcast %c2_i32 : i32 to vector<1x256xi32>
    %264 = arith.cmpi sge, %2, %263 : vector<1x256xi32>
    %c48_i32_118 = arith.constant 48 : i32
    %265 = vector.broadcast %c48_i32_118 : i32 to vector<1x256xi32>
    %266 = arith.cmpi sge, %0, %265 : vector<1x256xi32>
    %267 = arith.andi %264, %266 : vector<1x256xi1>
    %cst_119 = arith.constant 0.000000e+00 : f32
    %268 = vector.broadcast %cst_119 : f32 to vector<1x256xf32>
    %269 = arith.select %267, %262, %268 : vector<1x256xi1>, vector<1x256xf32>
    %270 = arith.addf %234, %269 : vector<1x256xf32>
    %c49_i32 = arith.constant 49 : i32
    %271 = tpu.dynamic_rotate %230 by %c49_i32 dim 1 : vector<1x256xf32>, i32 -> vector<1x256xf32>
    %c2 = arith.constant 2 : index
    %272 = memref.load %arg8[%c2] : memref<98xf32, #tpu.memory_space<smem>>
    %273 = vector.broadcast %272 : f32 to vector<1x256xf32>
    %274 = arith.mulf %271, %273 : vector<1x256xf32>
    %c49_i32_120 = arith.constant 49 : i32
    %275 = tpu.dynamic_rotate %232 by %c49_i32_120 dim 1 : vector<1x256xf32>, i32 -> vector<1x256xf32>
    %c51 = arith.constant 51 : index
    %276 = memref.load %arg8[%c51] : memref<98xf32, #tpu.memory_space<smem>>
    %277 = vector.broadcast %276 : f32 to vector<1x256xf32>
    %278 = arith.mulf %275, %277 : vector<1x256xf32>
    %279 = arith.addf %274, %278 : vector<1x256xf32>
    %c1_i32_121 = arith.constant 1 : i32
    %280 = vector.broadcast %c1_i32_121 : i32 to vector<1x256xi32>
    %281 = arith.cmpi sge, %2, %280 : vector<1x256xi32>
    %c48_i32_122 = arith.constant 48 : i32
    %282 = vector.broadcast %c48_i32_122 : i32 to vector<1x256xi32>
    %283 = arith.cmpi sge, %0, %282 : vector<1x256xi32>
    %284 = arith.andi %281, %283 : vector<1x256xi1>
    %cst_123 = arith.constant 0.000000e+00 : f32
    %285 = vector.broadcast %cst_123 : f32 to vector<1x256xf32>
    %286 = arith.select %284, %279, %285 : vector<1x256xi1>, vector<1x256xf32>
    %287 = arith.addf %235, %286 : vector<1x256xf32>
    %c48_i32_124 = arith.constant 48 : i32
    %288 = tpu.dynamic_rotate %230 by %c48_i32_124 dim 1 : vector<1x256xf32>, i32 -> vector<1x256xf32>
    %c3 = arith.constant 3 : index
    %289 = memref.load %arg8[%c3] : memref<98xf32, #tpu.memory_space<smem>>
    %290 = vector.broadcast %289 : f32 to vector<1x256xf32>
    %291 = arith.mulf %288, %290 : vector<1x256xf32>
    %c48_i32_125 = arith.constant 48 : i32
    %292 = tpu.dynamic_rotate %232 by %c48_i32_125 dim 1 : vector<1x256xf32>, i32 -> vector<1x256xf32>
    %c52 = arith.constant 52 : index
    %293 = memref.load %arg8[%c52] : memref<98xf32, #tpu.memory_space<smem>>
    %294 = vector.broadcast %293 : f32 to vector<1x256xf32>
    %295 = arith.mulf %292, %294 : vector<1x256xf32>
    %296 = arith.addf %291, %295 : vector<1x256xf32>
    %c48_i32_126 = arith.constant 48 : i32
    %297 = vector.broadcast %c48_i32_126 : i32 to vector<1x256xi32>
    %298 = arith.cmpi sge, %0, %297 : vector<1x256xi32>
    %cst_127 = arith.constant 0.000000e+00 : f32
    %299 = vector.broadcast %cst_127 : f32 to vector<1x256xf32>
    %300 = arith.select %298, %296, %299 : vector<1x256xi1>, vector<1x256xf32>
    %301 = arith.addf %236, %300 : vector<1x256xf32>
    %c47_i32 = arith.constant 47 : i32
    %302 = tpu.dynamic_rotate %230 by %c47_i32 dim 1 : vector<1x256xf32>, i32 -> vector<1x256xf32>
    %c4 = arith.constant 4 : index
    %303 = memref.load %arg8[%c4] : memref<98xf32, #tpu.memory_space<smem>>
    %304 = vector.broadcast %303 : f32 to vector<1x256xf32>
    %305 = arith.mulf %302, %304 : vector<1x256xf32>
    %c47_i32_128 = arith.constant 47 : i32
    %306 = tpu.dynamic_rotate %232 by %c47_i32_128 dim 1 : vector<1x256xf32>, i32 -> vector<1x256xf32>
    %c53 = arith.constant 53 : index
    %307 = memref.load %arg8[%c53] : memref<98xf32, #tpu.memory_space<smem>>
    %308 = vector.broadcast %307 : f32 to vector<1x256xf32>
    %309 = arith.mulf %306, %308 : vector<1x256xf32>
    %310 = arith.addf %305, %309 : vector<1x256xf32>
    %c15_i32_129 = arith.constant 15 : i32
    %311 = vector.broadcast %c15_i32_129 : i32 to vector<1x256xi32>
    %312 = arith.cmpi slt, %2, %311 : vector<1x256xi32>
    %c48_i32_130 = arith.constant 48 : i32
    %313 = vector.broadcast %c48_i32_130 : i32 to vector<1x256xi32>
    %314 = arith.cmpi sge, %0, %313 : vector<1x256xi32>
    %315 = arith.andi %312, %314 : vector<1x256xi1>
    %cst_131 = arith.constant 0.000000e+00 : f32
    %316 = vector.broadcast %cst_131 : f32 to vector<1x256xf32>
    %317 = arith.select %315, %310, %316 : vector<1x256xi1>, vector<1x256xf32>
    %318 = arith.addf %253, %317 : vector<1x256xf32>
    %c46_i32 = arith.constant 46 : i32
    %319 = tpu.dynamic_rotate %230 by %c46_i32 dim 1 : vector<1x256xf32>, i32 -> vector<1x256xf32>
    %c5 = arith.constant 5 : index
    %320 = memref.load %arg8[%c5] : memref<98xf32, #tpu.memory_space<smem>>
    %321 = vector.broadcast %320 : f32 to vector<1x256xf32>
    %322 = arith.mulf %319, %321 : vector<1x256xf32>
    %c46_i32_132 = arith.constant 46 : i32
    %323 = tpu.dynamic_rotate %232 by %c46_i32_132 dim 1 : vector<1x256xf32>, i32 -> vector<1x256xf32>
    %c54 = arith.constant 54 : index
    %324 = memref.load %arg8[%c54] : memref<98xf32, #tpu.memory_space<smem>>
    %325 = vector.broadcast %324 : f32 to vector<1x256xf32>
    %326 = arith.mulf %323, %325 : vector<1x256xf32>
    %327 = arith.addf %322, %326 : vector<1x256xf32>
    %c14_i32 = arith.constant 14 : i32
    %328 = vector.broadcast %c14_i32 : i32 to vector<1x256xi32>
    %329 = arith.cmpi slt, %2, %328 : vector<1x256xi32>
    %c48_i32_133 = arith.constant 48 : i32
    %330 = vector.broadcast %c48_i32_133 : i32 to vector<1x256xi32>
    %331 = arith.cmpi sge, %0, %330 : vector<1x256xi32>
    %332 = arith.andi %329, %331 : vector<1x256xi1>
    %cst_134 = arith.constant 0.000000e+00 : f32
    %333 = vector.broadcast %cst_134 : f32 to vector<1x256xf32>
    %334 = arith.select %332, %327, %333 : vector<1x256xi1>, vector<1x256xf32>
    %335 = arith.addf %270, %334 : vector<1x256xf32>
    %c45_i32 = arith.constant 45 : i32
    %336 = tpu.dynamic_rotate %230 by %c45_i32 dim 1 : vector<1x256xf32>, i32 -> vector<1x256xf32>
    %c6 = arith.constant 6 : index
    %337 = memref.load %arg8[%c6] : memref<98xf32, #tpu.memory_space<smem>>
    %338 = vector.broadcast %337 : f32 to vector<1x256xf32>
    %339 = arith.mulf %336, %338 : vector<1x256xf32>
    %c45_i32_135 = arith.constant 45 : i32
    %340 = tpu.dynamic_rotate %232 by %c45_i32_135 dim 1 : vector<1x256xf32>, i32 -> vector<1x256xf32>
    %c55 = arith.constant 55 : index
    %341 = memref.load %arg8[%c55] : memref<98xf32, #tpu.memory_space<smem>>
    %342 = vector.broadcast %341 : f32 to vector<1x256xf32>
    %343 = arith.mulf %340, %342 : vector<1x256xf32>
    %344 = arith.addf %339, %343 : vector<1x256xf32>
    %c13_i32 = arith.constant 13 : i32
    %345 = vector.broadcast %c13_i32 : i32 to vector<1x256xi32>
    %346 = arith.cmpi slt, %2, %345 : vector<1x256xi32>
    %c48_i32_136 = arith.constant 48 : i32
    %347 = vector.broadcast %c48_i32_136 : i32 to vector<1x256xi32>
    %348 = arith.cmpi sge, %0, %347 : vector<1x256xi32>
    %349 = arith.andi %346, %348 : vector<1x256xi1>
    %cst_137 = arith.constant 0.000000e+00 : f32
    %350 = vector.broadcast %cst_137 : f32 to vector<1x256xf32>
    %351 = arith.select %349, %344, %350 : vector<1x256xi1>, vector<1x256xf32>
    %352 = arith.addf %287, %351 : vector<1x256xf32>
    %c35_i32 = arith.constant 35 : i32
    %353 = tpu.dynamic_rotate %230 by %c35_i32 dim 1 : vector<1x256xf32>, i32 -> vector<1x256xf32>
    %c7 = arith.constant 7 : index
    %354 = memref.load %arg8[%c7] : memref<98xf32, #tpu.memory_space<smem>>
    %355 = vector.broadcast %354 : f32 to vector<1x256xf32>
    %356 = arith.mulf %353, %355 : vector<1x256xf32>
    %c35_i32_138 = arith.constant 35 : i32
    %357 = tpu.dynamic_rotate %232 by %c35_i32_138 dim 1 : vector<1x256xf32>, i32 -> vector<1x256xf32>
    %c56 = arith.constant 56 : index
    %358 = memref.load %arg8[%c56] : memref<98xf32, #tpu.memory_space<smem>>
    %359 = vector.broadcast %358 : f32 to vector<1x256xf32>
    %360 = arith.mulf %357, %359 : vector<1x256xf32>
    %361 = arith.addf %356, %360 : vector<1x256xf32>
    %c3_i32_139 = arith.constant 3 : i32
    %362 = vector.broadcast %c3_i32_139 : i32 to vector<1x256xi32>
    %363 = arith.cmpi sge, %2, %362 : vector<1x256xi32>
    %c32_i32 = arith.constant 32 : i32
    %364 = vector.broadcast %c32_i32 : i32 to vector<1x256xi32>
    %365 = arith.cmpi sge, %0, %364 : vector<1x256xi32>
    %366 = arith.andi %363, %365 : vector<1x256xi1>
    %cst_140 = arith.constant 0.000000e+00 : f32
    %367 = vector.broadcast %cst_140 : f32 to vector<1x256xf32>
    %368 = arith.select %366, %361, %367 : vector<1x256xi1>, vector<1x256xf32>
    %369 = arith.addf %301, %368 : vector<1x256xf32>
    %c34_i32 = arith.constant 34 : i32
    %370 = tpu.dynamic_rotate %230 by %c34_i32 dim 1 : vector<1x256xf32>, i32 -> vector<1x256xf32>
    %c8 = arith.constant 8 : index
    %371 = memref.load %arg8[%c8] : memref<98xf32, #tpu.memory_space<smem>>
    %372 = vector.broadcast %371 : f32 to vector<1x256xf32>
    %373 = arith.mulf %370, %372 : vector<1x256xf32>
    %c34_i32_141 = arith.constant 34 : i32
    %374 = tpu.dynamic_rotate %232 by %c34_i32_141 dim 1 : vector<1x256xf32>, i32 -> vector<1x256xf32>
    %c57 = arith.constant 57 : index
    %375 = memref.load %arg8[%c57] : memref<98xf32, #tpu.memory_space<smem>>
    %376 = vector.broadcast %375 : f32 to vector<1x256xf32>
    %377 = arith.mulf %374, %376 : vector<1x256xf32>
    %378 = arith.addf %373, %377 : vector<1x256xf32>
    %c2_i32_142 = arith.constant 2 : i32
    %379 = vector.broadcast %c2_i32_142 : i32 to vector<1x256xi32>
    %380 = arith.cmpi sge, %2, %379 : vector<1x256xi32>
    %c32_i32_143 = arith.constant 32 : i32
    %381 = vector.broadcast %c32_i32_143 : i32 to vector<1x256xi32>
    %382 = arith.cmpi sge, %0, %381 : vector<1x256xi32>
    %383 = arith.andi %380, %382 : vector<1x256xi1>
    %cst_144 = arith.constant 0.000000e+00 : f32
    %384 = vector.broadcast %cst_144 : f32 to vector<1x256xf32>
    %385 = arith.select %383, %378, %384 : vector<1x256xi1>, vector<1x256xf32>
    %386 = arith.addf %318, %385 : vector<1x256xf32>
    %c33_i32 = arith.constant 33 : i32
    %387 = tpu.dynamic_rotate %230 by %c33_i32 dim 1 : vector<1x256xf32>, i32 -> vector<1x256xf32>
    %c9 = arith.constant 9 : index
    %388 = memref.load %arg8[%c9] : memref<98xf32, #tpu.memory_space<smem>>
    %389 = vector.broadcast %388 : f32 to vector<1x256xf32>
    %390 = arith.mulf %387, %389 : vector<1x256xf32>
    %c33_i32_145 = arith.constant 33 : i32
    %391 = tpu.dynamic_rotate %232 by %c33_i32_145 dim 1 : vector<1x256xf32>, i32 -> vector<1x256xf32>
    %c58 = arith.constant 58 : index
    %392 = memref.load %arg8[%c58] : memref<98xf32, #tpu.memory_space<smem>>
    %393 = vector.broadcast %392 : f32 to vector<1x256xf32>
    %394 = arith.mulf %391, %393 : vector<1x256xf32>
    %395 = arith.addf %390, %394 : vector<1x256xf32>
    %c1_i32_146 = arith.constant 1 : i32
    %396 = vector.broadcast %c1_i32_146 : i32 to vector<1x256xi32>
    %397 = arith.cmpi sge, %2, %396 : vector<1x256xi32>
    %c32_i32_147 = arith.constant 32 : i32
    %398 = vector.broadcast %c32_i32_147 : i32 to vector<1x256xi32>
    %399 = arith.cmpi sge, %0, %398 : vector<1x256xi32>
    %400 = arith.andi %397, %399 : vector<1x256xi1>
    %cst_148 = arith.constant 0.000000e+00 : f32
    %401 = vector.broadcast %cst_148 : f32 to vector<1x256xf32>
    %402 = arith.select %400, %395, %401 : vector<1x256xi1>, vector<1x256xf32>
    %403 = arith.addf %335, %402 : vector<1x256xf32>
    %c32_i32_149 = arith.constant 32 : i32
    %404 = tpu.dynamic_rotate %230 by %c32_i32_149 dim 1 : vector<1x256xf32>, i32 -> vector<1x256xf32>
    %c10 = arith.constant 10 : index
    %405 = memref.load %arg8[%c10] : memref<98xf32, #tpu.memory_space<smem>>
    %406 = vector.broadcast %405 : f32 to vector<1x256xf32>
    %407 = arith.mulf %404, %406 : vector<1x256xf32>
    %c32_i32_150 = arith.constant 32 : i32
    %408 = tpu.dynamic_rotate %232 by %c32_i32_150 dim 1 : vector<1x256xf32>, i32 -> vector<1x256xf32>
    %c59 = arith.constant 59 : index
    %409 = memref.load %arg8[%c59] : memref<98xf32, #tpu.memory_space<smem>>
    %410 = vector.broadcast %409 : f32 to vector<1x256xf32>
    %411 = arith.mulf %408, %410 : vector<1x256xf32>
    %412 = arith.addf %407, %411 : vector<1x256xf32>
    %c32_i32_151 = arith.constant 32 : i32
    %413 = vector.broadcast %c32_i32_151 : i32 to vector<1x256xi32>
    %414 = arith.cmpi sge, %0, %413 : vector<1x256xi32>
    %cst_152 = arith.constant 0.000000e+00 : f32
    %415 = vector.broadcast %cst_152 : f32 to vector<1x256xf32>
    %416 = arith.select %414, %412, %415 : vector<1x256xi1>, vector<1x256xf32>
    %417 = arith.addf %352, %416 : vector<1x256xf32>
    %c31_i32 = arith.constant 31 : i32
    %418 = tpu.dynamic_rotate %230 by %c31_i32 dim 1 : vector<1x256xf32>, i32 -> vector<1x256xf32>
    %c11 = arith.constant 11 : index
    %419 = memref.load %arg8[%c11] : memref<98xf32, #tpu.memory_space<smem>>
    %420 = vector.broadcast %419 : f32 to vector<1x256xf32>
    %421 = arith.mulf %418, %420 : vector<1x256xf32>
    %c31_i32_153 = arith.constant 31 : i32
    %422 = tpu.dynamic_rotate %232 by %c31_i32_153 dim 1 : vector<1x256xf32>, i32 -> vector<1x256xf32>
    %c60 = arith.constant 60 : index
    %423 = memref.load %arg8[%c60] : memref<98xf32, #tpu.memory_space<smem>>
    %424 = vector.broadcast %423 : f32 to vector<1x256xf32>
    %425 = arith.mulf %422, %424 : vector<1x256xf32>
    %426 = arith.addf %421, %425 : vector<1x256xf32>
    %c15_i32_154 = arith.constant 15 : i32
    %427 = vector.broadcast %c15_i32_154 : i32 to vector<1x256xi32>
    %428 = arith.cmpi slt, %2, %427 : vector<1x256xi32>
    %c32_i32_155 = arith.constant 32 : i32
    %429 = vector.broadcast %c32_i32_155 : i32 to vector<1x256xi32>
    %430 = arith.cmpi sge, %0, %429 : vector<1x256xi32>
    %431 = arith.andi %428, %430 : vector<1x256xi1>
    %cst_156 = arith.constant 0.000000e+00 : f32
    %432 = vector.broadcast %cst_156 : f32 to vector<1x256xf32>
    %433 = arith.select %431, %426, %432 : vector<1x256xi1>, vector<1x256xf32>
    %434 = arith.addf %369, %433 : vector<1x256xf32>
    %c30_i32 = arith.constant 30 : i32
    %435 = tpu.dynamic_rotate %230 by %c30_i32 dim 1 : vector<1x256xf32>, i32 -> vector<1x256xf32>
    %c12 = arith.constant 12 : index
    %436 = memref.load %arg8[%c12] : memref<98xf32, #tpu.memory_space<smem>>
    %437 = vector.broadcast %436 : f32 to vector<1x256xf32>
    %438 = arith.mulf %435, %437 : vector<1x256xf32>
    %c30_i32_157 = arith.constant 30 : i32
    %439 = tpu.dynamic_rotate %232 by %c30_i32_157 dim 1 : vector<1x256xf32>, i32 -> vector<1x256xf32>
    %c61 = arith.constant 61 : index
    %440 = memref.load %arg8[%c61] : memref<98xf32, #tpu.memory_space<smem>>
    %441 = vector.broadcast %440 : f32 to vector<1x256xf32>
    %442 = arith.mulf %439, %441 : vector<1x256xf32>
    %443 = arith.addf %438, %442 : vector<1x256xf32>
    %c14_i32_158 = arith.constant 14 : i32
    %444 = vector.broadcast %c14_i32_158 : i32 to vector<1x256xi32>
    %445 = arith.cmpi slt, %2, %444 : vector<1x256xi32>
    %c32_i32_159 = arith.constant 32 : i32
    %446 = vector.broadcast %c32_i32_159 : i32 to vector<1x256xi32>
    %447 = arith.cmpi sge, %0, %446 : vector<1x256xi32>
    %448 = arith.andi %445, %447 : vector<1x256xi1>
    %cst_160 = arith.constant 0.000000e+00 : f32
    %449 = vector.broadcast %cst_160 : f32 to vector<1x256xf32>
    %450 = arith.select %448, %443, %449 : vector<1x256xi1>, vector<1x256xf32>
    %451 = arith.addf %386, %450 : vector<1x256xf32>
    %c29_i32 = arith.constant 29 : i32
    %452 = tpu.dynamic_rotate %230 by %c29_i32 dim 1 : vector<1x256xf32>, i32 -> vector<1x256xf32>
    %c13 = arith.constant 13 : index
    %453 = memref.load %arg8[%c13] : memref<98xf32, #tpu.memory_space<smem>>
    %454 = vector.broadcast %453 : f32 to vector<1x256xf32>
    %455 = arith.mulf %452, %454 : vector<1x256xf32>
    %c29_i32_161 = arith.constant 29 : i32
    %456 = tpu.dynamic_rotate %232 by %c29_i32_161 dim 1 : vector<1x256xf32>, i32 -> vector<1x256xf32>
    %c62 = arith.constant 62 : index
    %457 = memref.load %arg8[%c62] : memref<98xf32, #tpu.memory_space<smem>>
    %458 = vector.broadcast %457 : f32 to vector<1x256xf32>
    %459 = arith.mulf %456, %458 : vector<1x256xf32>
    %460 = arith.addf %455, %459 : vector<1x256xf32>
    %c13_i32_162 = arith.constant 13 : i32
    %461 = vector.broadcast %c13_i32_162 : i32 to vector<1x256xi32>
    %462 = arith.cmpi slt, %2, %461 : vector<1x256xi32>
    %c32_i32_163 = arith.constant 32 : i32
    %463 = vector.broadcast %c32_i32_163 : i32 to vector<1x256xi32>
    %464 = arith.cmpi sge, %0, %463 : vector<1x256xi32>
    %465 = arith.andi %462, %464 : vector<1x256xi1>
    %cst_164 = arith.constant 0.000000e+00 : f32
    %466 = vector.broadcast %cst_164 : f32 to vector<1x256xf32>
    %467 = arith.select %465, %460, %466 : vector<1x256xi1>, vector<1x256xf32>
    %468 = arith.addf %403, %467 : vector<1x256xf32>
    %c19_i32 = arith.constant 19 : i32
    %469 = tpu.dynamic_rotate %230 by %c19_i32 dim 1 : vector<1x256xf32>, i32 -> vector<1x256xf32>
    %c14 = arith.constant 14 : index
    %470 = memref.load %arg8[%c14] : memref<98xf32, #tpu.memory_space<smem>>
    %471 = vector.broadcast %470 : f32 to vector<1x256xf32>
    %472 = arith.mulf %469, %471 : vector<1x256xf32>
    %c19_i32_165 = arith.constant 19 : i32
    %473 = tpu.dynamic_rotate %232 by %c19_i32_165 dim 1 : vector<1x256xf32>, i32 -> vector<1x256xf32>
    %c63 = arith.constant 63 : index
    %474 = memref.load %arg8[%c63] : memref<98xf32, #tpu.memory_space<smem>>
    %475 = vector.broadcast %474 : f32 to vector<1x256xf32>
    %476 = arith.mulf %473, %475 : vector<1x256xf32>
    %477 = arith.addf %472, %476 : vector<1x256xf32>
    %c3_i32_166 = arith.constant 3 : i32
    %478 = vector.broadcast %c3_i32_166 : i32 to vector<1x256xi32>
    %479 = arith.cmpi sge, %2, %478 : vector<1x256xi32>
    %c16_i32_167 = arith.constant 16 : i32
    %480 = vector.broadcast %c16_i32_167 : i32 to vector<1x256xi32>
    %481 = arith.cmpi sge, %0, %480 : vector<1x256xi32>
    %482 = arith.andi %479, %481 : vector<1x256xi1>
    %cst_168 = arith.constant 0.000000e+00 : f32
    %483 = vector.broadcast %cst_168 : f32 to vector<1x256xf32>
    %484 = arith.select %482, %477, %483 : vector<1x256xi1>, vector<1x256xf32>
    %485 = arith.addf %417, %484 : vector<1x256xf32>
    %c18_i32 = arith.constant 18 : i32
    %486 = tpu.dynamic_rotate %230 by %c18_i32 dim 1 : vector<1x256xf32>, i32 -> vector<1x256xf32>
    %c15 = arith.constant 15 : index
    %487 = memref.load %arg8[%c15] : memref<98xf32, #tpu.memory_space<smem>>
    %488 = vector.broadcast %487 : f32 to vector<1x256xf32>
    %489 = arith.mulf %486, %488 : vector<1x256xf32>
    %c18_i32_169 = arith.constant 18 : i32
    %490 = tpu.dynamic_rotate %232 by %c18_i32_169 dim 1 : vector<1x256xf32>, i32 -> vector<1x256xf32>
    %c64_170 = arith.constant 64 : index
    %491 = memref.load %arg8[%c64_170] : memref<98xf32, #tpu.memory_space<smem>>
    %492 = vector.broadcast %491 : f32 to vector<1x256xf32>
    %493 = arith.mulf %490, %492 : vector<1x256xf32>
    %494 = arith.addf %489, %493 : vector<1x256xf32>
    %c2_i32_171 = arith.constant 2 : i32
    %495 = vector.broadcast %c2_i32_171 : i32 to vector<1x256xi32>
    %496 = arith.cmpi sge, %2, %495 : vector<1x256xi32>
    %c16_i32_172 = arith.constant 16 : i32
    %497 = vector.broadcast %c16_i32_172 : i32 to vector<1x256xi32>
    %498 = arith.cmpi sge, %0, %497 : vector<1x256xi32>
    %499 = arith.andi %496, %498 : vector<1x256xi1>
    %cst_173 = arith.constant 0.000000e+00 : f32
    %500 = vector.broadcast %cst_173 : f32 to vector<1x256xf32>
    %501 = arith.select %499, %494, %500 : vector<1x256xi1>, vector<1x256xf32>
    %502 = arith.addf %434, %501 : vector<1x256xf32>
    %c17_i32_174 = arith.constant 17 : i32
    %503 = tpu.dynamic_rotate %230 by %c17_i32_174 dim 1 : vector<1x256xf32>, i32 -> vector<1x256xf32>
    %c16 = arith.constant 16 : index
    %504 = memref.load %arg8[%c16] : memref<98xf32, #tpu.memory_space<smem>>
    %505 = vector.broadcast %504 : f32 to vector<1x256xf32>
    %506 = arith.mulf %503, %505 : vector<1x256xf32>
    %c17_i32_175 = arith.constant 17 : i32
    %507 = tpu.dynamic_rotate %232 by %c17_i32_175 dim 1 : vector<1x256xf32>, i32 -> vector<1x256xf32>
    %c65 = arith.constant 65 : index
    %508 = memref.load %arg8[%c65] : memref<98xf32, #tpu.memory_space<smem>>
    %509 = vector.broadcast %508 : f32 to vector<1x256xf32>
    %510 = arith.mulf %507, %509 : vector<1x256xf32>
    %511 = arith.addf %506, %510 : vector<1x256xf32>
    %c1_i32_176 = arith.constant 1 : i32
    %512 = vector.broadcast %c1_i32_176 : i32 to vector<1x256xi32>
    %513 = arith.cmpi sge, %2, %512 : vector<1x256xi32>
    %c16_i32_177 = arith.constant 16 : i32
    %514 = vector.broadcast %c16_i32_177 : i32 to vector<1x256xi32>
    %515 = arith.cmpi sge, %0, %514 : vector<1x256xi32>
    %516 = arith.andi %513, %515 : vector<1x256xi1>
    %cst_178 = arith.constant 0.000000e+00 : f32
    %517 = vector.broadcast %cst_178 : f32 to vector<1x256xf32>
    %518 = arith.select %516, %511, %517 : vector<1x256xi1>, vector<1x256xf32>
    %519 = arith.addf %451, %518 : vector<1x256xf32>
    %c16_i32_179 = arith.constant 16 : i32
    %520 = tpu.dynamic_rotate %230 by %c16_i32_179 dim 1 : vector<1x256xf32>, i32 -> vector<1x256xf32>
    %c17 = arith.constant 17 : index
    %521 = memref.load %arg8[%c17] : memref<98xf32, #tpu.memory_space<smem>>
    %522 = vector.broadcast %521 : f32 to vector<1x256xf32>
    %523 = arith.mulf %520, %522 : vector<1x256xf32>
    %c16_i32_180 = arith.constant 16 : i32
    %524 = tpu.dynamic_rotate %232 by %c16_i32_180 dim 1 : vector<1x256xf32>, i32 -> vector<1x256xf32>
    %c66 = arith.constant 66 : index
    %525 = memref.load %arg8[%c66] : memref<98xf32, #tpu.memory_space<smem>>
    %526 = vector.broadcast %525 : f32 to vector<1x256xf32>
    %527 = arith.mulf %524, %526 : vector<1x256xf32>
    %528 = arith.addf %523, %527 : vector<1x256xf32>
    %c16_i32_181 = arith.constant 16 : i32
    %529 = vector.broadcast %c16_i32_181 : i32 to vector<1x256xi32>
    %530 = arith.cmpi sge, %0, %529 : vector<1x256xi32>
    %cst_182 = arith.constant 0.000000e+00 : f32
    %531 = vector.broadcast %cst_182 : f32 to vector<1x256xf32>
    %532 = arith.select %530, %528, %531 : vector<1x256xi1>, vector<1x256xf32>
    %533 = arith.addf %468, %532 : vector<1x256xf32>
    %c15_i32_183 = arith.constant 15 : i32
    %534 = tpu.dynamic_rotate %230 by %c15_i32_183 dim 1 : vector<1x256xf32>, i32 -> vector<1x256xf32>
    %c18 = arith.constant 18 : index
    %535 = memref.load %arg8[%c18] : memref<98xf32, #tpu.memory_space<smem>>
    %536 = vector.broadcast %535 : f32 to vector<1x256xf32>
    %537 = arith.mulf %534, %536 : vector<1x256xf32>
    %c15_i32_184 = arith.constant 15 : i32
    %538 = tpu.dynamic_rotate %232 by %c15_i32_184 dim 1 : vector<1x256xf32>, i32 -> vector<1x256xf32>
    %c67 = arith.constant 67 : index
    %539 = memref.load %arg8[%c67] : memref<98xf32, #tpu.memory_space<smem>>
    %540 = vector.broadcast %539 : f32 to vector<1x256xf32>
    %541 = arith.mulf %538, %540 : vector<1x256xf32>
    %542 = arith.addf %537, %541 : vector<1x256xf32>
    %c15_i32_185 = arith.constant 15 : i32
    %543 = vector.broadcast %c15_i32_185 : i32 to vector<1x256xi32>
    %544 = arith.cmpi slt, %2, %543 : vector<1x256xi32>
    %c16_i32_186 = arith.constant 16 : i32
    %545 = vector.broadcast %c16_i32_186 : i32 to vector<1x256xi32>
    %546 = arith.cmpi sge, %0, %545 : vector<1x256xi32>
    %547 = arith.andi %544, %546 : vector<1x256xi1>
    %cst_187 = arith.constant 0.000000e+00 : f32
    %548 = vector.broadcast %cst_187 : f32 to vector<1x256xf32>
    %549 = arith.select %547, %542, %548 : vector<1x256xi1>, vector<1x256xf32>
    %550 = arith.addf %485, %549 : vector<1x256xf32>
    %c14_i32_188 = arith.constant 14 : i32
    %551 = tpu.dynamic_rotate %230 by %c14_i32_188 dim 1 : vector<1x256xf32>, i32 -> vector<1x256xf32>
    %c19 = arith.constant 19 : index
    %552 = memref.load %arg8[%c19] : memref<98xf32, #tpu.memory_space<smem>>
    %553 = vector.broadcast %552 : f32 to vector<1x256xf32>
    %554 = arith.mulf %551, %553 : vector<1x256xf32>
    %c14_i32_189 = arith.constant 14 : i32
    %555 = tpu.dynamic_rotate %232 by %c14_i32_189 dim 1 : vector<1x256xf32>, i32 -> vector<1x256xf32>
    %c68 = arith.constant 68 : index
    %556 = memref.load %arg8[%c68] : memref<98xf32, #tpu.memory_space<smem>>
    %557 = vector.broadcast %556 : f32 to vector<1x256xf32>
    %558 = arith.mulf %555, %557 : vector<1x256xf32>
    %559 = arith.addf %554, %558 : vector<1x256xf32>
    %c14_i32_190 = arith.constant 14 : i32
    %560 = vector.broadcast %c14_i32_190 : i32 to vector<1x256xi32>
    %561 = arith.cmpi slt, %2, %560 : vector<1x256xi32>
    %c16_i32_191 = arith.constant 16 : i32
    %562 = vector.broadcast %c16_i32_191 : i32 to vector<1x256xi32>
    %563 = arith.cmpi sge, %0, %562 : vector<1x256xi32>
    %564 = arith.andi %561, %563 : vector<1x256xi1>
    %cst_192 = arith.constant 0.000000e+00 : f32
    %565 = vector.broadcast %cst_192 : f32 to vector<1x256xf32>
    %566 = arith.select %564, %559, %565 : vector<1x256xi1>, vector<1x256xf32>
    %567 = arith.addf %502, %566 : vector<1x256xf32>
    %c13_i32_193 = arith.constant 13 : i32
    %568 = tpu.dynamic_rotate %230 by %c13_i32_193 dim 1 : vector<1x256xf32>, i32 -> vector<1x256xf32>
    %c20 = arith.constant 20 : index
    %569 = memref.load %arg8[%c20] : memref<98xf32, #tpu.memory_space<smem>>
    %570 = vector.broadcast %569 : f32 to vector<1x256xf32>
    %571 = arith.mulf %568, %570 : vector<1x256xf32>
    %c13_i32_194 = arith.constant 13 : i32
    %572 = tpu.dynamic_rotate %232 by %c13_i32_194 dim 1 : vector<1x256xf32>, i32 -> vector<1x256xf32>
    %c69 = arith.constant 69 : index
    %573 = memref.load %arg8[%c69] : memref<98xf32, #tpu.memory_space<smem>>
    %574 = vector.broadcast %573 : f32 to vector<1x256xf32>
    %575 = arith.mulf %572, %574 : vector<1x256xf32>
    %576 = arith.addf %571, %575 : vector<1x256xf32>
    %c13_i32_195 = arith.constant 13 : i32
    %577 = vector.broadcast %c13_i32_195 : i32 to vector<1x256xi32>
    %578 = arith.cmpi slt, %2, %577 : vector<1x256xi32>
    %c16_i32_196 = arith.constant 16 : i32
    %579 = vector.broadcast %c16_i32_196 : i32 to vector<1x256xi32>
    %580 = arith.cmpi sge, %0, %579 : vector<1x256xi32>
    %581 = arith.andi %578, %580 : vector<1x256xi1>
    %cst_197 = arith.constant 0.000000e+00 : f32
    %582 = vector.broadcast %cst_197 : f32 to vector<1x256xf32>
    %583 = arith.select %581, %576, %582 : vector<1x256xi1>, vector<1x256xf32>
    %584 = arith.addf %519, %583 : vector<1x256xf32>
    %c3_i32_198 = arith.constant 3 : i32
    %585 = tpu.dynamic_rotate %230 by %c3_i32_198 dim 1 : vector<1x256xf32>, i32 -> vector<1x256xf32>
    %c21 = arith.constant 21 : index
    %586 = memref.load %arg8[%c21] : memref<98xf32, #tpu.memory_space<smem>>
    %587 = vector.broadcast %586 : f32 to vector<1x256xf32>
    %588 = arith.mulf %585, %587 : vector<1x256xf32>
    %c3_i32_199 = arith.constant 3 : i32
    %589 = tpu.dynamic_rotate %232 by %c3_i32_199 dim 1 : vector<1x256xf32>, i32 -> vector<1x256xf32>
    %c70 = arith.constant 70 : index
    %590 = memref.load %arg8[%c70] : memref<98xf32, #tpu.memory_space<smem>>
    %591 = vector.broadcast %590 : f32 to vector<1x256xf32>
    %592 = arith.mulf %589, %591 : vector<1x256xf32>
    %593 = arith.addf %588, %592 : vector<1x256xf32>
    %c3_i32_200 = arith.constant 3 : i32
    %594 = vector.broadcast %c3_i32_200 : i32 to vector<1x256xi32>
    %595 = arith.cmpi sge, %2, %594 : vector<1x256xi32>
    %cst_201 = arith.constant 0.000000e+00 : f32
    %596 = vector.broadcast %cst_201 : f32 to vector<1x256xf32>
    %597 = arith.select %595, %593, %596 : vector<1x256xi1>, vector<1x256xf32>
    %598 = arith.addf %533, %597 : vector<1x256xf32>
    %c2_i32_202 = arith.constant 2 : i32
    %599 = tpu.dynamic_rotate %230 by %c2_i32_202 dim 1 : vector<1x256xf32>, i32 -> vector<1x256xf32>
    %c22 = arith.constant 22 : index
    %600 = memref.load %arg8[%c22] : memref<98xf32, #tpu.memory_space<smem>>
    %601 = vector.broadcast %600 : f32 to vector<1x256xf32>
    %602 = arith.mulf %599, %601 : vector<1x256xf32>
    %c2_i32_203 = arith.constant 2 : i32
    %603 = tpu.dynamic_rotate %232 by %c2_i32_203 dim 1 : vector<1x256xf32>, i32 -> vector<1x256xf32>
    %c71 = arith.constant 71 : index
    %604 = memref.load %arg8[%c71] : memref<98xf32, #tpu.memory_space<smem>>
    %605 = vector.broadcast %604 : f32 to vector<1x256xf32>
    %606 = arith.mulf %603, %605 : vector<1x256xf32>
    %607 = arith.addf %602, %606 : vector<1x256xf32>
    %c2_i32_204 = arith.constant 2 : i32
    %608 = vector.broadcast %c2_i32_204 : i32 to vector<1x256xi32>
    %609 = arith.cmpi sge, %2, %608 : vector<1x256xi32>
    %cst_205 = arith.constant 0.000000e+00 : f32
    %610 = vector.broadcast %cst_205 : f32 to vector<1x256xf32>
    %611 = arith.select %609, %607, %610 : vector<1x256xi1>, vector<1x256xf32>
    %612 = arith.addf %550, %611 : vector<1x256xf32>
    %c1_i32_206 = arith.constant 1 : i32
    %613 = tpu.dynamic_rotate %230 by %c1_i32_206 dim 1 : vector<1x256xf32>, i32 -> vector<1x256xf32>
    %c23 = arith.constant 23 : index
    %614 = memref.load %arg8[%c23] : memref<98xf32, #tpu.memory_space<smem>>
    %615 = vector.broadcast %614 : f32 to vector<1x256xf32>
    %616 = arith.mulf %613, %615 : vector<1x256xf32>
    %c1_i32_207 = arith.constant 1 : i32
    %617 = tpu.dynamic_rotate %232 by %c1_i32_207 dim 1 : vector<1x256xf32>, i32 -> vector<1x256xf32>
    %c72 = arith.constant 72 : index
    %618 = memref.load %arg8[%c72] : memref<98xf32, #tpu.memory_space<smem>>
    %619 = vector.broadcast %618 : f32 to vector<1x256xf32>
    %620 = arith.mulf %617, %619 : vector<1x256xf32>
    %621 = arith.addf %616, %620 : vector<1x256xf32>
    %c1_i32_208 = arith.constant 1 : i32
    %622 = vector.broadcast %c1_i32_208 : i32 to vector<1x256xi32>
    %623 = arith.cmpi sge, %2, %622 : vector<1x256xi32>
    %cst_209 = arith.constant 0.000000e+00 : f32
    %624 = vector.broadcast %cst_209 : f32 to vector<1x256xf32>
    %625 = arith.select %623, %621, %624 : vector<1x256xi1>, vector<1x256xf32>
    %626 = arith.addf %567, %625 : vector<1x256xf32>
    %c24 = arith.constant 24 : index
    %627 = memref.load %arg8[%c24] : memref<98xf32, #tpu.memory_space<smem>>
    %628 = vector.broadcast %627 : f32 to vector<1x256xf32>
    %629 = arith.mulf %230, %628 : vector<1x256xf32>
    %c73 = arith.constant 73 : index
    %630 = memref.load %arg8[%c73] : memref<98xf32, #tpu.memory_space<smem>>
    %631 = vector.broadcast %630 : f32 to vector<1x256xf32>
    %632 = arith.mulf %232, %631 : vector<1x256xf32>
    %633 = arith.addf %629, %632 : vector<1x256xf32>
    %634 = arith.addf %584, %633 : vector<1x256xf32>
    %c255_i32_210 = arith.constant 255 : i32
    %635 = tpu.dynamic_rotate %230 by %c255_i32_210 dim 1 : vector<1x256xf32>, i32 -> vector<1x256xf32>
    %c25 = arith.constant 25 : index
    %636 = memref.load %arg8[%c25] : memref<98xf32, #tpu.memory_space<smem>>
    %637 = vector.broadcast %636 : f32 to vector<1x256xf32>
    %638 = arith.mulf %635, %637 : vector<1x256xf32>
    %c255_i32_211 = arith.constant 255 : i32
    %639 = tpu.dynamic_rotate %232 by %c255_i32_211 dim 1 : vector<1x256xf32>, i32 -> vector<1x256xf32>
    %c74 = arith.constant 74 : index
    %640 = memref.load %arg8[%c74] : memref<98xf32, #tpu.memory_space<smem>>
    %641 = vector.broadcast %640 : f32 to vector<1x256xf32>
    %642 = arith.mulf %639, %641 : vector<1x256xf32>
    %643 = arith.addf %638, %642 : vector<1x256xf32>
    %c15_i32_212 = arith.constant 15 : i32
    %644 = vector.broadcast %c15_i32_212 : i32 to vector<1x256xi32>
    %645 = arith.cmpi slt, %2, %644 : vector<1x256xi32>
    %cst_213 = arith.constant 0.000000e+00 : f32
    %646 = vector.broadcast %cst_213 : f32 to vector<1x256xf32>
    %647 = arith.select %645, %643, %646 : vector<1x256xi1>, vector<1x256xf32>
    %648 = arith.addf %598, %647 : vector<1x256xf32>
    %c254_i32 = arith.constant 254 : i32
    %649 = tpu.dynamic_rotate %230 by %c254_i32 dim 1 : vector<1x256xf32>, i32 -> vector<1x256xf32>
    %c26 = arith.constant 26 : index
    %650 = memref.load %arg8[%c26] : memref<98xf32, #tpu.memory_space<smem>>
    %651 = vector.broadcast %650 : f32 to vector<1x256xf32>
    %652 = arith.mulf %649, %651 : vector<1x256xf32>
    %c254_i32_214 = arith.constant 254 : i32
    %653 = tpu.dynamic_rotate %232 by %c254_i32_214 dim 1 : vector<1x256xf32>, i32 -> vector<1x256xf32>
    %c75 = arith.constant 75 : index
    %654 = memref.load %arg8[%c75] : memref<98xf32, #tpu.memory_space<smem>>
    %655 = vector.broadcast %654 : f32 to vector<1x256xf32>
    %656 = arith.mulf %653, %655 : vector<1x256xf32>
    %657 = arith.addf %652, %656 : vector<1x256xf32>
    %c14_i32_215 = arith.constant 14 : i32
    %658 = vector.broadcast %c14_i32_215 : i32 to vector<1x256xi32>
    %659 = arith.cmpi slt, %2, %658 : vector<1x256xi32>
    %cst_216 = arith.constant 0.000000e+00 : f32
    %660 = vector.broadcast %cst_216 : f32 to vector<1x256xf32>
    %661 = arith.select %659, %657, %660 : vector<1x256xi1>, vector<1x256xf32>
    %662 = arith.addf %612, %661 : vector<1x256xf32>
    %c253_i32 = arith.constant 253 : i32
    %663 = tpu.dynamic_rotate %230 by %c253_i32 dim 1 : vector<1x256xf32>, i32 -> vector<1x256xf32>
    %c27 = arith.constant 27 : index
    %664 = memref.load %arg8[%c27] : memref<98xf32, #tpu.memory_space<smem>>
    %665 = vector.broadcast %664 : f32 to vector<1x256xf32>
    %666 = arith.mulf %663, %665 : vector<1x256xf32>
    %c253_i32_217 = arith.constant 253 : i32
    %667 = tpu.dynamic_rotate %232 by %c253_i32_217 dim 1 : vector<1x256xf32>, i32 -> vector<1x256xf32>
    %c76 = arith.constant 76 : index
    %668 = memref.load %arg8[%c76] : memref<98xf32, #tpu.memory_space<smem>>
    %669 = vector.broadcast %668 : f32 to vector<1x256xf32>
    %670 = arith.mulf %667, %669 : vector<1x256xf32>
    %671 = arith.addf %666, %670 : vector<1x256xf32>
    %c13_i32_218 = arith.constant 13 : i32
    %672 = vector.broadcast %c13_i32_218 : i32 to vector<1x256xi32>
    %673 = arith.cmpi slt, %2, %672 : vector<1x256xi32>
    %cst_219 = arith.constant 0.000000e+00 : f32
    %674 = vector.broadcast %cst_219 : f32 to vector<1x256xf32>
    %675 = arith.select %673, %671, %674 : vector<1x256xi1>, vector<1x256xf32>
    %676 = arith.addf %626, %675 : vector<1x256xf32>
    %c243_i32 = arith.constant 243 : i32
    %677 = tpu.dynamic_rotate %230 by %c243_i32 dim 1 : vector<1x256xf32>, i32 -> vector<1x256xf32>
    %c28 = arith.constant 28 : index
    %678 = memref.load %arg8[%c28] : memref<98xf32, #tpu.memory_space<smem>>
    %679 = vector.broadcast %678 : f32 to vector<1x256xf32>
    %680 = arith.mulf %677, %679 : vector<1x256xf32>
    %c243_i32_220 = arith.constant 243 : i32
    %681 = tpu.dynamic_rotate %232 by %c243_i32_220 dim 1 : vector<1x256xf32>, i32 -> vector<1x256xf32>
    %c77 = arith.constant 77 : index
    %682 = memref.load %arg8[%c77] : memref<98xf32, #tpu.memory_space<smem>>
    %683 = vector.broadcast %682 : f32 to vector<1x256xf32>
    %684 = arith.mulf %681, %683 : vector<1x256xf32>
    %685 = arith.addf %680, %684 : vector<1x256xf32>
    %c3_i32_221 = arith.constant 3 : i32
    %686 = vector.broadcast %c3_i32_221 : i32 to vector<1x256xi32>
    %687 = arith.cmpi sge, %2, %686 : vector<1x256xi32>
    %c240_i32_222 = arith.constant 240 : i32
    %688 = vector.broadcast %c240_i32_222 : i32 to vector<1x256xi32>
    %689 = arith.cmpi slt, %0, %688 : vector<1x256xi32>
    %690 = arith.andi %687, %689 : vector<1x256xi1>
    %cst_223 = arith.constant 0.000000e+00 : f32
    %691 = vector.broadcast %cst_223 : f32 to vector<1x256xf32>
    %692 = arith.select %690, %685, %691 : vector<1x256xi1>, vector<1x256xf32>
    %693 = arith.addf %634, %692 : vector<1x256xf32>
    %c242_i32 = arith.constant 242 : i32
    %694 = tpu.dynamic_rotate %230 by %c242_i32 dim 1 : vector<1x256xf32>, i32 -> vector<1x256xf32>
    %c29 = arith.constant 29 : index
    %695 = memref.load %arg8[%c29] : memref<98xf32, #tpu.memory_space<smem>>
    %696 = vector.broadcast %695 : f32 to vector<1x256xf32>
    %697 = arith.mulf %694, %696 : vector<1x256xf32>
    %c242_i32_224 = arith.constant 242 : i32
    %698 = tpu.dynamic_rotate %232 by %c242_i32_224 dim 1 : vector<1x256xf32>, i32 -> vector<1x256xf32>
    %c78 = arith.constant 78 : index
    %699 = memref.load %arg8[%c78] : memref<98xf32, #tpu.memory_space<smem>>
    %700 = vector.broadcast %699 : f32 to vector<1x256xf32>
    %701 = arith.mulf %698, %700 : vector<1x256xf32>
    %702 = arith.addf %697, %701 : vector<1x256xf32>
    %c2_i32_225 = arith.constant 2 : i32
    %703 = vector.broadcast %c2_i32_225 : i32 to vector<1x256xi32>
    %704 = arith.cmpi sge, %2, %703 : vector<1x256xi32>
    %c240_i32_226 = arith.constant 240 : i32
    %705 = vector.broadcast %c240_i32_226 : i32 to vector<1x256xi32>
    %706 = arith.cmpi slt, %0, %705 : vector<1x256xi32>
    %707 = arith.andi %704, %706 : vector<1x256xi1>
    %cst_227 = arith.constant 0.000000e+00 : f32
    %708 = vector.broadcast %cst_227 : f32 to vector<1x256xf32>
    %709 = arith.select %707, %702, %708 : vector<1x256xi1>, vector<1x256xf32>
    %710 = arith.addf %648, %709 : vector<1x256xf32>
    %c241_i32_228 = arith.constant 241 : i32
    %711 = tpu.dynamic_rotate %230 by %c241_i32_228 dim 1 : vector<1x256xf32>, i32 -> vector<1x256xf32>
    %c30 = arith.constant 30 : index
    %712 = memref.load %arg8[%c30] : memref<98xf32, #tpu.memory_space<smem>>
    %713 = vector.broadcast %712 : f32 to vector<1x256xf32>
    %714 = arith.mulf %711, %713 : vector<1x256xf32>
    %c241_i32_229 = arith.constant 241 : i32
    %715 = tpu.dynamic_rotate %232 by %c241_i32_229 dim 1 : vector<1x256xf32>, i32 -> vector<1x256xf32>
    %c79 = arith.constant 79 : index
    %716 = memref.load %arg8[%c79] : memref<98xf32, #tpu.memory_space<smem>>
    %717 = vector.broadcast %716 : f32 to vector<1x256xf32>
    %718 = arith.mulf %715, %717 : vector<1x256xf32>
    %719 = arith.addf %714, %718 : vector<1x256xf32>
    %c1_i32_230 = arith.constant 1 : i32
    %720 = vector.broadcast %c1_i32_230 : i32 to vector<1x256xi32>
    %721 = arith.cmpi sge, %2, %720 : vector<1x256xi32>
    %c240_i32_231 = arith.constant 240 : i32
    %722 = vector.broadcast %c240_i32_231 : i32 to vector<1x256xi32>
    %723 = arith.cmpi slt, %0, %722 : vector<1x256xi32>
    %724 = arith.andi %721, %723 : vector<1x256xi1>
    %cst_232 = arith.constant 0.000000e+00 : f32
    %725 = vector.broadcast %cst_232 : f32 to vector<1x256xf32>
    %726 = arith.select %724, %719, %725 : vector<1x256xi1>, vector<1x256xf32>
    %727 = arith.addf %662, %726 : vector<1x256xf32>
    %c240_i32_233 = arith.constant 240 : i32
    %728 = tpu.dynamic_rotate %230 by %c240_i32_233 dim 1 : vector<1x256xf32>, i32 -> vector<1x256xf32>
    %c31 = arith.constant 31 : index
    %729 = memref.load %arg8[%c31] : memref<98xf32, #tpu.memory_space<smem>>
    %730 = vector.broadcast %729 : f32 to vector<1x256xf32>
    %731 = arith.mulf %728, %730 : vector<1x256xf32>
    %c240_i32_234 = arith.constant 240 : i32
    %732 = tpu.dynamic_rotate %232 by %c240_i32_234 dim 1 : vector<1x256xf32>, i32 -> vector<1x256xf32>
    %c80 = arith.constant 80 : index
    %733 = memref.load %arg8[%c80] : memref<98xf32, #tpu.memory_space<smem>>
    %734 = vector.broadcast %733 : f32 to vector<1x256xf32>
    %735 = arith.mulf %732, %734 : vector<1x256xf32>
    %736 = arith.addf %731, %735 : vector<1x256xf32>
    %c240_i32_235 = arith.constant 240 : i32
    %737 = vector.broadcast %c240_i32_235 : i32 to vector<1x256xi32>
    %738 = arith.cmpi slt, %0, %737 : vector<1x256xi32>
    %cst_236 = arith.constant 0.000000e+00 : f32
    %739 = vector.broadcast %cst_236 : f32 to vector<1x256xf32>
    %740 = arith.select %738, %736, %739 : vector<1x256xi1>, vector<1x256xf32>
    %741 = arith.addf %676, %740 : vector<1x256xf32>
    %c239_i32_237 = arith.constant 239 : i32
    %742 = tpu.dynamic_rotate %230 by %c239_i32_237 dim 1 : vector<1x256xf32>, i32 -> vector<1x256xf32>
    %c32_238 = arith.constant 32 : index
    %743 = memref.load %arg8[%c32_238] : memref<98xf32, #tpu.memory_space<smem>>
    %744 = vector.broadcast %743 : f32 to vector<1x256xf32>
    %745 = arith.mulf %742, %744 : vector<1x256xf32>
    %c239_i32_239 = arith.constant 239 : i32
    %746 = tpu.dynamic_rotate %232 by %c239_i32_239 dim 1 : vector<1x256xf32>, i32 -> vector<1x256xf32>
    %c81 = arith.constant 81 : index
    %747 = memref.load %arg8[%c81] : memref<98xf32, #tpu.memory_space<smem>>
    %748 = vector.broadcast %747 : f32 to vector<1x256xf32>
    %749 = arith.mulf %746, %748 : vector<1x256xf32>
    %750 = arith.addf %745, %749 : vector<1x256xf32>
    %c15_i32_240 = arith.constant 15 : i32
    %751 = vector.broadcast %c15_i32_240 : i32 to vector<1x256xi32>
    %752 = arith.cmpi slt, %2, %751 : vector<1x256xi32>
    %c240_i32_241 = arith.constant 240 : i32
    %753 = vector.broadcast %c240_i32_241 : i32 to vector<1x256xi32>
    %754 = arith.cmpi slt, %0, %753 : vector<1x256xi32>
    %755 = arith.andi %752, %754 : vector<1x256xi1>
    %cst_242 = arith.constant 0.000000e+00 : f32
    %756 = vector.broadcast %cst_242 : f32 to vector<1x256xf32>
    %757 = arith.select %755, %750, %756 : vector<1x256xi1>, vector<1x256xf32>
    %758 = arith.addf %693, %757 : vector<1x256xf32>
    %c238_i32 = arith.constant 238 : i32
    %759 = tpu.dynamic_rotate %230 by %c238_i32 dim 1 : vector<1x256xf32>, i32 -> vector<1x256xf32>
    %c33 = arith.constant 33 : index
    %760 = memref.load %arg8[%c33] : memref<98xf32, #tpu.memory_space<smem>>
    %761 = vector.broadcast %760 : f32 to vector<1x256xf32>
    %762 = arith.mulf %759, %761 : vector<1x256xf32>
    %c238_i32_243 = arith.constant 238 : i32
    %763 = tpu.dynamic_rotate %232 by %c238_i32_243 dim 1 : vector<1x256xf32>, i32 -> vector<1x256xf32>
    %c82 = arith.constant 82 : index
    %764 = memref.load %arg8[%c82] : memref<98xf32, #tpu.memory_space<smem>>
    %765 = vector.broadcast %764 : f32 to vector<1x256xf32>
    %766 = arith.mulf %763, %765 : vector<1x256xf32>
    %767 = arith.addf %762, %766 : vector<1x256xf32>
    %c14_i32_244 = arith.constant 14 : i32
    %768 = vector.broadcast %c14_i32_244 : i32 to vector<1x256xi32>
    %769 = arith.cmpi slt, %2, %768 : vector<1x256xi32>
    %c240_i32_245 = arith.constant 240 : i32
    %770 = vector.broadcast %c240_i32_245 : i32 to vector<1x256xi32>
    %771 = arith.cmpi slt, %0, %770 : vector<1x256xi32>
    %772 = arith.andi %769, %771 : vector<1x256xi1>
    %cst_246 = arith.constant 0.000000e+00 : f32
    %773 = vector.broadcast %cst_246 : f32 to vector<1x256xf32>
    %774 = arith.select %772, %767, %773 : vector<1x256xi1>, vector<1x256xf32>
    %775 = arith.addf %710, %774 : vector<1x256xf32>
    %c237_i32 = arith.constant 237 : i32
    %776 = tpu.dynamic_rotate %230 by %c237_i32 dim 1 : vector<1x256xf32>, i32 -> vector<1x256xf32>
    %c34 = arith.constant 34 : index
    %777 = memref.load %arg8[%c34] : memref<98xf32, #tpu.memory_space<smem>>
    %778 = vector.broadcast %777 : f32 to vector<1x256xf32>
    %779 = arith.mulf %776, %778 : vector<1x256xf32>
    %c237_i32_247 = arith.constant 237 : i32
    %780 = tpu.dynamic_rotate %232 by %c237_i32_247 dim 1 : vector<1x256xf32>, i32 -> vector<1x256xf32>
    %c83 = arith.constant 83 : index
    %781 = memref.load %arg8[%c83] : memref<98xf32, #tpu.memory_space<smem>>
    %782 = vector.broadcast %781 : f32 to vector<1x256xf32>
    %783 = arith.mulf %780, %782 : vector<1x256xf32>
    %784 = arith.addf %779, %783 : vector<1x256xf32>
    %c13_i32_248 = arith.constant 13 : i32
    %785 = vector.broadcast %c13_i32_248 : i32 to vector<1x256xi32>
    %786 = arith.cmpi slt, %2, %785 : vector<1x256xi32>
    %c240_i32_249 = arith.constant 240 : i32
    %787 = vector.broadcast %c240_i32_249 : i32 to vector<1x256xi32>
    %788 = arith.cmpi slt, %0, %787 : vector<1x256xi32>
    %789 = arith.andi %786, %788 : vector<1x256xi1>
    %cst_250 = arith.constant 0.000000e+00 : f32
    %790 = vector.broadcast %cst_250 : f32 to vector<1x256xf32>
    %791 = arith.select %789, %784, %790 : vector<1x256xi1>, vector<1x256xf32>
    %792 = arith.addf %727, %791 : vector<1x256xf32>
    %c227_i32 = arith.constant 227 : i32
    %793 = tpu.dynamic_rotate %230 by %c227_i32 dim 1 : vector<1x256xf32>, i32 -> vector<1x256xf32>
    %c35 = arith.constant 35 : index
    %794 = memref.load %arg8[%c35] : memref<98xf32, #tpu.memory_space<smem>>
    %795 = vector.broadcast %794 : f32 to vector<1x256xf32>
    %796 = arith.mulf %793, %795 : vector<1x256xf32>
    %c227_i32_251 = arith.constant 227 : i32
    %797 = tpu.dynamic_rotate %232 by %c227_i32_251 dim 1 : vector<1x256xf32>, i32 -> vector<1x256xf32>
    %c84 = arith.constant 84 : index
    %798 = memref.load %arg8[%c84] : memref<98xf32, #tpu.memory_space<smem>>
    %799 = vector.broadcast %798 : f32 to vector<1x256xf32>
    %800 = arith.mulf %797, %799 : vector<1x256xf32>
    %801 = arith.addf %796, %800 : vector<1x256xf32>
    %c3_i32_252 = arith.constant 3 : i32
    %802 = vector.broadcast %c3_i32_252 : i32 to vector<1x256xi32>
    %803 = arith.cmpi sge, %2, %802 : vector<1x256xi32>
    %c224_i32 = arith.constant 224 : i32
    %804 = vector.broadcast %c224_i32 : i32 to vector<1x256xi32>
    %805 = arith.cmpi slt, %0, %804 : vector<1x256xi32>
    %806 = arith.andi %803, %805 : vector<1x256xi1>
    %cst_253 = arith.constant 0.000000e+00 : f32
    %807 = vector.broadcast %cst_253 : f32 to vector<1x256xf32>
    %808 = arith.select %806, %801, %807 : vector<1x256xi1>, vector<1x256xf32>
    %809 = arith.addf %741, %808 : vector<1x256xf32>
    %c226_i32 = arith.constant 226 : i32
    %810 = tpu.dynamic_rotate %230 by %c226_i32 dim 1 : vector<1x256xf32>, i32 -> vector<1x256xf32>
    %c36 = arith.constant 36 : index
    %811 = memref.load %arg8[%c36] : memref<98xf32, #tpu.memory_space<smem>>
    %812 = vector.broadcast %811 : f32 to vector<1x256xf32>
    %813 = arith.mulf %810, %812 : vector<1x256xf32>
    %c226_i32_254 = arith.constant 226 : i32
    %814 = tpu.dynamic_rotate %232 by %c226_i32_254 dim 1 : vector<1x256xf32>, i32 -> vector<1x256xf32>
    %c85 = arith.constant 85 : index
    %815 = memref.load %arg8[%c85] : memref<98xf32, #tpu.memory_space<smem>>
    %816 = vector.broadcast %815 : f32 to vector<1x256xf32>
    %817 = arith.mulf %814, %816 : vector<1x256xf32>
    %818 = arith.addf %813, %817 : vector<1x256xf32>
    %c2_i32_255 = arith.constant 2 : i32
    %819 = vector.broadcast %c2_i32_255 : i32 to vector<1x256xi32>
    %820 = arith.cmpi sge, %2, %819 : vector<1x256xi32>
    %c224_i32_256 = arith.constant 224 : i32
    %821 = vector.broadcast %c224_i32_256 : i32 to vector<1x256xi32>
    %822 = arith.cmpi slt, %0, %821 : vector<1x256xi32>
    %823 = arith.andi %820, %822 : vector<1x256xi1>
    %cst_257 = arith.constant 0.000000e+00 : f32
    %824 = vector.broadcast %cst_257 : f32 to vector<1x256xf32>
    %825 = arith.select %823, %818, %824 : vector<1x256xi1>, vector<1x256xf32>
    %826 = arith.addf %758, %825 : vector<1x256xf32>
    %c225_i32 = arith.constant 225 : i32
    %827 = tpu.dynamic_rotate %230 by %c225_i32 dim 1 : vector<1x256xf32>, i32 -> vector<1x256xf32>
    %c37 = arith.constant 37 : index
    %828 = memref.load %arg8[%c37] : memref<98xf32, #tpu.memory_space<smem>>
    %829 = vector.broadcast %828 : f32 to vector<1x256xf32>
    %830 = arith.mulf %827, %829 : vector<1x256xf32>
    %c225_i32_258 = arith.constant 225 : i32
    %831 = tpu.dynamic_rotate %232 by %c225_i32_258 dim 1 : vector<1x256xf32>, i32 -> vector<1x256xf32>
    %c86 = arith.constant 86 : index
    %832 = memref.load %arg8[%c86] : memref<98xf32, #tpu.memory_space<smem>>
    %833 = vector.broadcast %832 : f32 to vector<1x256xf32>
    %834 = arith.mulf %831, %833 : vector<1x256xf32>
    %835 = arith.addf %830, %834 : vector<1x256xf32>
    %c1_i32_259 = arith.constant 1 : i32
    %836 = vector.broadcast %c1_i32_259 : i32 to vector<1x256xi32>
    %837 = arith.cmpi sge, %2, %836 : vector<1x256xi32>
    %c224_i32_260 = arith.constant 224 : i32
    %838 = vector.broadcast %c224_i32_260 : i32 to vector<1x256xi32>
    %839 = arith.cmpi slt, %0, %838 : vector<1x256xi32>
    %840 = arith.andi %837, %839 : vector<1x256xi1>
    %cst_261 = arith.constant 0.000000e+00 : f32
    %841 = vector.broadcast %cst_261 : f32 to vector<1x256xf32>
    %842 = arith.select %840, %835, %841 : vector<1x256xi1>, vector<1x256xf32>
    %843 = arith.addf %775, %842 : vector<1x256xf32>
    %c224_i32_262 = arith.constant 224 : i32
    %844 = tpu.dynamic_rotate %230 by %c224_i32_262 dim 1 : vector<1x256xf32>, i32 -> vector<1x256xf32>
    %c38 = arith.constant 38 : index
    %845 = memref.load %arg8[%c38] : memref<98xf32, #tpu.memory_space<smem>>
    %846 = vector.broadcast %845 : f32 to vector<1x256xf32>
    %847 = arith.mulf %844, %846 : vector<1x256xf32>
    %c224_i32_263 = arith.constant 224 : i32
    %848 = tpu.dynamic_rotate %232 by %c224_i32_263 dim 1 : vector<1x256xf32>, i32 -> vector<1x256xf32>
    %c87 = arith.constant 87 : index
    %849 = memref.load %arg8[%c87] : memref<98xf32, #tpu.memory_space<smem>>
    %850 = vector.broadcast %849 : f32 to vector<1x256xf32>
    %851 = arith.mulf %848, %850 : vector<1x256xf32>
    %852 = arith.addf %847, %851 : vector<1x256xf32>
    %c224_i32_264 = arith.constant 224 : i32
    %853 = vector.broadcast %c224_i32_264 : i32 to vector<1x256xi32>
    %854 = arith.cmpi slt, %0, %853 : vector<1x256xi32>
    %cst_265 = arith.constant 0.000000e+00 : f32
    %855 = vector.broadcast %cst_265 : f32 to vector<1x256xf32>
    %856 = arith.select %854, %852, %855 : vector<1x256xi1>, vector<1x256xf32>
    %857 = arith.addf %792, %856 : vector<1x256xf32>
    %c223_i32 = arith.constant 223 : i32
    %858 = tpu.dynamic_rotate %230 by %c223_i32 dim 1 : vector<1x256xf32>, i32 -> vector<1x256xf32>
    %c39 = arith.constant 39 : index
    %859 = memref.load %arg8[%c39] : memref<98xf32, #tpu.memory_space<smem>>
    %860 = vector.broadcast %859 : f32 to vector<1x256xf32>
    %861 = arith.mulf %858, %860 : vector<1x256xf32>
    %c223_i32_266 = arith.constant 223 : i32
    %862 = tpu.dynamic_rotate %232 by %c223_i32_266 dim 1 : vector<1x256xf32>, i32 -> vector<1x256xf32>
    %c88 = arith.constant 88 : index
    %863 = memref.load %arg8[%c88] : memref<98xf32, #tpu.memory_space<smem>>
    %864 = vector.broadcast %863 : f32 to vector<1x256xf32>
    %865 = arith.mulf %862, %864 : vector<1x256xf32>
    %866 = arith.addf %861, %865 : vector<1x256xf32>
    %c15_i32_267 = arith.constant 15 : i32
    %867 = vector.broadcast %c15_i32_267 : i32 to vector<1x256xi32>
    %868 = arith.cmpi slt, %2, %867 : vector<1x256xi32>
    %c224_i32_268 = arith.constant 224 : i32
    %869 = vector.broadcast %c224_i32_268 : i32 to vector<1x256xi32>
    %870 = arith.cmpi slt, %0, %869 : vector<1x256xi32>
    %871 = arith.andi %868, %870 : vector<1x256xi1>
    %cst_269 = arith.constant 0.000000e+00 : f32
    %872 = vector.broadcast %cst_269 : f32 to vector<1x256xf32>
    %873 = arith.select %871, %866, %872 : vector<1x256xi1>, vector<1x256xf32>
    %874 = arith.addf %809, %873 : vector<1x256xf32>
    %c222_i32 = arith.constant 222 : i32
    %875 = tpu.dynamic_rotate %230 by %c222_i32 dim 1 : vector<1x256xf32>, i32 -> vector<1x256xf32>
    %c40 = arith.constant 40 : index
    %876 = memref.load %arg8[%c40] : memref<98xf32, #tpu.memory_space<smem>>
    %877 = vector.broadcast %876 : f32 to vector<1x256xf32>
    %878 = arith.mulf %875, %877 : vector<1x256xf32>
    %c222_i32_270 = arith.constant 222 : i32
    %879 = tpu.dynamic_rotate %232 by %c222_i32_270 dim 1 : vector<1x256xf32>, i32 -> vector<1x256xf32>
    %c89 = arith.constant 89 : index
    %880 = memref.load %arg8[%c89] : memref<98xf32, #tpu.memory_space<smem>>
    %881 = vector.broadcast %880 : f32 to vector<1x256xf32>
    %882 = arith.mulf %879, %881 : vector<1x256xf32>
    %883 = arith.addf %878, %882 : vector<1x256xf32>
    %c14_i32_271 = arith.constant 14 : i32
    %884 = vector.broadcast %c14_i32_271 : i32 to vector<1x256xi32>
    %885 = arith.cmpi slt, %2, %884 : vector<1x256xi32>
    %c224_i32_272 = arith.constant 224 : i32
    %886 = vector.broadcast %c224_i32_272 : i32 to vector<1x256xi32>
    %887 = arith.cmpi slt, %0, %886 : vector<1x256xi32>
    %888 = arith.andi %885, %887 : vector<1x256xi1>
    %cst_273 = arith.constant 0.000000e+00 : f32
    %889 = vector.broadcast %cst_273 : f32 to vector<1x256xf32>
    %890 = arith.select %888, %883, %889 : vector<1x256xi1>, vector<1x256xf32>
    %891 = arith.addf %826, %890 : vector<1x256xf32>
    %c221_i32 = arith.constant 221 : i32
    %892 = tpu.dynamic_rotate %230 by %c221_i32 dim 1 : vector<1x256xf32>, i32 -> vector<1x256xf32>
    %c41 = arith.constant 41 : index
    %893 = memref.load %arg8[%c41] : memref<98xf32, #tpu.memory_space<smem>>
    %894 = vector.broadcast %893 : f32 to vector<1x256xf32>
    %895 = arith.mulf %892, %894 : vector<1x256xf32>
    %c221_i32_274 = arith.constant 221 : i32
    %896 = tpu.dynamic_rotate %232 by %c221_i32_274 dim 1 : vector<1x256xf32>, i32 -> vector<1x256xf32>
    %c90 = arith.constant 90 : index
    %897 = memref.load %arg8[%c90] : memref<98xf32, #tpu.memory_space<smem>>
    %898 = vector.broadcast %897 : f32 to vector<1x256xf32>
    %899 = arith.mulf %896, %898 : vector<1x256xf32>
    %900 = arith.addf %895, %899 : vector<1x256xf32>
    %c13_i32_275 = arith.constant 13 : i32
    %901 = vector.broadcast %c13_i32_275 : i32 to vector<1x256xi32>
    %902 = arith.cmpi slt, %2, %901 : vector<1x256xi32>
    %c224_i32_276 = arith.constant 224 : i32
    %903 = vector.broadcast %c224_i32_276 : i32 to vector<1x256xi32>
    %904 = arith.cmpi slt, %0, %903 : vector<1x256xi32>
    %905 = arith.andi %902, %904 : vector<1x256xi1>
    %cst_277 = arith.constant 0.000000e+00 : f32
    %906 = vector.broadcast %cst_277 : f32 to vector<1x256xf32>
    %907 = arith.select %905, %900, %906 : vector<1x256xi1>, vector<1x256xf32>
    %908 = arith.addf %843, %907 : vector<1x256xf32>
    %c211_i32 = arith.constant 211 : i32
    %909 = tpu.dynamic_rotate %230 by %c211_i32 dim 1 : vector<1x256xf32>, i32 -> vector<1x256xf32>
    %c42 = arith.constant 42 : index
    %910 = memref.load %arg8[%c42] : memref<98xf32, #tpu.memory_space<smem>>
    %911 = vector.broadcast %910 : f32 to vector<1x256xf32>
    %912 = arith.mulf %909, %911 : vector<1x256xf32>
    %c211_i32_278 = arith.constant 211 : i32
    %913 = tpu.dynamic_rotate %232 by %c211_i32_278 dim 1 : vector<1x256xf32>, i32 -> vector<1x256xf32>
    %c91 = arith.constant 91 : index
    %914 = memref.load %arg8[%c91] : memref<98xf32, #tpu.memory_space<smem>>
    %915 = vector.broadcast %914 : f32 to vector<1x256xf32>
    %916 = arith.mulf %913, %915 : vector<1x256xf32>
    %917 = arith.addf %912, %916 : vector<1x256xf32>
    %c3_i32_279 = arith.constant 3 : i32
    %918 = vector.broadcast %c3_i32_279 : i32 to vector<1x256xi32>
    %919 = arith.cmpi sge, %2, %918 : vector<1x256xi32>
    %c208_i32 = arith.constant 208 : i32
    %920 = vector.broadcast %c208_i32 : i32 to vector<1x256xi32>
    %921 = arith.cmpi slt, %0, %920 : vector<1x256xi32>
    %922 = arith.andi %919, %921 : vector<1x256xi1>
    %cst_280 = arith.constant 0.000000e+00 : f32
    %923 = vector.broadcast %cst_280 : f32 to vector<1x256xf32>
    %924 = arith.select %922, %917, %923 : vector<1x256xi1>, vector<1x256xf32>
    %925 = arith.addf %857, %924 : vector<1x256xf32>
    %c210_i32 = arith.constant 210 : i32
    %926 = tpu.dynamic_rotate %230 by %c210_i32 dim 1 : vector<1x256xf32>, i32 -> vector<1x256xf32>
    %c43 = arith.constant 43 : index
    %927 = memref.load %arg8[%c43] : memref<98xf32, #tpu.memory_space<smem>>
    %928 = vector.broadcast %927 : f32 to vector<1x256xf32>
    %929 = arith.mulf %926, %928 : vector<1x256xf32>
    %c210_i32_281 = arith.constant 210 : i32
    %930 = tpu.dynamic_rotate %232 by %c210_i32_281 dim 1 : vector<1x256xf32>, i32 -> vector<1x256xf32>
    %c92 = arith.constant 92 : index
    %931 = memref.load %arg8[%c92] : memref<98xf32, #tpu.memory_space<smem>>
    %932 = vector.broadcast %931 : f32 to vector<1x256xf32>
    %933 = arith.mulf %930, %932 : vector<1x256xf32>
    %934 = arith.addf %929, %933 : vector<1x256xf32>
    %c2_i32_282 = arith.constant 2 : i32
    %935 = vector.broadcast %c2_i32_282 : i32 to vector<1x256xi32>
    %936 = arith.cmpi sge, %2, %935 : vector<1x256xi32>
    %c208_i32_283 = arith.constant 208 : i32
    %937 = vector.broadcast %c208_i32_283 : i32 to vector<1x256xi32>
    %938 = arith.cmpi slt, %0, %937 : vector<1x256xi32>
    %939 = arith.andi %936, %938 : vector<1x256xi1>
    %cst_284 = arith.constant 0.000000e+00 : f32
    %940 = vector.broadcast %cst_284 : f32 to vector<1x256xf32>
    %941 = arith.select %939, %934, %940 : vector<1x256xi1>, vector<1x256xf32>
    %942 = arith.addf %874, %941 : vector<1x256xf32>
    %c209_i32 = arith.constant 209 : i32
    %943 = tpu.dynamic_rotate %230 by %c209_i32 dim 1 : vector<1x256xf32>, i32 -> vector<1x256xf32>
    %c44 = arith.constant 44 : index
    %944 = memref.load %arg8[%c44] : memref<98xf32, #tpu.memory_space<smem>>
    %945 = vector.broadcast %944 : f32 to vector<1x256xf32>
    %946 = arith.mulf %943, %945 : vector<1x256xf32>
    %c209_i32_285 = arith.constant 209 : i32
    %947 = tpu.dynamic_rotate %232 by %c209_i32_285 dim 1 : vector<1x256xf32>, i32 -> vector<1x256xf32>
    %c93 = arith.constant 93 : index
    %948 = memref.load %arg8[%c93] : memref<98xf32, #tpu.memory_space<smem>>
    %949 = vector.broadcast %948 : f32 to vector<1x256xf32>
    %950 = arith.mulf %947, %949 : vector<1x256xf32>
    %951 = arith.addf %946, %950 : vector<1x256xf32>
    %c1_i32_286 = arith.constant 1 : i32
    %952 = vector.broadcast %c1_i32_286 : i32 to vector<1x256xi32>
    %953 = arith.cmpi sge, %2, %952 : vector<1x256xi32>
    %c208_i32_287 = arith.constant 208 : i32
    %954 = vector.broadcast %c208_i32_287 : i32 to vector<1x256xi32>
    %955 = arith.cmpi slt, %0, %954 : vector<1x256xi32>
    %956 = arith.andi %953, %955 : vector<1x256xi1>
    %cst_288 = arith.constant 0.000000e+00 : f32
    %957 = vector.broadcast %cst_288 : f32 to vector<1x256xf32>
    %958 = arith.select %956, %951, %957 : vector<1x256xi1>, vector<1x256xf32>
    %959 = arith.addf %891, %958 : vector<1x256xf32>
    %c208_i32_289 = arith.constant 208 : i32
    %960 = tpu.dynamic_rotate %230 by %c208_i32_289 dim 1 : vector<1x256xf32>, i32 -> vector<1x256xf32>
    %c45 = arith.constant 45 : index
    %961 = memref.load %arg8[%c45] : memref<98xf32, #tpu.memory_space<smem>>
    %962 = vector.broadcast %961 : f32 to vector<1x256xf32>
    %963 = arith.mulf %960, %962 : vector<1x256xf32>
    %c208_i32_290 = arith.constant 208 : i32
    %964 = tpu.dynamic_rotate %232 by %c208_i32_290 dim 1 : vector<1x256xf32>, i32 -> vector<1x256xf32>
    %c94 = arith.constant 94 : index
    %965 = memref.load %arg8[%c94] : memref<98xf32, #tpu.memory_space<smem>>
    %966 = vector.broadcast %965 : f32 to vector<1x256xf32>
    %967 = arith.mulf %964, %966 : vector<1x256xf32>
    %968 = arith.addf %963, %967 : vector<1x256xf32>
    %c208_i32_291 = arith.constant 208 : i32
    %969 = vector.broadcast %c208_i32_291 : i32 to vector<1x256xi32>
    %970 = arith.cmpi slt, %0, %969 : vector<1x256xi32>
    %cst_292 = arith.constant 0.000000e+00 : f32
    %971 = vector.broadcast %cst_292 : f32 to vector<1x256xf32>
    %972 = arith.select %970, %968, %971 : vector<1x256xi1>, vector<1x256xf32>
    %973 = arith.addf %908, %972 : vector<1x256xf32>
    %c207_i32 = arith.constant 207 : i32
    %974 = tpu.dynamic_rotate %230 by %c207_i32 dim 1 : vector<1x256xf32>, i32 -> vector<1x256xf32>
    %c46 = arith.constant 46 : index
    %975 = memref.load %arg8[%c46] : memref<98xf32, #tpu.memory_space<smem>>
    %976 = vector.broadcast %975 : f32 to vector<1x256xf32>
    %977 = arith.mulf %974, %976 : vector<1x256xf32>
    %c207_i32_293 = arith.constant 207 : i32
    %978 = tpu.dynamic_rotate %232 by %c207_i32_293 dim 1 : vector<1x256xf32>, i32 -> vector<1x256xf32>
    %c95 = arith.constant 95 : index
    %979 = memref.load %arg8[%c95] : memref<98xf32, #tpu.memory_space<smem>>
    %980 = vector.broadcast %979 : f32 to vector<1x256xf32>
    %981 = arith.mulf %978, %980 : vector<1x256xf32>
    %982 = arith.addf %977, %981 : vector<1x256xf32>
    %c15_i32_294 = arith.constant 15 : i32
    %983 = vector.broadcast %c15_i32_294 : i32 to vector<1x256xi32>
    %984 = arith.cmpi slt, %2, %983 : vector<1x256xi32>
    %c208_i32_295 = arith.constant 208 : i32
    %985 = vector.broadcast %c208_i32_295 : i32 to vector<1x256xi32>
    %986 = arith.cmpi slt, %0, %985 : vector<1x256xi32>
    %987 = arith.andi %984, %986 : vector<1x256xi1>
    %cst_296 = arith.constant 0.000000e+00 : f32
    %988 = vector.broadcast %cst_296 : f32 to vector<1x256xf32>
    %989 = arith.select %987, %982, %988 : vector<1x256xi1>, vector<1x256xf32>
    %990 = arith.addf %925, %989 : vector<1x256xf32>
    %c206_i32 = arith.constant 206 : i32
    %991 = tpu.dynamic_rotate %230 by %c206_i32 dim 1 : vector<1x256xf32>, i32 -> vector<1x256xf32>
    %c47 = arith.constant 47 : index
    %992 = memref.load %arg8[%c47] : memref<98xf32, #tpu.memory_space<smem>>
    %993 = vector.broadcast %992 : f32 to vector<1x256xf32>
    %994 = arith.mulf %991, %993 : vector<1x256xf32>
    %c206_i32_297 = arith.constant 206 : i32
    %995 = tpu.dynamic_rotate %232 by %c206_i32_297 dim 1 : vector<1x256xf32>, i32 -> vector<1x256xf32>
    %c96_298 = arith.constant 96 : index
    %996 = memref.load %arg8[%c96_298] : memref<98xf32, #tpu.memory_space<smem>>
    %997 = vector.broadcast %996 : f32 to vector<1x256xf32>
    %998 = arith.mulf %995, %997 : vector<1x256xf32>
    %999 = arith.addf %994, %998 : vector<1x256xf32>
    %c14_i32_299 = arith.constant 14 : i32
    %1000 = vector.broadcast %c14_i32_299 : i32 to vector<1x256xi32>
    %1001 = arith.cmpi slt, %2, %1000 : vector<1x256xi32>
    %c208_i32_300 = arith.constant 208 : i32
    %1002 = vector.broadcast %c208_i32_300 : i32 to vector<1x256xi32>
    %1003 = arith.cmpi slt, %0, %1002 : vector<1x256xi32>
    %1004 = arith.andi %1001, %1003 : vector<1x256xi1>
    %cst_301 = arith.constant 0.000000e+00 : f32
    %1005 = vector.broadcast %cst_301 : f32 to vector<1x256xf32>
    %1006 = arith.select %1004, %999, %1005 : vector<1x256xi1>, vector<1x256xf32>
    %1007 = arith.addf %942, %1006 : vector<1x256xf32>
    %c205_i32 = arith.constant 205 : i32
    %1008 = tpu.dynamic_rotate %230 by %c205_i32 dim 1 : vector<1x256xf32>, i32 -> vector<1x256xf32>
    %c48 = arith.constant 48 : index
    %1009 = memref.load %arg8[%c48] : memref<98xf32, #tpu.memory_space<smem>>
    %1010 = vector.broadcast %1009 : f32 to vector<1x256xf32>
    %1011 = arith.mulf %1008, %1010 : vector<1x256xf32>
    %c205_i32_302 = arith.constant 205 : i32
    %1012 = tpu.dynamic_rotate %232 by %c205_i32_302 dim 1 : vector<1x256xf32>, i32 -> vector<1x256xf32>
    %c97 = arith.constant 97 : index
    %1013 = memref.load %arg8[%c97] : memref<98xf32, #tpu.memory_space<smem>>
    %1014 = vector.broadcast %1013 : f32 to vector<1x256xf32>
    %1015 = arith.mulf %1012, %1014 : vector<1x256xf32>
    %1016 = arith.addf %1011, %1015 : vector<1x256xf32>
    %c13_i32_303 = arith.constant 13 : i32
    %1017 = vector.broadcast %c13_i32_303 : i32 to vector<1x256xi32>
    %1018 = arith.cmpi slt, %2, %1017 : vector<1x256xi32>
    %c208_i32_304 = arith.constant 208 : i32
    %1019 = vector.broadcast %c208_i32_304 : i32 to vector<1x256xi32>
    %1020 = arith.cmpi slt, %0, %1019 : vector<1x256xi32>
    %1021 = arith.andi %1018, %1020 : vector<1x256xi1>
    %cst_305 = arith.constant 0.000000e+00 : f32
    %1022 = vector.broadcast %cst_305 : f32 to vector<1x256xf32>
    %1023 = arith.select %1021, %1016, %1022 : vector<1x256xi1>, vector<1x256xf32>
    %1024 = arith.addf %959, %1023 : vector<1x256xf32>
    %1025 = arith.addf %1024, %973 : vector<1x256xf32>
    %1026 = arith.addf %990, %1007 : vector<1x256xf32>
    %1027 = arith.addf %1025, %1026 : vector<1x256xf32>
    %1028 = arith.negf %1027 : vector<1x256xf32>
    %1029 = math.exp %1028 : vector<1x256xf32>
    %cst_306 = arith.constant 1.000000e+00 : f32
    %1030 = vector.broadcast %cst_306 : f32 to vector<1x256xf32>
    %1031 = arith.addf %1030, %1029 : vector<1x256xf32>
    %1032 = arith.divf %1030, %1031 : vector<1x256xf32>
    %1033 = vector.broadcast %1032 : vector<1x256xf32> to vector<32x256xf32>
    %1034 = arith.mulf %226, %1033 : vector<32x256xf32>
    %1035 = arith.addf %1034, %4 : vector<32x256xf32>
    %cst_307 = arith.constant 0.000000e+00 : f32
    %1036 = vector.broadcast %cst_307 : f32 to vector<32x256xf32>
    %1037 = arith.maximumf %1035, %1036 : vector<32x256xf32>
    %c0_308 = arith.constant 0 : index
    %c0_309 = arith.constant 0 : index
    %c0_310 = arith.constant 0 : index
    %1038 = vector.load %arg9[%c0_308, %c0_309, %c0_310] : memref<1x32x256xf32, #tpu.memory_space<vmem>>, vector<1x32x256xf32>
    %1039 = vector.shape_cast %1038 : vector<1x32x256xf32> to vector<32x256xf32>
    %1040 = vector.shape_cast %1037 : vector<32x256xf32> to vector<1x32x256xf32>
    tpu.vector_store %arg9[%c0_308, %c0_309, %c0_310], %1040 {strides = array<i32>} : memref<1x32x256xf32, #tpu.memory_space<vmem>>, vector<1x32x256xf32>,
    return
  }
  func.func @transform_0(%arg0: i32) -> (i32, i32, i32) {
    %c0_i32 = arith.constant 0 : i32
    %c0_i32_0 = arith.constant 0 : i32
    %c0_i32_1 = arith.constant 0 : i32
    return %arg0, %c0_i32, %c0_i32_0 : i32, i32, i32
  }
  func.func @transform_1(%arg0: i32) -> (i32, i32) {
    %c0_i32 = arith.constant 0 : i32
    %c0_i32_0 = arith.constant 0 : i32
    %c0_i32_1 = arith.constant 0 : i32
    return %c0_i32, %c0_i32_0 : i32, i32
  }
  func.func @transform_2(%arg0: i32) -> (i32, i32) {
    %c0_i32 = arith.constant 0 : i32
    %c0_i32_0 = arith.constant 0 : i32
    %c0_i32_1 = arith.constant 0 : i32
    return %c0_i32, %c0_i32_0 : i32, i32
  }
  func.func @transform_3(%arg0: i32) -> (i32, i32) {
    %c0_i32 = arith.constant 0 : i32
    %c0_i32_0 = arith.constant 0 : i32
    %c0_i32_1 = arith.constant 0 : i32
    return %c0_i32, %c0_i32_0 : i32, i32
  }
  func.func @transform_4(%arg0: i32) -> (i32, i32) {
    %c0_i32 = arith.constant 0 : i32
    %c0_i32_0 = arith.constant 0 : i32
    %c0_i32_1 = arith.constant 0 : i32
    return %c0_i32, %c0_i32_0 : i32, i32
  }
  func.func @transform_5(%arg0: i32) -> (i32, i32) {
    %c0_i32 = arith.constant 0 : i32
    %c0_i32_0 = arith.constant 0 : i32
    %c0_i32_1 = arith.constant 0 : i32
    return %c0_i32, %c0_i32_0 : i32, i32
  }
  func.func @transform_6(%arg0: i32) -> (i32, i32) {
    %c0_i32 = arith.constant 0 : i32
    %c0_i32_0 = arith.constant 0 : i32
    %c0_i32_1 = arith.constant 0 : i32
    return %c0_i32, %c0_i32_0 : i32, i32
  }
  func.func @transform_7(%arg0: i32) -> i32 {
    %c0_i32 = arith.constant 0 : i32
    %c0_i32_0 = arith.constant 0 : i32
    return %c0_i32 : i32
  }
  func.func @transform_8(%arg0: i32) -> (i32, i32, i32) {
    %c0_i32 = arith.constant 0 : i32
    %c0_i32_0 = arith.constant 0 : i32
    %c0_i32_1 = arith.constant 0 : i32
    return %arg0, %c0_i32, %c0_i32_0 : i32, i32, i32
  }
}

</mosaic_0001>

<bundles_post_ra>
// kernel: tpu_custom_call.1
= control target key start
LH: loop header
LB: loop body
LE: loop exit
PB: predicated region body
PF: predicated region fallthrough
CT: control target
= control target key end

     0   :  { %s7761_s0 = inlined_call_operand.vmem [shape: f32[2,32,256], index: 0, kind: input, shape index: {}]   ;;  %s7762_s1 = inlined_call_operand.hbm [shape: bf16[32,288], index: 1, kind: input, shape index: {}]   ;;  %s7763_s2 = inlined_call_operand.vmem [shape: f32[32,1], index: 2, kind: input, shape index: {}]   ;;  %s7764_s3 = inlined_call_operand.hbm [shape: bf16[32,288], index: 3, kind: input, shape index: {}]   ;;  %s7765_s4 = inlined_call_operand.vmem [shape: f32[32,1], index: 4, kind: input, shape index: {}]   ;;  %s7766_s5 = inlined_call_operand.vmem [shape: f32[32,2], index: 5, kind: input, shape index: {}]   ;;  %s7767_s6 = inlined_call_operand.vmem [shape: f32[32,2], index: 6, kind: input, shape index: {}]   ;;  %s7768_s7 = inlined_call_operand.vmem [shape: f32[98], index: 7, kind: input, shape index: {}]   ;;  %s7769_s8 = inlined_call_operand.hbm [shape: f32[2,32,256], index: 8, kind: output, shape index: {}]  }
   0x1   :  { %7937 = sst [smem:[#allocation90_spill]] %s7761_s0 }
   0x2   :  { %7938 = sst [smem:[#allocation91_spill]] %s7768_s7 }
   0x3   :  { %13 = vsyncpa [#allocation4], 0 }
   0x4   :  { %14 = vsyncpa [#allocation8], 0 }
   0x5   :  { %15 = vsyncpa [#allocation6], 0 }
   0x6   :  { %16 = vsyncpa [#allocation5], 0 }
   0x7   :  { %18 = vsyncpa [#allocation5 + $0x1], 0  ;;  %s4311_s27 = smov 0   ;;  %s4313_s28 = smov 0  }
   0x8   :  { %s4315_s29 = smov 0   ;;  %s4317_s30 = smov 0  }
   0x9 LB: > { %7939 = sst [smem:[#allocation15_spill]] %s4204_s29  ;;  %s4332_s9 = sadd.s32 4294967295, %s4208_s30   ;;  %s4208_s30 = sphi %s4317_s30, %s8437_s30   ;;  %s4204_s29 = sphi %s4315_s29, %s8439_s29   ;;  %s4200_s28 = sphi %s4313_s28, %s8441_s28   ;;  %s4196_s27 = sphi %s4311_s27, %s8440_s27  }
   0xa   : > { %s3232_s10 = sadd.s32 4294967294, %s4208_s30   ;;  %s4336_s11 = sadd.s32 1, %s4208_s30  }
   0xb   : > { %7940 = sst [smem:[#allocation16_spill]] %s4336_s11  ;;  %s204_s12 = sadd.s32 1, %s4204_s29 }
   0xc   : > { %s201_s13 = ssub.s32 %s4208_s30, %s4336_s11  ;;  %p214_p0 = scmp.ne.s32.totalorder %s4204_s29, %s4200_s28 }
   0xd   : > { %p202_p1 = scmp.eq.s32.totalorder %s201_s13, 0  ;;  %p215_p2 = scmp.eq.s32.totalorder %s4332_s9, 1 }
   0xe   : > { %p220_p3 = scmp.ne.s32.totalorder %s4200_s28, %s4196_s27  ;;  %p221_p4 = scmp.eq.s32.totalorder %s3232_s10, 1 }
   0xf   : > { %s4347_s14 = scalar_select %p202_p1, %s4204_s29, %s204_s12  }
  0x10   : > { %p4349_p5 = por %p215_p2, %p214_p0  ;;  %p4353_p6 = por %p221_p4, %p220_p3 }
  0x11   : > { %7941 = sst [smem:[#allocation17_spill]] %s4347_s14  ;;  %p3233_p7 = scmp.ge.s32.totalorder %s4208_s30, 1 }
  0x12   : > { %s7943_s16 = scalar_select %p4353_p6, 1, 0 }
  0x13   : > { %p228_p8 = scmp.lt.s32.totalorder %s4208_s30, 3  ;;  %p7770_p9 = scmp.eq.s32.totalorder %s4332_s9, 0 }
  0x14   : > { %s4210_s18 = smov [#allocation3]   ;;  %s4211_s21 = smov [#allocation7]  }
  0x15   : > { %p4360_p10 = pnand %p3233_p7, %p228_p8  ;;  %s240_s19 = sshll.u32 %s4210_s18, 4  ;;  %s4366_s19 = int_to_ptr.vmem [resolvable:$true] %s240_s19 }
  0x16   : > { %s256_s22 = sshll.u32 %s4211_s21, 4  ;;  %s7946_s7 = sld [smem:[#allocation91_spill]]  ;;  %s4374_s22 = int_to_ptr.vmem [resolvable:$true] %s256_s22 }
  0x17   : > { %p3585_p11 = pneg %p4360_p10  ;;  %s4063_s12 = scalar_lea.hbm %s7762_s1, 768 }
  0x18   : > { %p4064_p13 = scmp.ne.s32.totalorder %s7762_s1, %s4063_s12  ;;  %p4070_p3 = scmp.lt.u32.totalorder %s4063_s12, %s7762_s1 }
  0x19   : > { %p4370_p12 = pnand %p7770_p9, %p3585_p11 }
  0x1b   : > { %p4389_p0 = pneg %p4370_p12 }
  0x1c   : > { %s279_s25 = sshll.u32 %s7946_s7, 4  ;;  %s4379_s25 = int_to_ptr.vmem [resolvable:$true] %s279_s25 }
  0x1d   : > { %p4066_p1 = pnand %p4389_p0, %p4064_p13 }
  0x1f   : > { %p4067_p2 = pneg %p4066_p1 }
  0x21   : > { %p4072_p4 = pnand %p4070_p3, %p4067_p2 }
  0x23   : > { %4075 = shalt.err (!%p4072_p4)
}
  0x24   : > { %s4076_s24 = scalar_lea.vmem %s4366_s19, 768  ;;  %p4084_p9 = scmp.lt.s32.totalorder %s4366_s19, %s4366_s19 }
  0x25   : > { %p4077_p7 = scmp.ne.s32.totalorder %s4366_s19, %s4076_s24  ;;  %p4085_p6 = scmp.lt.s32.totalorder %s4076_s24, %s4076_s24 }
  0x27   : > { %p4079_p8 = pnand %p4077_p7, %p4389_p0  ;;  %p4086_p13 = por %p4085_p6, %p4084_p9 }
  0x29   : > { %p4080_p11 = pneg %p4079_p8 }
  0x2b   : > { %p4087_p1 = pnand %p4086_p13, %p4080_p11 }
  0x2d   : > { %4090 = shalt.err (!%p4087_p1)
}
  0x2e   : > { %s4212_s26 = smov 192   ;;  %s4213_s10 = smov 12  }
  0x2f   : > { %3588 = dma.hbm_to_vmem [thread:$0]  (!%p4370_p12), %s7762_s1, 768, %s4366_s19, [#allocation4], %s4212_s26, %s4212_s26, %s4213_s10  }
  0x30   : > { %s4091_s23 = scalar_lea.hbm %s7764_s3, 768 }
  0x31   : > { %p4092_p6 = scmp.ne.s32.totalorder %s7764_s3, %s4091_s23  ;;  %p4098_p3 = scmp.lt.u32.totalorder %s4091_s23, %s7764_s3 }
  0x33   : > { %p4094_p9 = pnand %p4092_p6, %p4389_p0 }
  0x35   : > { %p4095_p2 = pneg %p4094_p9 }
  0x37   : > { %p4100_p4 = pnand %p4098_p3, %p4095_p2 }
  0x39   : > { %4103 = shalt.err (!%p4100_p4)
}
  0x3a   : > { %s4104_s19 = scalar_lea.vmem %s4374_s22, 768  ;;  %p4112_p13 = scmp.lt.s32.totalorder %s4374_s22, %s4374_s22 }
  0x3b   : > { %p4105_p7 = scmp.ne.s32.totalorder %s4374_s22, %s4104_s19  ;;  %p4113_p1 = scmp.lt.s32.totalorder %s4104_s19, %s4104_s19 }
  0x3d   : > { %p4107_p8 = pnand %p4105_p7, %p4389_p0  ;;  %p4114_p6 = por %p4113_p1, %p4112_p13 }
  0x3f   : > { %p4108_p11 = pneg %p4107_p8 }
  0x41   : > { %p4115_p9 = pnand %p4114_p6, %p4108_p11 }
  0x43   : > { %4118 = shalt.err (!%p4115_p9)
}
  0x44   : > { %3591 = dma.hbm_to_vmem [thread:$0]  (!%p4370_p12), %s7764_s3, 768, %s4374_s22, [#allocation8], %s4212_s26, %s4212_s26, %s4213_s10  }
  0x45   : > { %s4119_s11 = scalar_lea.vmem %s4379_s25, 16  ;;  %p4127_p7 = scmp.lt.s32.totalorder %s4379_s25, %s4379_s25 }
  0x46   : > { %p4120_p2 = scmp.ne.s32.totalorder %s4379_s25, %s4119_s11  ;;  %p4128_p8 = scmp.lt.s32.totalorder %s4119_s11, %s4119_s11 }
  0x48   : > { %p4122_p3 = pnand %p4120_p2, %p4389_p0  ;;  %p4129_p11 = por %p4128_p8, %p4127_p7 }
  0x4a   : > { %p4123_p4 = pneg %p4122_p3 }
  0x4c   : > { %p4130_p13 = pnand %p4129_p11, %p4123_p4 }
  0x4e   : > { %4133 = shalt.err (!%p4130_p13)
}
  0x4f   : > { %s4214_s12 = smov [#allocation9]   ;;  %300 = sbr.rel (%p4360_p10) target bundleno = 1914 (0x77a), region = 52 }
  0x50   : > { %3594 = dma.vmem_to_smem (!%p4370_p12), %s4379_s25, 16, %s4214_s12, [#allocation6]  }
  0x56   : > { %p7948_p1 = scmp.eq.s32.totalorder %s4332_s9, 0 }
  0x58   : > { %4179 = dma.done.wait (%p7948_p1), [#allocation4], 768   ;;  %p7949_p0 = pmov %p7948_p1 }
  0x5a   : > { %4181 = vsyncadd (%p7949_p0), [#allocation4], 4294966528  ;;  %p7950_p6 = pmov %p7949_p0 }
  0x5b   : > { %p7951_p9 = pmov %p7949_p0 }
  0x5c   : > { %4183 = dma.done.wait (%p7950_p6), [#allocation8], 768  }
  0x5d   : > { %4185 = vsyncadd (%p7951_p9), [#allocation8], 4294966528  ;;  %p7952_p2 = pmov %p7949_p0 }
  0x5e   : > { %p7953_p12 = pmov %p7949_p0 }
  0x5f   : > { %4187 = dma.done.wait (%p7952_p2), [#allocation6], 16  }
  0x60   : > { %4189 = vsyncadd (%p7953_p12), [#allocation6], 4294967280 }
  0x61   : > { %314 = sfence }
  0x62   : > { %p343_p10 = scmp.lt.s32.totalorder %s4332_s9, 1  ;;  %s7954_s0 = sld [smem:[#allocation90_spill]]  ;;  %v4017_v12 = vld [vmem:[#allocation3 + $0x4] ss:$12 sps:$4 sm:$0xff]   ;;  %v4223_v13 = vmov 0   ;;  %v791_v15 = vld [vmem:[%s7763_s2 + $0x8] sm:$0xff]  ;;  %v7853_v18 = vlaneseq }
  0x63   : > { %s7809_s26 = smov 17   ;;  %s7811_s10 = smov 16   ;;  %883 = vmatprep.mubr.bf16.mxu0 %v4017_v12  ;;  %3853 = vset.pattern.permute.xlu0 %v4223_v13  ;;  %v790_v14 = vld [vmem:[%s7763_s2] sm:$0xff]  ;;  %v792_v16 = vld [vmem:[%s7763_s2 + $0x10] sm:$0xff]  ;;  %v793_v17 = vld [vmem:[%s7763_s2 + $0x18] sm:$0xff] }
  0x64   : > { %s344_s14 = scalar_select %p343_p10, %s4332_s9, 1  ;;  %3854 = vset.pattern.permute.xlu1 %v4223_v13  ;;  %v4542_v19 = vand.u32 127, %v7853_v18 }
  0x65   : > { %s7813_s13 = smov 15   ;;  %s7819_s18 = smov 1  }
  0x66   : > { %s3369_s17 = sshll.u32 %s344_s14, 6  ;;  %s7821_s21 = smov 127   ;;  %v4545_v20 = vadd.s32 128, %v4542_v19  ;;  %v4548_v21 = vand.u32 15, %v4542_v19  ;;  %vm7774_vm1 = vcmp.ge.s32.totalorder %v4542_v19, 16  ;;  %vm7783_vm2 = vcmp.lt.s32.totalorder %v4542_v19, 17 }
  0x67   : > { %s7823_s23 = smov 113   ;;  %s7825_s24 = smov 112   ;;  %vm7778_vm5 = vcmp.lt.s32.totalorder %v4542_v19, 16  ;;  %vm7777_vm8 = vcmp.lt.s32.totalorder %v4542_v19, 15  ;;  %vm4624_vm9 = vmpackc.low %vm7774_vm1, %vm7774_vm1  ;;  %vm7776_vm14 = vcmp.lt.s32.totalorder %v4542_v19, 1 }
  0x68   : > { %s4461_s25 = scalar_lea.vmem %s7954_s0, %s3369_s17  ;;  %s7827_s19 = smov 111   ;;  %7955 = vst [vmem:[#allocation18_spill] sm:$0xff] %v4545_v20  ;;  %v4551_v24 = vand.u32 15, %v4545_v20  ;;  %vm7775_vm0 = vcmp.ge.s32.totalorder %v4548_v21, 1  ;;  %vm7779_vm11 = vcmp.lt.s32.totalorder %v4548_v21, 15 }
  0x69   : > { %v4464_v0 = vld [vmem:[%s4461_s25 + $0x20] sm:$0xff]  ;;  %v4467_v1 = vld [vmem:[%s4461_s25 + $0x30] sm:$0xff]  ;;  %v4478_v5 = vld [vmem:[%s4461_s25 + $0x28] sm:$0xff]  ;;  %s4224_s7 = smov 51   ;;  %s4225_s29 = smov 50  }
  0x6a   : > { %v4470_v2 = vld [vmem:[%s4461_s25] sm:$0xff]  ;;  %v3703_v3 = vpack.i.bf16 %v4467_v1, %v4464_v0  ;;  %v4475_v4 = vld [vmem:[%s4461_s25 + $0x10] sm:$0xff]  ;;  %v4481_v6 = vld [vmem:[%s4461_s25 + $0x38] sm:$0xff]  ;;  %vm7780_vm3 = vcmp.ge.s32.totalorder %v4551_v24, 1  ;;  %vm7787_vm10 = vcmp.lt.s32.totalorder %v4551_v24, 15  ;;  %s4226_s11 = smov 49  }
  0x6b   : > { %v3693_v7 = vpack.i.bf16 %v4475_v4, %v4470_v2  ;;  %v4486_v8 = vld [vmem:[%s4461_s25 + $0x8] sm:$0xff]  ;;  %v4489_v9 = vld [vmem:[%s4461_s25 + $0x18] sm:$0xff]  ;;  %v3708_v10 = vpack.i.bf16 %v4481_v6, %v4478_v5  ;;  %vm4561_vm4 = vmand %vm7775_vm0, %vm7774_vm1  ;;  %s4227_s12 = smov 48   ;;  %s7791_s14 = smov 47  }
  0x6c   : > { %3704 = vrot.lane.b32.xlu1 %v3703_v3, %s7809_s26  ;;  %v3698_v11 = vpack.i.bf16 %v4489_v9, %v4486_v8  ;;  %vm4577_vm6 = vmpackc.low %vm7780_vm3, %vm7780_vm3  ;;  %s7793_s17 = smov 46   ;;  %s7795_s20 = smov 45  }
  0x6d   : > { %3694 = vrot.lane.b32.xlu0 %v3693_v7, %s7809_s26  ;;  %vm4588_vm7 = vmpackc.low %vm4561_vm4, %vm4561_vm4  ;;  %s7797_s22 = smov 35   ;;  %s6936_s0 = sld [smem:[#allocation9 + $0x60]] }
  0x6e   : > { %vm4643_vm12 = vmpackc.low %vm7787_vm10, %vm7787_vm10 }
  0x6f   : > { %vm4651_vm13 = vmand %vm7779_vm11, %vm7774_vm1 }
  0x70   : > { %3709 = vrot.lane.b32.xlu1 %v3708_v10, %s7809_s26  ;;  %vm4671_vm15 = vmpackc.low %vm4651_vm13, %vm4651_vm13 }
  0x71   : > { %3699 = vrot.lane.b32.xlu0 %v3698_v11, %s7809_s26  ;;  %vm4702_vm1 = vmpackc.low %vm7775_vm0, %vm7775_vm0  ;;  %vm7781_vm0 = vcmp.lt.s32.totalorder %v4542_v19, 127 }
  0x74   : > { %3719 = vrot.lane.b32.xlu1 %v3698_v11, %s7811_s10 }
  0x75   : > { %3714 = vrot.lane.b32.xlu0 %v3693_v7, %s7811_s10 }
  0x78   : > { %3729 = vrot.lane.b32.xlu1 %v3708_v10, %s7811_s10 }
  0x79   : > { %3724 = vrot.lane.b32.xlu0 %v3703_v3, %s7811_s10 }
  0x7c   : > { %3739 = vrot.lane.b32.xlu1 %v3698_v11, %s7813_s13 }
  0x7d   : > { %3734 = vrot.lane.b32.xlu0 %v3693_v7, %s7813_s13 }
  0x80   : > { %3749 = vrot.lane.b32.xlu1 %v3708_v10, %s7813_s13 }
  0x81   : > { %3744 = vrot.lane.b32.xlu0 %v3703_v3, %s7813_s13 }
  0x84   : > { %3759 = vrot.lane.b32.xlu1 %v3698_v11, %s7819_s18 }
  0x85   : > { %3754 = vrot.lane.b32.xlu0 %v3693_v7, %s7819_s18 }
  0x88   : > { %3769 = vrot.lane.b32.xlu1 %v3708_v10, %s7819_s18 }
  0x89   : > { %3764 = vrot.lane.b32.xlu0 %v3703_v3, %s7819_s18 }
  0x8c   : > { %3779 = vrot.lane.b32.xlu1 %v3698_v11, %s7821_s21 }
  0x8d   : > { %3774 = vrot.lane.b32.xlu0 %v3693_v7, %s7821_s21 }
  0x90   : > { %3789 = vrot.lane.b32.xlu1 %v3708_v10, %s7821_s21 }
  0x91   : > { %3784 = vrot.lane.b32.xlu0 %v3703_v3, %s7821_s21 }
  0x94   : > { %3799 = vrot.lane.b32.xlu1 %v3698_v11, %s7823_s23 }
  0x95   : > { %3794 = vrot.lane.b32.xlu0 %v3693_v7, %s7823_s23 }
  0x98   : > { %3809 = vrot.lane.b32.xlu1 %v3708_v10, %s7823_s23 }
  0x99   : > { %3804 = vrot.lane.b32.xlu0 %v3703_v3, %s7823_s23 }
  0x9c   : > { %3819 = vrot.lane.b32.xlu1 %v3698_v11, %s7825_s24 }
  0x9d   : > { %3814 = vrot.lane.b32.xlu0 %v3693_v7, %s7825_s24 }
  0xa0   : > { %3829 = vrot.lane.b32.xlu1 %v3708_v10, %s7825_s24 }
  0xa1   : > { %3824 = vrot.lane.b32.xlu0 %v3703_v3, %s7825_s24 }
  0xa4   : > { %3839 = vrot.lane.b32.xlu1 %v3698_v11, %s7827_s19 }
  0xa5   : > { %3834 = vrot.lane.b32.xlu0 %v3693_v7, %s7827_s19 }
  0xa8   : > { %3849 = vrot.lane.b32.xlu1 %v3708_v10, %s7827_s19 }
  0xa9   : > { %3844 = vrot.lane.b32.xlu0 %v3703_v3, %s7827_s19 }
  0xac   : > { %801 = vperm.xlu1 %3854, %v791_v15  }
  0xad   : > { %796 = vperm.xlu0 %3853, %v790_v14  }
  0xb0   : > { %806 = vperm.xlu1 %3854, %v792_v16  }
  0xb1   : > { %811 = vperm.xlu0 %3853, %v793_v17  }
  0xde   : > { %v3705_v22 = vpop.permute.xlu1 %3704 }
  0xdf   : > { %v3695_v23 = vpop.permute.xlu0 %3694  ;;  %v3707_v25 = vunpack.i.h.bf16 %v3705_v22  ;;  %v3706_v26 = vunpack.i.l.bf16 %v3705_v22 }
  0xe0   : > { %v3697_v31 = vunpack.i.h.bf16 %v3695_v23  ;;  %v3696_v32 = vunpack.i.l.bf16 %v3695_v23 }
  0xe2   : > { %v3710_v27 = vpop.permute.xlu1 %3709 }
  0xe3   : > { %v3712_v28 = vunpack.i.h.bf16 %v3710_v27  ;;  %v3711_v29 = vunpack.i.l.bf16 %v3710_v27  ;;  %v3700_v30 = vpop.permute.xlu0 %3699 }
  0xe4   : > { %v3702_v33 = vunpack.i.h.bf16 %v3700_v30  ;;  %v3701_v34 = vunpack.i.l.bf16 %v3700_v30 }
  0xe5   : > { %v381_v36 = vsel %vm7783_vm2, %v3706_v26, %v3711_v29  ;;  %v382_v37 = vsel %vm7783_vm2, %v3707_v25, %v3712_v28  ;;  %v385_v52 = vsel %vm7783_vm2, %v3711_v29, %v3706_v26  ;;  %v386_v53 = vsel %vm7783_vm2, %v3712_v28, %v3707_v25 }
  0xe6   : > { %v379_v38 = vsel %vm7783_vm2, %v3696_v32, %v3701_v34  ;;  %v380_v39 = vsel %vm7783_vm2, %v3697_v31, %v3702_v33  ;;  %v383_v41 = vsel %vm7783_vm2, %v3701_v34, %v3696_v32  ;;  %v384_v42 = vsel %vm7783_vm2, %v3702_v33, %v3697_v31  ;;  %v3720_v43 = vpop.permute.xlu1 %3719 }
  0xe7   : > { %v3372_v44 = vpack.c.bf16 %v380_v39, %v379_v38  ;;  %v3375_v46 = vpack.c.bf16 %v384_v42, %v383_v41  ;;  %v3722_v47 = vunpack.i.h.bf16 %v3720_v43  ;;  %v3721_v48 = vunpack.i.l.bf16 %v3720_v43  ;;  %v3715_v49 = vpop.permute.xlu0 %3714 }
  0xe8   : > { %v3717_v50 = vunpack.i.h.bf16 %v3715_v49  ;;  %v3716_v51 = vunpack.i.l.bf16 %v3715_v49  ;;  %v3378_v54 = vpack.c.bf16 %v382_v37, %v381_v36  ;;  %v3381_v3 = vpack.c.bf16 %v386_v53, %v385_v52 }
  0xe9   : > { %3373 = vmatprep.subr.msk.bf16.mxu0 %vm4577_vm6, %v3372_v44  ;;  %vm7789_vm2 = vcmp.lt.s32.totalorder %v4542_v19, 111 }
  0xea   : > { %3376 = vmatpush1.bf16.msk.msra.mxu0 %vm4588_vm7, %v3375_v46  ;;  %v435_v55 = vsel %vm7778_vm5, %v3722_v47, %v3717_v50  ;;  %v3730_v56 = vpop.permute.xlu1 %3729  ;;  %v430_v57 = vsel %vm7778_vm5, %v3716_v51, %v3721_v48  ;;  %v431_v58 = vsel %vm7778_vm5, %v3717_v50, %v3722_v47  ;;  %v434_v59 = vsel %vm7778_vm5, %v3721_v48, %v3716_v51 }
  0xeb   : > { %3379 = vmatprep.subr.msk.bf16.mxu0 %vm4577_vm6, %v3378_v54  ;;  %v3732_v60 = vunpack.i.h.bf16 %v3730_v56  ;;  %v3731_v61 = vunpack.i.l.bf16 %v3730_v56  ;;  %v3725_v62 = vpop.permute.xlu0 %3724  ;;  %v451_v63 = vpack.c.bf16 %v431_v58, %v430_v57  ;;  %v3384_v12 = vpack.c.bf16 %v435_v55, %v434_v59 }
  0xec   : > { %v3727_v7 = vunpack.i.h.bf16 %v3725_v62  ;;  %v3726_v10 = vunpack.i.l.bf16 %v3725_v62  ;;  %v7966_v46 = vmov 0 }
  0xed   : > { %v7967_v46 = vsel %vm4651_vm13, 4294967295, %v7966_v46 }
  0xee   : > { %3382 = vmatpush1.bf16.msk.msra.mxu0 %vm4588_vm7, %v3381_v3  ;;  %v437_v11 = vsel %vm7778_vm5, %v3732_v60, %v3727_v7  ;;  %v3740_v14 = vpop.permute.xlu1 %3739  ;;  %v432_v15 = vsel %vm7778_vm5, %v3726_v10, %v3731_v61  ;;  %v433_v16 = vsel %vm7778_vm5, %v3727_v7, %v3732_v60  ;;  %v436_v17 = vsel %vm7778_vm5, %v3731_v61, %v3726_v10  ;;  %vm4744_vm5 = vmpackc.low %vm7779_vm11, %vm7779_vm11 }
  0xef   : > { %855 = vmatprep.subr.bf16.mxu0 %v451_v63  ;;  %v3742_v23 = vunpack.i.h.bf16 %v3740_v14  ;;  %v3741_v25 = vunpack.i.l.bf16 %v3740_v14  ;;  %v3735_v26 = vpop.permute.xlu0 %3734  ;;  %v453_v27 = vpack.c.bf16 %v433_v16, %v432_v15  ;;  %v3387_v33 = vpack.c.bf16 %v437_v11, %v436_v17  ;;  %7968 = vst [vmem:[#allocation19_spill] sm:$0xff] %v7967_v46 }
  0xf0   : > { %v3737_v28 = vunpack.i.h.bf16 %v3735_v26  ;;  %v3736_v29 = vunpack.i.l.bf16 %v3735_v26 }
  0xf2   : > { %3385 = vmatpush1.bf16.msk.msra.mxu0 %vm4624_vm9, %v3384_v12  ;;  %v476_v30 = vsel %vm7777_vm8, %v3737_v28, %v3742_v23  ;;  %v480_v31 = vsel %vm7777_vm8, %v3742_v23, %v3737_v28  ;;  %v475_v32 = vsel %vm7777_vm8, %v3736_v29, %v3741_v25  ;;  %v3750_v34 = vpop.permute.xlu1 %3749  ;;  %v479_v36 = vsel %vm7777_vm8, %v3741_v25, %v3736_v29 }
  0xf3   : > { %857 = vmatprep.subr.bf16.mxu0 %v453_v27  ;;  %v3752_v37 = vunpack.i.h.bf16 %v3750_v34  ;;  %v3751_v38 = vunpack.i.l.bf16 %v3750_v34  ;;  %v3745_v39 = vpop.permute.xlu0 %3744  ;;  %v3390_v42 = vpack.c.bf16 %v476_v30, %v475_v32  ;;  %v3393_v50 = vpack.c.bf16 %v480_v31, %v479_v36 }
  0xf4   : > { %v3747_v43 = vunpack.i.h.bf16 %v3745_v39  ;;  %v3746_v44 = vunpack.i.l.bf16 %v3745_v39 }
  0xf6   : > { %3388 = vmatpush1.bf16.msk.msra.mxu0 %vm4624_vm9, %v3387_v33  ;;  %v478_v47 = vsel %vm7777_vm8, %v3747_v43, %v3752_v37  ;;  %v482_v48 = vsel %vm7777_vm8, %v3752_v37, %v3747_v43  ;;  %v477_v49 = vsel %vm7777_vm8, %v3746_v44, %v3751_v38  ;;  %v3760_v51 = vpop.permute.xlu1 %3759  ;;  %v481_v52 = vsel %vm7777_vm8, %v3751_v38, %v3746_v44 }
  0xf7   : > { %3391 = vmatprep.subr.msk.bf16.mxu0 %vm4643_vm12, %v3390_v42  ;;  %v3762_v54 = vunpack.i.h.bf16 %v3760_v51  ;;  %v3761_v55 = vunpack.i.l.bf16 %v3760_v51  ;;  %v3755_v56 = vpop.permute.xlu0 %3754  ;;  %v3396_v57 = vpack.c.bf16 %v478_v47, %v477_v49  ;;  %v3399_v63 = vpack.c.bf16 %v482_v48, %v481_v52 }
  0xf8   : > { %v3757_v58 = vunpack.i.h.bf16 %v3755_v56  ;;  %v3756_v59 = vunpack.i.l.bf16 %v3755_v56  ;;  %v553_v33 = vpack.c.bf16 %v4489_v9, %v4486_v8  ;;  %v552_v43 = vpack.c.bf16 %v4475_v4, %v4470_v2 }
  0xf9   : > { %v555_v47 = vpack.c.bf16 %v4481_v6, %v4478_v5  ;;  %vm7786_vm8 = vcmp.lt.s32.totalorder %v4545_v20, 240 }
  0xfa   : > { %3394 = vmatpush1.bf16.msk.msra.mxu0 %vm4671_vm15, %v3393_v50  ;;  %v525_v60 = vsel %vm7776_vm14, %v3757_v58, %v3762_v54  ;;  %v529_v61 = vsel %vm7776_vm14, %v3762_v54, %v3757_v58  ;;  %v524_v62 = vsel %vm7776_vm14, %v3756_v59, %v3761_v55  ;;  %v3770_v3 = vpop.permute.xlu1 %3769  ;;  %v528_v7 = vsel %vm7776_vm14, %v3761_v55, %v3756_v59  ;;  %vm4756_vm11 = vmand %vm7780_vm3, %vm7786_vm8 }
  0xfb   : > { %3397 = vmatprep.subr.msk.bf16.mxu0 %vm4643_vm12, %v3396_v57  ;;  %v3772_v10 = vunpack.i.h.bf16 %v3770_v3  ;;  %v3771_v11 = vunpack.i.l.bf16 %v3770_v3  ;;  %v3765_v12 = vpop.permute.xlu0 %3764  ;;  %v3402_v14 = vpack.c.bf16 %v525_v60, %v524_v62  ;;  %v3405_v25 = vpack.c.bf16 %v529_v61, %v528_v7  ;;  %vm4775_vm3 = vmpackc.low %vm4756_vm11, %vm4756_vm11 }
  0xfc   : > { %v3767_v15 = vunpack.i.h.bf16 %v3765_v12  ;;  %v3766_v16 = vunpack.i.l.bf16 %v3765_v12  ;;  %v554_v54 = vpack.c.bf16 %v4467_v1, %v4464_v0 }
  0xfe   : > { %3400 = vmatpush1.bf16.msk.msra.mxu0 %vm4671_vm15, %v3399_v63  ;;  %v527_v17 = vsel %vm7776_vm14, %v3767_v15, %v3772_v10  ;;  %v526_v23 = vsel %vm7776_vm14, %v3766_v16, %v3771_v11  ;;  %v3780_v26 = vpop.permute.xlu1 %3779  ;;  %v531_v27 = vsel %vm7776_vm14, %v3772_v10, %v3767_v15  ;;  %v530_v28 = vsel %vm7776_vm14, %v3771_v11, %v3766_v16 }
  0xff   : > { %3403 = vmatprep.subr.msk.bf16.mxu0 %vm4577_vm6, %v3402_v14  ;;  %v3408_v30 = vpack.c.bf16 %v527_v17, %v526_v23  ;;  %v3775_v31 = vpop.permute.xlu0 %3774  ;;  %v3411_v32 = vpack.c.bf16 %v531_v27, %v530_v28  ;;  %v3782_v36 = vunpack.i.h.bf16 %v3780_v26  ;;  %v3781_v37 = vunpack.i.l.bf16 %v3780_v26 }
 0x100   : > { %v3777_v38 = vunpack.i.h.bf16 %v3775_v31  ;;  %v3776_v39 = vunpack.i.l.bf16 %v3775_v31  ;;  %vm7782_vm14 = vcmp.lt.s32.totalorder %v4542_v19, 113  ;;  %v7975_v23 = vmov 0 }
 0x101   : > { %v7976_v23 = vsel %vm4756_vm11, 4294967295, %v7975_v23  ;;  %vm4828_vm11 = vmand %vm7787_vm10, %vm7786_vm8  ;;  %vm7987_vm10 = vcmp.lt.s32.totalorder %v4542_v19, 17 }
 0x102   : > { %3406 = vmatpush1.bf16.msk.msra.mxu0 %vm4702_vm1, %v3405_v25  ;;  %v3790_v34 = vpop.permute.xlu1 %3789  ;;  %v582_v8 = vsel %vm7781_vm0, %v3782_v36, %v3777_v38  ;;  %v581_v9 = vsel %vm7781_vm0, %v3781_v37, %v3776_v39  ;;  %v578_v2 = vsel %vm7781_vm0, %v3777_v38, %v3782_v36  ;;  %v577_v4 = vsel %vm7781_vm0, %v3776_v39, %v3781_v37 }
 0x103   : > { %3409 = vmatprep.subr.msk.bf16.mxu0 %vm4577_vm6, %v3408_v30  ;;  %v3785_v42 = vpop.permute.xlu0 %3784  ;;  %v3792_v49 = vunpack.i.h.bf16 %v3790_v34  ;;  %v3791_v50 = vunpack.i.l.bf16 %v3790_v34  ;;  %v3414_v55 = vpack.c.bf16 %v582_v8, %v581_v9  ;;  %v3417_v1 = vpack.c.bf16 %v578_v2, %v577_v4  ;;  %7977 = vst [vmem:[#allocation20_spill] sm:$0xff] %v7976_v23 }
 0x104   : > { %v3787_v51 = vunpack.i.h.bf16 %v3785_v42  ;;  %v3786_v52 = vunpack.i.l.bf16 %v3785_v42 }
 0x106   : > { %3412 = vmatpush1.bf16.msk.msra.mxu0 %vm4702_vm1, %v3411_v32  ;;  %v3800_v44 = vpop.permute.xlu1 %3799  ;;  %v584_v60 = vsel %vm7781_vm0, %v3792_v49, %v3787_v51  ;;  %v583_v61 = vsel %vm7781_vm0, %v3791_v50, %v3786_v52  ;;  %v580_v0 = vsel %vm7781_vm0, %v3787_v51, %v3792_v49  ;;  %v579_v63 = vsel %vm7781_vm0, %v3786_v52, %v3791_v50 }
 0x107   : > { %867 = vmatprep.subr.bf16.mxu0 %v553_v33  ;;  %v3795_v48 = vpop.permute.xlu0 %3794  ;;  %v3802_v57 = vunpack.i.h.bf16 %v3800_v44  ;;  %v3801_v5 = vunpack.i.l.bf16 %v3800_v44  ;;  %v3420_v11 = vpack.c.bf16 %v584_v60, %v583_v61  ;;  %v3423_v27 = vpack.c.bf16 %v580_v0, %v579_v63 }
 0x108   : > { %v3797_v6 = vunpack.i.h.bf16 %v3795_v48  ;;  %v3796_v58 = vunpack.i.l.bf16 %v3795_v48  ;;  %vm7785_vm0 = vcmp.lt.s32.totalorder %v4542_v19, 112 }
 0x10a   : > { %868 = vmatpush1.bf16.msra.mxu0 %v552_v43  ;;  %v3810_v56 = vpop.permute.xlu1 %3809  ;;  %v627_v7 = vsel %vm7782_vm14, %v3802_v57, %v3797_v6  ;;  %v626_v10 = vsel %vm7782_vm14, %v3801_v5, %v3796_v58  ;;  %v623_v25 = vsel %vm7782_vm14, %v3797_v6, %v3802_v57  ;;  %v622_v26 = vsel %vm7782_vm14, %v3796_v58, %v3801_v5 }
 0x10b   : > { %869 = vmatprep.subr.bf16.mxu0 %v555_v47  ;;  %v3805_v59 = vpop.permute.xlu0 %3804  ;;  %v3812_v14 = vunpack.i.h.bf16 %v3810_v56  ;;  %v3811_v15 = vunpack.i.l.bf16 %v3810_v56  ;;  %v3426_v28 = vpack.c.bf16 %v627_v7, %v626_v10  ;;  %v3429_v43 = vpack.c.bf16 %v623_v25, %v622_v26 }
 0x10c   : > { %v3807_v16 = vunpack.i.h.bf16 %v3805_v59  ;;  %v3806_v17 = vunpack.i.l.bf16 %v3805_v59  ;;  %v7982_v25 = vmov 0 }
 0x10d   : > { %v7983_v25 = vsel %vm4828_vm11, 4294967295, %v7982_v25 }
 0x10e   : > { %870 = vmatpush1.bf16.msra.mxu0 %v554_v54  ;;  %v3820_v62 = vpop.permute.xlu1 %3819  ;;  %v629_v37 = vsel %vm7782_vm14, %v3812_v14, %v3807_v16  ;;  %v628_v38 = vsel %vm7782_vm14, %v3811_v15, %v3806_v17  ;;  %v625_v42 = vsel %vm7782_vm14, %v3807_v16, %v3812_v14  ;;  %v624_v44 = vsel %vm7782_vm14, %v3806_v17, %v3811_v15  ;;  %vm4807_vm14 = vmpackc.low %vm7786_vm8, %vm7786_vm8 }
 0x10f   : > { %3415 = vmatprep.subr.msk.bf16.mxu0 %vm4643_vm12, %v3414_v55  ;;  %v3815_v12 = vpop.permute.xlu0 %3814  ;;  %v3822_v30 = vunpack.i.h.bf16 %v3820_v62  ;;  %v3821_v31 = vunpack.i.l.bf16 %v3820_v62  ;;  %v3432_v47 = vpack.c.bf16 %v629_v37, %v628_v38  ;;  %v3435_v4 = vpack.c.bf16 %v625_v42, %v624_v44  ;;  %7984 = vst [vmem:[#allocation21_spill] sm:$0xff] %v7983_v25  ;;  %v4018_v37 = vld [vmem:[#allocation3 + $0x1c] ss:$12 sps:$4 sm:$0xff]  }
 0x110   : > { %v3817_v32 = vunpack.i.h.bf16 %v3815_v12  ;;  %v3816_v33 = vunpack.i.l.bf16 %v3815_v12  ;;  %vm7788_vm8 = vcmask 261120  }
 0x112   : > { %3418 = vmatpush1.bf16.msk.msra.mxu0 %vm4744_vm5, %v3417_v1  ;;  %v3830_v34 = vpop.permute.xlu1 %3829  ;;  %v676_v8 = vsel %vm7785_vm0, %v3822_v30, %v3817_v32  ;;  %v675_v9 = vsel %vm7785_vm0, %v3821_v31, %v3816_v33  ;;  %v671_v55 = vsel %vm7785_vm0, %v3816_v33, %v3821_v31  ;;  %v672_v56 = vsel %vm7785_vm0, %v3817_v32, %v3822_v30 }
 0x113   : > { %3421 = vmatprep.subr.msk.bf16.mxu0 %vm4643_vm12, %v3420_v11  ;;  %v3825_v36 = vpop.permute.xlu0 %3824  ;;  %v3832_v50 = vunpack.i.h.bf16 %v3830_v34  ;;  %v3831_v51 = vunpack.i.l.bf16 %v3830_v34  ;;  %v3438_v54 = vpack.c.bf16 %v676_v8, %v675_v9  ;;  %v691_v62 = vpack.c.bf16 %v672_v56, %v671_v55  ;;  %v4015_v34 = vld [vmem:[#allocation3] ss:$12 sps:$4 sm:$0xff]   ;;  %v4020_v8 = vld [vmem:[#allocation3 + $0x18] ss:$12 sps:$4 sm:$0xff]   ;;  %v4021_v9 = vld [vmem:[#allocation3 + $0x8] ss:$12 sps:$4 sm:$0xff]  }
 0x114   : > { %v3827_v52 = vunpack.i.h.bf16 %v3825_v36  ;;  %v3826_v2 = vunpack.i.l.bf16 %v3825_v36 }
 0x116   : > { %3424 = vmatpush1.bf16.msk.msra.mxu0 %vm4744_vm5, %v3423_v27  ;;  %v3840_v48 = vpop.permute.xlu1 %3839  ;;  %v678_v59 = vsel %vm7785_vm0, %v3832_v50, %v3827_v52  ;;  %v677_v60 = vsel %vm7785_vm0, %v3831_v51, %v3826_v2  ;;  %v673_v63 = vsel %vm7785_vm0, %v3826_v2, %v3831_v51  ;;  %v674_v12 = vsel %vm7785_vm0, %v3827_v52, %v3832_v50  ;;  %vm4841_vm0 = vmpackc.low %vm4828_vm11, %vm4828_vm11 }
 0x117   : > { %3427 = vmatprep.subr.msk.bf16.mxu0 %vm4775_vm3, %v3426_v28  ;;  %v3835_v49 = vpop.permute.xlu0 %3834  ;;  %v3842_v57 = vunpack.i.h.bf16 %v3840_v48  ;;  %v3841_v5 = vunpack.i.l.bf16 %v3840_v48  ;;  %v3441_v11 = vpack.c.bf16 %v678_v59, %v677_v60  ;;  %v693_v26 = vpack.c.bf16 %v674_v12, %v673_v63 }
 0x118   : > { %v3837_v6 = vunpack.i.h.bf16 %v3835_v49  ;;  %v3836_v58 = vunpack.i.l.bf16 %v3835_v49 }
 0x11a   : > { %3430 = vmatpush1.bf16.msk.msra.mxu0 %vm4702_vm1, %v3429_v43  ;;  %v3850_v0 = vpop.permute.xlu1 %3849  ;;  %v721_v7 = vsel %vm7789_vm2, %v3842_v57, %v3837_v6  ;;  %v720_v10 = vsel %vm7789_vm2, %v3841_v5, %v3836_v58  ;;  %v717_v27 = vsel %vm7789_vm2, %v3837_v6, %v3842_v57  ;;  %v716_v28 = vsel %vm7789_vm2, %v3836_v58, %v3841_v5 }
 0x11b   : > { %3433 = vmatprep.subr.msk.bf16.mxu0 %vm4775_vm3, %v3432_v47  ;;  %v3845_v1 = vpop.permute.xlu0 %3844  ;;  %v3852_v14 = vunpack.i.h.bf16 %v3850_v0  ;;  %v3851_v15 = vunpack.i.l.bf16 %v3850_v0  ;;  %v3444_v30 = vpack.c.bf16 %v721_v7, %v720_v10  ;;  %v3447_v36 = vpack.c.bf16 %v717_v27, %v716_v28  ;;  %v4022_v47 = vld [vmem:[#allocation3 + $0x20] ss:$12 sps:$4 sm:$0xff]  }
 0x11c   : > { %v3847_v16 = vunpack.i.h.bf16 %v3845_v1  ;;  %v3846_v17 = vunpack.i.l.bf16 %v3845_v1 }
 0x11e   : > { %3436 = vmatpush1.bf16.msk.msra.mxu0 %vm4702_vm1, %v3435_v4  ;;  %v723_v32 = vsel %vm7789_vm2, %v3852_v14, %v3847_v16  ;;  %v722_v33 = vsel %vm7789_vm2, %v3851_v15, %v3846_v17  ;;  %v719_v38 = vsel %vm7789_vm2, %v3847_v16, %v3852_v14  ;;  %v718_v42 = vsel %vm7789_vm2, %v3846_v17, %v3851_v15 }
 0x11f   : > { %3439 = vmatprep.subr.msk.bf16.mxu0 %vm4807_vm14, %v3438_v54  ;;  %v3450_v43 = vpack.c.bf16 %v723_v32, %v722_v33  ;;  %v3453_v44 = vpack.c.bf16 %v719_v38, %v718_v42  ;;  %v1337_v38 = vld [vmem:[%s7765_s4] sm:$0xff]  ;;  %v1338_v42 = vld [vmem:[%s7765_s4 + $0x8] sm:$0xff] }
 0x122   : > { %880 = vmatpush1.bf16.msra.mxu0 %v691_v62 }
 0x123   : > { %3442 = vmatprep.subr.msk.bf16.mxu0 %vm4807_vm14, %v3441_v11 }
 0x126   : > { %882 = vmatpush1.bf16.msra.mxu0 %v693_v26 }
 0x127   : > { %3445 = vmatprep.subr.msk.bf16.mxu0 %vm4841_vm0, %v3444_v30 }
 0x129   : > { %884 = vmatmul.mubr.bf16.vlgmr.msra.gmra.mrb[0].mxu0 %v4015_v34 }
 0x12a   : > { %3448 = vmatpush1.bf16.msk.msra.mxu0 %vm4744_vm5, %v3447_v36  ;;  %893 = vmatprep.mubr.bf16.mxu0 %v4018_v37  ;;  %v4025_v37 = vld [vmem:[#allocation7 + $0x4] ss:$12 sps:$4 sm:$0xff]  }
 0x12b   : > { %3451 = vmatprep.subr.msk.bf16.mxu0 %vm4841_vm0, %v3450_v43  ;;  %v802_v50 = vpop.permute.xlu1 %801  ;;  %1429 = vmatprep.mubr.bf16.mxu1 %v4025_v37  ;;  %v1339_v43 = vld [vmem:[%s7765_s4 + $0x10] sm:$0xff] }
 0x12c   : > { %v797_v48 = vpop.permute.xlu0 %796 }
 0x12e   : > { %3454 = vmatpush1.bf16.msk.msra.mxu0 %vm4744_vm5, %v3453_v44  ;;  %v1340_v44 = vld [vmem:[%s7765_s4 + $0x18] sm:$0xff] }
 0x12f   : > { %v807_v59 = vpop.permute.xlu1 %806 }
 0x130   : > { %v812_v7 = vpop.permute.xlu0 %811 }
 0x131   : > { %894 = vmatmul.mubr.bf16.gmra.mrb[4].mxu0 %v4020_v8 }
 0x132   : > { %936 = vmatprep.mubr.bf16.mxu0 %v4223_v13 }
 0x139   : > { %3251 = vmatmul.mubr.msk.bf16.vlgmr.msra.gmra.mrb[0].mxu0 %vm7788_vm8, %v4021_v9 }
 0x13a   : > { %946 = vmatprep.mubr.bf16.mxu0 %v4223_v13 }
 0x141   : > { %3252 = vmatmul.mubr.msk.bf16.gmra.mrb[4].mxu0 %vm7788_vm8, %v4022_v47  ;;  %vm7988_vm8 = vmmov %vm7987_vm10 }
 0x142   : > { %vm7989_vm2 = vmmov %vm7988_vm8 }
 0x143   : > { %vm7990_vm11 = vmmov %vm7989_vm2 }
 0x20c   : > { %v938_v49 = vpop.f32.mrb[0].mxu0 }
 0x20d   : > { %v3539_v51 = vadd.f32 %v938_v49, %v797_v48  ;;  %v940_v52 = vpop.f32.mrb[1].mxu0 }
 0x20e   : > { %v3540_v2 = vadd.f32 %v940_v52, %v797_v48  ;;  %v942_v4 = vpop.f32.mrb[2].mxu0 }
 0x20f   : > { %v3541_v54 = vadd.f32 %v942_v4, %v802_v50  ;;  %v944_v55 = vpop.f32.mrb[3].mxu0  ;;  %v957_v57 = vmax.f32 %v3539_v51, 0.0 }
 0x210   : > { %v3542_v56 = vadd.f32 %v944_v55, %v802_v50  ;;  %v958_v6 = vmax.f32 %v3540_v2, 0.0 }
 0x211   : > { %v959_v5 = vmax.f32 %v3541_v54, 0.0 }
 0x212   : > { %v960_v58 = vmax.f32 %v3542_v56, 0.0 }
 0x213   : > { %v3855_v60 = vpack.i.bf16 %v959_v5, %v957_v57  ;;  %v4869_v17 = vpack.c.bf16 %v959_v5, %v957_v57 }
 0x214   : > { %v948_v0 = vpop.f32.mrb[4].mxu0  ;;  %v3860_v1 = vpack.i.bf16 %v960_v58, %v958_v6  ;;  %v4867_v16 = vpack.c.bf16 %v960_v58, %v958_v6 }
 0x215   : > { %v3543_v62 = vadd.f32 %v948_v0, %v807_v59  ;;  %v950_v63 = vpop.f32.mrb[5].mxu0  ;;  %3856 = vrot.lane.b32.xlu1 %v3855_v60, %s7809_s26 }
 0x216   : > { %v3544_v10 = vadd.f32 %v950_v63, %v807_v59  ;;  %v952_v11 = vpop.f32.mrb[6].mxu0  ;;  %3861 = vrot.lane.b32.xlu0 %v3860_v1, %s7809_s26 }
 0x217   : > { %v3545_v12 = vadd.f32 %v952_v11, %v812_v7  ;;  %v954_v14 = vpop.f32.mrb[7].mxu0  ;;  %v961_v26 = vmax.f32 %v3543_v62, 0.0 }
 0x218   : > { %v3546_v15 = vadd.f32 %v954_v14, %v812_v7  ;;  %v962_v28 = vmax.f32 %v3544_v10, 0.0 }
 0x219   : > { %v963_v27 = vmax.f32 %v3545_v12, 0.0 }
 0x21a   : > { %v964_v30 = vmax.f32 %v3546_v15, 0.0 }
 0x21b   : > { %v3865_v32 = vpack.i.bf16 %v963_v27, %v961_v26  ;;  %v4875_v36 = vpack.c.bf16 %v963_v27, %v961_v26 }
 0x21c   : > { %v3875_v33 = vpack.i.bf16 %v964_v30, %v962_v28  ;;  %v4873_v34 = vpack.c.bf16 %v964_v30, %v962_v28 }
 0x21d   : > { %3866 = vrot.lane.b32.xlu1 %v3865_v32, %s7809_s26 }
 0x21e   : > { %3876 = vrot.lane.b32.xlu0 %v3875_v33, %s7809_s26 }
 0x221   : > { %3871 = vrot.lane.b32.xlu1 %v3855_v60, %s7811_s10 }
 0x222   : > { %3881 = vrot.lane.b32.xlu0 %v3860_v1, %s7811_s10 }
 0x225   : > { %3886 = vrot.lane.b32.xlu1 %v3865_v32, %s7811_s10 }
 0x226   : > { %3896 = vrot.lane.b32.xlu0 %v3875_v33, %s7811_s10 }
 0x229   : > { %3891 = vrot.lane.b32.xlu1 %v3855_v60, %s7813_s13 }
 0x22a   : > { %3901 = vrot.lane.b32.xlu0 %v3860_v1, %s7813_s13 }
 0x22d   : > { %3906 = vrot.lane.b32.xlu1 %v3865_v32, %s7813_s13 }
 0x22e   : > { %3916 = vrot.lane.b32.xlu0 %v3875_v33, %s7813_s13 }
 0x231   : > { %3911 = vrot.lane.b32.xlu1 %v3855_v60, %s7819_s18 }
 0x232   : > { %3921 = vrot.lane.b32.xlu0 %v3860_v1, %s7819_s18 }
 0x235   : > { %3926 = vrot.lane.b32.xlu1 %v3865_v32, %s7819_s18 }
 0x236   : > { %3931 = vrot.lane.b32.xlu0 %v3875_v33, %s7819_s18 }
 0x239   : > { %3936 = vrot.lane.b32.xlu1 %v3855_v60, %s7821_s21 }
 0x23a   : > { %3941 = vrot.lane.b32.xlu0 %v3860_v1, %s7821_s21 }
 0x23d   : > { %3946 = vrot.lane.b32.xlu1 %v3865_v32, %s7821_s21 }
 0x23e   : > { %3956 = vrot.lane.b32.xlu0 %v3875_v33, %s7821_s21 }
 0x241   : > { %3951 = vrot.lane.b32.xlu1 %v3855_v60, %s7823_s23 }
 0x242   : > { %3961 = vrot.lane.b32.xlu0 %v3860_v1, %s7823_s23 }
 0x245   : > { %3966 = vrot.lane.b32.xlu1 %v3865_v32, %s7823_s23 }
 0x246   : > { %3976 = vrot.lane.b32.xlu0 %v3875_v33, %s7823_s23 }
 0x249   : > { %3971 = vrot.lane.b32.xlu1 %v3855_v60, %s7825_s24 }
 0x24a   : > { %3981 = vrot.lane.b32.xlu0 %v3860_v1, %s7825_s24 }
 0x24d   : > { %3986 = vrot.lane.b32.xlu1 %v3865_v32, %s7825_s24 }
 0x24e   : > { %3991 = vrot.lane.b32.xlu0 %v3875_v33, %s7825_s24 }
 0x251   : > { %3996 = vrot.lane.b32.xlu1 %v3855_v60, %s7827_s19 }
 0x252   : > { %4001 = vrot.lane.b32.xlu0 %v3860_v1, %s7827_s19 }
 0x255   : > { %4006 = vrot.lane.b32.xlu1 %v3865_v32, %s7827_s19 }
 0x256   : > { %4011 = vrot.lane.b32.xlu0 %v3875_v33, %s7827_s19 }
 0x259   : > { %1343 = vperm.xlu1 %3854, %v1337_v38  }
 0x25a   : > { %1348 = vperm.xlu0 %3853, %v1338_v42  }
 0x25d   : > { %1353 = vperm.xlu1 %3854, %v1339_v43  }
 0x25e   : > { %1358 = vperm.xlu0 %3853, %v1340_v44  }
 0x287   : > { %v3857_v8 = vpop.permute.xlu1 %3856 }
 0x288   : > { %v3859_v9 = vunpack.i.h.bf16 %v3857_v8  ;;  %v3858_v47 = vunpack.i.l.bf16 %v3857_v8  ;;  %v3862_v48 = vpop.permute.xlu0 %3861 }
 0x289   : > { %v3864_v49 = vunpack.i.h.bf16 %v3862_v48  ;;  %v3863_v50 = vunpack.i.l.bf16 %v3862_v48 }
 0x28b   : > { %v981_v51 = vsel %vm7987_vm10, %v3858_v47, %v3863_v50  ;;  %v982_v52 = vsel %vm7988_vm8, %v3859_v9, %v3864_v49  ;;  %v985_v2 = vsel %vm7989_vm2, %v3863_v50, %v3858_v47  ;;  %v986_v4 = vsel %vm7990_vm11, %v3864_v49, %v3859_v9  ;;  %vm7991_vm8 = vmmov %vm7989_vm2 }
 0x28c   : > { %v3456_v54 = vpack.c.bf16 %v982_v52, %v981_v51  ;;  %v3459_v55 = vpack.c.bf16 %v986_v4, %v985_v2  ;;  %vm7992_vm10 = vmmov %vm7989_vm2 }
 0x28d   : > { %vm7993_vm11 = vmmov %vm7989_vm2 }
 0x28e   : > { %3457 = vmatprep.subr.msk.bf16.mxu1 %vm4577_vm6, %v3456_v54 }
 0x28f   : > { %v3867_v56 = vpop.permute.xlu1 %3866  ;;  %3460 = vmatpush1.bf16.msk.msra.mxu1 %vm4588_vm7, %v3459_v55 }
 0x290   : > { %v3869_v57 = vunpack.i.h.bf16 %v3867_v56  ;;  %v3868_v5 = vunpack.i.l.bf16 %v3867_v56  ;;  %v3877_v6 = vpop.permute.xlu0 %3876 }
 0x291   : > { %v3879_v58 = vunpack.i.h.bf16 %v3877_v6  ;;  %v3878_v59 = vunpack.i.l.bf16 %v3877_v6 }
 0x293   : > { %v983_v60 = vsel %vm7991_vm8, %v3868_v5, %v3878_v59  ;;  %v984_v0 = vsel %vm7989_vm2, %v3869_v57, %v3879_v58  ;;  %v987_v1 = vsel %vm7992_vm10, %v3878_v59, %v3868_v5  ;;  %v988_v62 = vsel %vm7993_vm11, %v3879_v58, %v3869_v57  ;;  %v3872_v63 = vpop.permute.xlu1 %3871 }
 0x294   : > { %v3874_v7 = vunpack.i.h.bf16 %v3872_v63  ;;  %v3873_v10 = vunpack.i.l.bf16 %v3872_v63  ;;  %v3882_v11 = vpop.permute.xlu0 %3881  ;;  %v3462_v12 = vpack.c.bf16 %v984_v0, %v983_v60  ;;  %v3465_v14 = vpack.c.bf16 %v988_v62, %v987_v1 }
 0x295   : > { %v3884_v15 = vunpack.i.h.bf16 %v3882_v11  ;;  %v3883_v26 = vunpack.i.l.bf16 %v3882_v11  ;;  %vm7994_vm8 = vcmp.lt.s32.totalorder %v4542_v19, 16 }
 0x296   : > { %3463 = vmatprep.subr.msk.bf16.mxu1 %vm4577_vm6, %v3462_v12  ;;  %vm7995_vm2 = vmmov %vm7994_vm8 }
 0x297   : > { %v1025_v27 = vsel %vm7994_vm8, %v3883_v26, %v3873_v10  ;;  %v1026_v28 = vsel %vm7995_vm2, %v3884_v15, %v3874_v7  ;;  %v3887_v30 = vpop.permute.xlu1 %3886  ;;  %3466 = vmatpush1.bf16.msk.msra.mxu1 %vm4588_vm7, %v3465_v14  ;;  %vm7996_vm10 = vmmov %vm7995_vm2 }
 0x298   : > { %v1021_v32 = vsel %vm7996_vm10, %v3873_v10, %v3883_v26  ;;  %vm7997_vm11 = vmmov %vm7995_vm2  ;;  %v3889_v37 = vunpack.i.h.bf16 %v3887_v30  ;;  %v3888_v38 = vunpack.i.l.bf16 %v3887_v30  ;;  %v3897_v42 = vpop.permute.xlu0 %3896  ;;  %v3468_v44 = vpack.c.bf16 %v1026_v28, %v1025_v27 }
 0x299   : > { %v1022_v33 = vsel %vm7997_vm11, %v3874_v7, %v3884_v15  ;;  %v3899_v8 = vunpack.i.h.bf16 %v3897_v42  ;;  %v3898_v9 = vunpack.i.l.bf16 %v3897_v42  ;;  %vm7998_vm8 = vmmov %vm7995_vm2  ;;  %vm8001_vm11 = vcmp.lt.s32.totalorder %v4542_v19, 15 }
 0x29a   : > { %v1038_v43 = vpack.c.bf16 %v1022_v33, %v1021_v32  ;;  %vm7999_vm7 = vmmov %vm7995_vm2 }
 0x29b   : > { %v1027_v47 = vsel %vm7998_vm8, %v3898_v9, %v3888_v38  ;;  %v1028_v45 = vsel %vm7995_vm2, %v3899_v8, %v3889_v37  ;;  %v3892_v48 = vpop.permute.xlu1 %3891  ;;  %v1023_v49 = vsel %vm7999_vm7, %v3888_v38, %v3898_v9  ;;  %vm8000_vm10 = vmmov %vm7995_vm2 }
 0x29c   : > { %1401 = vmatprep.subr.bf16.mxu1 %v1038_v43  ;;  %v1024_v50 = vsel %vm8000_vm10, %v3889_v37, %v3899_v8  ;;  %v3894_v51 = vunpack.i.h.bf16 %v3892_v48  ;;  %v3893_v52 = vunpack.i.l.bf16 %v3892_v48  ;;  %v3902_v2 = vpop.permute.xlu0 %3901  ;;  %v3471_v54 = vpack.c.bf16 %v1028_v45, %v1027_v47  ;;  %vm8002_vm8 = vmmov %vm8001_vm11 }
 0x29d   : > { %3469 = vmatpush1.bf16.msk.msra.mxu1 %vm4624_vm9, %v3468_v44  ;;  %v1040_v4 = vpack.c.bf16 %v1024_v50, %v1023_v49  ;;  %v3904_v55 = vunpack.i.h.bf16 %v3902_v2  ;;  %v3903_v56 = vunpack.i.l.bf16 %v3902_v2  ;;  %vm8003_vm2 = vmmov %vm8002_vm8 }
 0x29e   : > { %vm8004_vm7 = vmmov %vm8003_vm2 }
 0x29f   : > { %1403 = vmatprep.subr.bf16.mxu1 %v1040_v4  ;;  %v1061_v57 = vsel %vm8001_vm11, %v3893_v52, %v3903_v56  ;;  %v1062_v5 = vsel %vm8002_vm8, %v3894_v51, %v3904_v55  ;;  %v1065_v6 = vsel %vm8003_vm2, %v3903_v56, %v3893_v52  ;;  %v1066_v58 = vsel %vm8004_vm7, %v3904_v55, %v3894_v51  ;;  %v3907_v59 = vpop.permute.xlu1 %3906  ;;  %vm8005_vm10 = vmmov %vm8003_vm2 }
 0x2a0   : > { %v3909_v60 = vunpack.i.h.bf16 %v3907_v59  ;;  %v3908_v0 = vunpack.i.l.bf16 %v3907_v59  ;;  %v3917_v1 = vpop.permute.xlu0 %3916  ;;  %v3474_v62 = vpack.c.bf16 %v1062_v5, %v1061_v57  ;;  %v3477_v63 = vpack.c.bf16 %v1066_v58, %v1065_v6  ;;  %vm8006_vm11 = vmmov %vm8003_vm2 }
 0x2a1   : > { %3472 = vmatpush1.bf16.msk.msra.mxu1 %vm4624_vm9, %v3471_v54  ;;  %v3919_v7 = vunpack.i.h.bf16 %v3917_v1  ;;  %v3918_v10 = vunpack.i.l.bf16 %v3917_v1  ;;  %vm8007_vm8 = vmmov %vm8003_vm2 }
 0x2a2   : > { %3475 = vmatprep.subr.msk.bf16.mxu1 %vm4643_vm12, %v3474_v62  ;;  %vm8008_vm9 = vmmov %vm8003_vm2  ;;  %vm8009_vm2 = vcmp.lt.s32.totalorder %v4542_v19, 1 }
 0x2a3   : > { %v1063_v11 = vsel %vm8005_vm10, %v3908_v0, %v3918_v10  ;;  %v1064_v12 = vsel %vm8006_vm11, %v3909_v60, %v3919_v7  ;;  %v1067_v22 = vsel %vm8007_vm8, %v3918_v10, %v3908_v0  ;;  %v1068_v14 = vsel %vm8008_vm9, %v3919_v7, %v3909_v60  ;;  %v3912_v15 = vpop.permute.xlu1 %3911  ;;  %vm8010_vm7 = vmmov %vm8009_vm2 }
 0x2a4   : > { %v3914_v26 = vunpack.i.h.bf16 %v3912_v15  ;;  %v3913_v27 = vunpack.i.l.bf16 %v3912_v15  ;;  %v3922_v28 = vpop.permute.xlu0 %3921  ;;  %v3480_v30 = vpack.c.bf16 %v1064_v12, %v1063_v11  ;;  %v3483_v32 = vpack.c.bf16 %v1068_v14, %v1067_v22  ;;  %vm8011_vm10 = vmmov %vm8009_vm2 }
 0x2a5   : > { %3478 = vmatpush1.bf16.msk.msra.mxu1 %vm4671_vm15, %v3477_v63  ;;  %v3924_v33 = vunpack.i.h.bf16 %v3922_v28  ;;  %v3923_v37 = vunpack.i.l.bf16 %v3922_v28  ;;  %vm8012_vm11 = vmmov %vm8009_vm2 }
 0x2a6   : > { %3481 = vmatprep.subr.msk.bf16.mxu1 %vm4643_vm12, %v3480_v30  ;;  %vm8013_vm8 = vmmov %vm8009_vm2 }
 0x2a7   : > { %v1101_v38 = vsel %vm8009_vm2, %v3913_v27, %v3923_v37  ;;  %v1102_v42 = vsel %vm8010_vm7, %v3914_v26, %v3924_v33  ;;  %v1105_v43 = vsel %vm8011_vm10, %v3923_v37, %v3913_v27  ;;  %v1106_v44 = vsel %vm8012_vm11, %v3924_v33, %v3914_v26  ;;  %v3927_v8 = vpop.permute.xlu1 %3926  ;;  %vm8014_vm9 = vmmov %vm8009_vm2 }
 0x2a8   : > { %v3929_v9 = vunpack.i.h.bf16 %v3927_v8  ;;  %v3928_v47 = vunpack.i.l.bf16 %v3927_v8  ;;  %v3932_v45 = vpop.permute.xlu0 %3931  ;;  %v3486_v48 = vpack.c.bf16 %v1102_v42, %v1101_v38  ;;  %v3489_v49 = vpack.c.bf16 %v1106_v44, %v1105_v43 }
 0x2a9   : > { %3484 = vmatpush1.bf16.msk.msra.mxu1 %vm4671_vm15, %v3483_v32  ;;  %v3934_v50 = vunpack.i.h.bf16 %v3932_v45  ;;  %v3933_v51 = vunpack.i.l.bf16 %v3932_v45  ;;  %vm8015_vm15 = vmmov %vm8009_vm2  ;;  %vm8016_vm7 = vcmp.lt.s32.totalorder %v4542_v19, 127 }
 0x2aa   : > { %3487 = vmatprep.subr.msk.bf16.mxu1 %vm4577_vm6, %v3486_v48  ;;  %vm8017_vm10 = vmmov %vm8016_vm7 }
 0x2ab   : > { %v1103_v52 = vsel %vm8013_vm8, %v3928_v47, %v3933_v51  ;;  %v1104_v2 = vsel %vm8014_vm9, %v3929_v9, %v3934_v50  ;;  %v1107_v53 = vsel %vm8009_vm2, %v3933_v51, %v3928_v47  ;;  %v1108_v4 = vsel %vm8015_vm15, %v3934_v50, %v3929_v9  ;;  %v3937_v54 = vpop.permute.xlu1 %3936 }
 0x2ac   : > { %v3942_v55 = vpop.permute.xlu0 %3941  ;;  %v3492_v56 = vpack.c.bf16 %v1104_v2, %v1103_v52  ;;  %v3495_v57 = vpack.c.bf16 %v1108_v4, %v1107_v53  ;;  %v3939_v5 = vunpack.i.h.bf16 %v3937_v54  ;;  %v3938_v6 = vunpack.i.l.bf16 %v3937_v54 }
 0x2ad   : > { %3490 = vmatpush1.bf16.msk.msra.mxu1 %vm4702_vm1, %v3489_v49  ;;  %v3944_v58 = vunpack.i.h.bf16 %v3942_v55  ;;  %v3943_v59 = vunpack.i.l.bf16 %v3942_v55 }
 0x2ae   : > { %3493 = vmatprep.subr.msk.bf16.mxu1 %vm4577_vm6, %v3492_v56  ;;  %vm8018_vm6 = vmmov %vm8016_vm7 }
 0x2af   : > { %v3947_v60 = vpop.permute.xlu1 %3946  ;;  %v1153_v1 = vsel %vm8016_vm7, %v3943_v59, %v3938_v6  ;;  %v1154_v62 = vsel %vm8017_vm10, %v3944_v58, %v3939_v5  ;;  %v1149_v22 = vsel %vm8018_vm6, %v3938_v6, %v3943_v59  ;;  %vm8019_vm11 = vmmov %vm8018_vm6  ;;  %vm8024_vm7 = vcmp.lt.s32.totalorder %v4542_v19, 113 }
 0x2b0   : > { %v3957_v0 = vpop.permute.xlu0 %3956  ;;  %v3949_v63 = vunpack.i.h.bf16 %v3947_v60  ;;  %v3948_v7 = vunpack.i.l.bf16 %v3947_v60  ;;  %v3498_v14 = vpack.c.bf16 %v1154_v62, %v1153_v1  ;;  %vm8020_vm8 = vmmov %vm8018_vm6 }
 0x2b1   : > { %3496 = vmatpush1.bf16.msk.msra.mxu1 %vm4702_vm1, %v3495_v57  ;;  %v3959_v10 = vunpack.i.h.bf16 %v3957_v0  ;;  %v3958_v11 = vunpack.i.l.bf16 %v3957_v0  ;;  %vm8021_vm9 = vmmov %vm8018_vm6 }
 0x2b2   : > { %1413 = vmatprep.subr.bf16.mxu1 %v4867_v16  ;;  %v1150_v16 = vsel %vm8019_vm11, %v3939_v5, %v3944_v58  ;;  %vm8022_vm2 = vmmov %vm8018_vm6 }
 0x2b3   : > { %v3952_v12 = vpop.permute.xlu1 %3951  ;;  %v1155_v30 = vsel %vm8020_vm8, %v3958_v11, %v3948_v7  ;;  %v1151_v33 = vsel %vm8022_vm2, %v3948_v7, %v3958_v11  ;;  %v3501_v37 = vpack.c.bf16 %v1150_v16, %v1149_v22  ;;  %vm8023_vm15 = vmmov %vm8022_vm2 }
 0x2b4   : > { %v3962_v40 = vpop.permute.xlu0 %3961  ;;  %v3954_v15 = vunpack.i.h.bf16 %v3952_v12  ;;  %v3953_v26 = vunpack.i.l.bf16 %v3952_v12  ;;  %v1152_v38 = vsel %vm8023_vm15, %v3949_v63, %v3959_v10  ;;  %vm8025_vm10 = vmmov %vm8024_vm7  ;;  %vm8032_vm15 = vcmp.lt.s32.totalorder %v4542_v19, 112 }
 0x2b5   : > { %1414 = vmatpush1.bf16.msra.mxu1 %v4869_v17  ;;  %v3964_v27 = vunpack.i.h.bf16 %v3962_v40  ;;  %v3963_v28 = vunpack.i.l.bf16 %v3962_v40  ;;  %v1156_v17 = vsel %vm8021_vm9, %v3959_v10, %v3949_v63  ;;  %vm8026_vm6 = vmmov %vm8024_vm7  ;;  %v3507_v51 = vpack.c.bf16 %v1152_v38, %v1151_v33 }
 0x2b6   : > { %1415 = vmatprep.subr.bf16.mxu1 %v4873_v34  ;;  %v3504_v44 = vpack.c.bf16 %v1156_v17, %v1155_v30  ;;  %vm8027_vm11 = vmmov %vm8026_vm6 }
 0x2b7   : > { %v3967_v32 = vpop.permute.xlu1 %3966  ;;  %v1193_v42 = vsel %vm8024_vm7, %v3963_v28, %v3953_v26  ;;  %v1194_v43 = vsel %vm8025_vm10, %v3964_v27, %v3954_v15  ;;  %v1189_v49 = vsel %vm8026_vm6, %v3953_v26, %v3963_v28  ;;  %v1190_v50 = vsel %vm8027_vm11, %v3954_v15, %v3964_v27  ;;  %vm8028_vm8 = vmmov %vm8026_vm6 }
 0x2b8   : > { %v3977_v34 = vpop.permute.xlu0 %3976  ;;  %v3969_v8 = vunpack.i.h.bf16 %v3967_v32  ;;  %v3510_v52 = vpack.c.bf16 %v1194_v43, %v1193_v42  ;;  %vm8029_vm9 = vmmov %vm8026_vm6  ;;  %v3513_v6 = vpack.c.bf16 %v1190_v50, %v1189_v49 }
 0x2b9   : > { %1416 = vmatpush1.bf16.msra.mxu1 %v4875_v36  ;;  %v3968_v36 = vunpack.i.l.bf16 %v3967_v32  ;;  %v3979_v9 = vunpack.i.h.bf16 %v3977_v34  ;;  %v3978_v47 = vunpack.i.l.bf16 %v3977_v34  ;;  %vm8031_vm2 = vmmov %vm8026_vm6 }
 0x2ba   : > { %3499 = vmatprep.subr.msk.bf16.mxu1 %vm4643_vm12, %v3498_v14  ;;  %vm8033_vm7 = vmmov %vm8032_vm15 }
 0x2bb   : > { %v3972_v45 = vpop.permute.xlu1 %3971  ;;  %v1195_v55 = vsel %vm8028_vm8, %v3978_v47, %v3968_v36  ;;  %v1196_v56 = vsel %vm8029_vm9, %v3979_v9, %v3969_v8  ;;  %v1192_v58 = vsel %vm8031_vm2, %v3969_v8, %v3979_v9  ;;  %vm8034_vm10 = vmmov %vm8033_vm7  ;;  %vm8039_vm9 = vcmp.lt.s32.totalorder %v4542_v19, 111 }
 0x2bc   : > { %v3982_v48 = vpop.permute.xlu0 %3981  ;;  %v3974_v2 = vunpack.i.h.bf16 %v3972_v45  ;;  %v3973_v53 = vunpack.i.l.bf16 %v3972_v45  ;;  %v3516_v0 = vpack.c.bf16 %v1196_v56, %v1195_v55  ;;  %v4029_v55 = vld [vmem:[#allocation7 + $0x8] ss:$12 sps:$4 sm:$0xff]   ;;  %v4030_v56 = vld [vmem:[#allocation7 + $0x20] ss:$12 sps:$4 sm:$0xff]  }
 0x2bd   : > { %3502 = vmatpush1.bf16.msk.msra.mxu1 %vm4744_vm5, %v3501_v37  ;;  %v3984_v4 = vunpack.i.h.bf16 %v3982_v48  ;;  %v3983_v54 = vunpack.i.l.bf16 %v3982_v48  ;;  %v4023_v48 = vld [vmem:[#allocation7] ss:$12 sps:$4 sm:$0xff]  }
 0x2be   : > { %3505 = vmatprep.subr.msk.bf16.mxu1 %vm4643_vm12, %v3504_v44  ;;  %vm8030_vm12 = vmmov %vm8026_vm6 }
 0x2bf   : > { %v3987_v41 = vpop.permute.xlu1 %3986  ;;  %v1191_v5 = vsel %vm8030_vm12, %v3968_v36, %v3978_v47  ;;  %v1233_v59 = vsel %vm8032_vm15, %v3983_v54, %v3973_v53  ;;  %v1234_v60 = vsel %vm8033_vm7, %v3984_v4, %v3974_v2  ;;  %v1229_v22 = vsel %vm8034_vm10, %v3973_v53, %v3983_v54  ;;  %vm8035_vm6 = vmmov %vm8033_vm7  ;;  %v4028_v54 = vld [vmem:[#allocation7 + $0x18] ss:$12 sps:$4 sm:$0xff]  }
 0x2c0   : > { %v3992_v57 = vpop.permute.xlu0 %3991  ;;  %v3989_v1 = vunpack.i.h.bf16 %v3987_v41  ;;  %v3988_v62 = vunpack.i.l.bf16 %v3987_v41  ;;  %v3519_v12 = vpack.c.bf16 %v1192_v58, %v1191_v5  ;;  %v3522_v40 = vpack.c.bf16 %v1234_v60, %v1233_v59  ;;  %vm8036_vm11 = vmmov %vm8035_vm6 }
 0x2c1   : > { %3508 = vmatpush1.bf16.msk.msra.mxu1 %vm4744_vm5, %v3507_v51  ;;  %v3994_v63 = vunpack.i.h.bf16 %v3992_v57  ;;  %v3993_v7 = vunpack.i.l.bf16 %v3992_v57  ;;  %v1230_v16 = vsel %vm8035_vm6, %v3974_v2, %v3984_v4  ;;  %vm8037_vm8 = vmmov %vm8035_vm6  ;;  %v4026_v51 = vld [vmem:[#allocation7 + $0x1c] ss:$12 sps:$4 sm:$0xff]  }
 0x2c2   : > { %3511 = vmatprep.subr.msk.bf16.mxu1 %vm4775_vm3, %v3510_v52  ;;  %v1245_v32 = vpack.c.bf16 %v1230_v16, %v1229_v22  ;;  %vm8040_vm12 = vmmov %vm8039_vm9 }
 0x2c3   : > { %v3997_v10 = vpop.permute.xlu1 %3996  ;;  %v1235_v28 = vsel %vm8036_vm11, %v3993_v7, %v3988_v62  ;;  %v1236_v30 = vsel %vm8037_vm8, %v3994_v63, %v3989_v1  ;;  %vm8048_vm11 = vcmask 261120  }
 0x2c4   : > { %v4002_v11 = vpop.permute.xlu0 %4001  ;;  %v3999_v14 = vunpack.i.h.bf16 %v3997_v10  ;;  %v3998_v15 = vunpack.i.l.bf16 %v3997_v10  ;;  %v3525_v38 = vpack.c.bf16 %v1236_v30, %v1235_v28  ;;  %vm8049_vm8 = vmmov %vm8048_vm11 }
 0x2c5   : > { %3514 = vmatpush1.bf16.msk.msra.mxu1 %vm4702_vm1, %v3513_v6  ;;  %v4004_v26 = vunpack.i.h.bf16 %v4002_v11  ;;  %v4003_v27 = vunpack.i.l.bf16 %v4002_v11 }
 0x2c6   : > { %3517 = vmatprep.subr.msk.bf16.mxu1 %vm4775_vm3, %v3516_v0  ;;  %vm8038_vm3 = vmmov %vm8035_vm6 }
 0x2c7   : > { %v4007_v39 = vpop.permute.xlu1 %4006  ;;  %v1231_v34 = vsel %vm8038_vm3, %v3988_v62, %v3993_v7  ;;  %v1273_v33 = vsel %vm8039_vm9, %v4003_v27, %v3998_v15  ;;  %v1274_v37 = vsel %vm8040_vm12, %v4004_v26, %v3999_v14  ;;  %vm8041_vm2 = vmmov %vm8038_vm3  ;;  %vm1721_vm3 = vcmp.lt.s32.totalorder %v4542_v19, 50 }
 0x2c8   : > { %v4012_v17 = vpop.permute.xlu0 %4011  ;;  %v1232_v29 = vsel %vm8041_vm2, %v3989_v1, %v3994_v63  ;;  %v4009_v42 = vunpack.i.h.bf16 %v4007_v39  ;;  %v4008_v43 = vunpack.i.l.bf16 %v4007_v39  ;;  %v3528_v45 = vpack.c.bf16 %v1274_v37, %v1273_v33  ;;  %v1504_v37 = vld [vmem:[%s7766_s5 + $0x8] sm:$0xff] }
 0x2c9   : > { %3520 = vmatpush1.bf16.msk.msra.mxu1 %vm4702_vm1, %v3519_v12  ;;  %v4014_v44 = vunpack.i.h.bf16 %v4012_v17  ;;  %v4013_v8 = vunpack.i.l.bf16 %v4012_v17  ;;  %v1247_v36 = vpack.c.bf16 %v1232_v29, %v1231_v34  ;;  %vm8042_vm1 = vmmov %vm8039_vm9  ;;  %vm1752_vm9 = vcmp.lt.s32.totalorder %v4542_v19, 49 }
 0x2ca   : > { %3523 = vmatprep.subr.msk.bf16.mxu1 %vm4807_vm14, %v3522_v40  ;;  %v1269_v9 = vsel %vm8042_vm1, %v3998_v15, %v4003_v27  ;;  %vm8043_vm15 = vmmov %vm8042_vm1  ;;  %vm1781_vm12 = vcmp.lt.s32.totalorder %v4542_v19, 48  ;;  %vm1808_vm2 = vcmp.lt.s32.totalorder %v4542_v19, 47 }
 0x2cb   : > { %v1270_v47 = vsel %vm8043_vm15, %v3999_v14, %v4004_v26  ;;  %vm8044_vm7 = vmmov %vm8042_vm1  ;;  %vm1868_vm15 = vcmp.lt.s32.totalorder %v4542_v19, 45 }
 0x2cc   : > { %v1275_v49 = vsel %vm8044_vm7, %v4013_v8, %v4008_v43  ;;  %vm8045_vm10 = vmmov %vm8042_vm1  ;;  %v3531_v61 = vpack.c.bf16 %v1270_v47, %v1269_v9  ;;  %v1505_v9 = vld [vmem:[%s7766_s5 + $0x10] sm:$0xff]  ;;  %vm1899_vm7 = vcmp.lt.s32.totalorder %v4542_v19, 35 }
 0x2cd   : > { %1426 = vmatpush1.bf16.msra.mxu1 %v1245_v32  ;;  %v1276_v50 = vsel %vm8045_vm10, %v4014_v44, %v4009_v42  ;;  %vm8047_vm6 = vmmov %vm8042_vm1  ;;  %vm7927_vm10 = vcmp.lt.s32.totalorder %v4542_v19, 34 }
 0x2ce   : > { %3526 = vmatprep.subr.msk.bf16.mxu1 %vm4807_vm14, %v3525_v38  ;;  %vm8046_vm14 = vmmov %vm8042_vm1  ;;  %v1272_v2 = vsel %vm8047_vm6, %v4009_v42, %v4014_v44  ;;  %v3534_v53 = vpack.c.bf16 %v1276_v50, %v1275_v49  ;;  %v1503_v42 = vld [vmem:[%s7766_s5] sm:$0xff]  ;;  %v1506_v50 = vld [vmem:[%s7766_s5 + $0x18] sm:$0xff]  ;;  %vm1837_vm1 = vcmp.lt.s32.totalorder %v4542_v19, 46  ;;  %vm1709_vm6 = vcmp.ge.s32.totalorder %v4542_v19, 48 }
 0x2cf   : > { %v1271_v52 = vsel %vm8046_vm14, %v4008_v43, %v4013_v8  ;;  %vm7928_vm14 = vcmp.ge.s32.totalorder %v4548_v21, 3 }
 0x2d0   : > { %v3537_v4 = vpack.c.bf16 %v1272_v2, %v1271_v52 }
 0x2d1   : > { %1428 = vmatpush1.bf16.msra.mxu1 %v1247_v36 }
 0x2d2   : > { %3529 = vmatprep.subr.msk.bf16.mxu1 %vm4841_vm0, %v3528_v45 }
 0x2d4   : > { %1430 = vmatmul.mubr.bf16.vlgmr.msra.gmra.mrb[0].mxu1 %v4023_v48 }
 0x2d5   : > { %3532 = vmatpush1.bf16.msk.msra.mxu1 %vm4744_vm5, %v3531_v61  ;;  %1439 = vmatprep.mubr.bf16.mxu1 %v4026_v51 }
 0x2d6   : > { %3535 = vmatprep.subr.msk.bf16.mxu1 %vm4841_vm0, %v3534_v53  ;;  %vm1532_vm0 = vcmask 15360  }
 0x2d8   : > { %v1344_v41 = vpop.permute.xlu1 %1343 }
 0x2d9   : > { %3538 = vmatpush1.bf16.msk.msra.mxu1 %vm4744_vm5, %v3537_v4  ;;  %v1349_v58 = vpop.permute.xlu0 %1348  ;;  %vm1688_vm5 = vcmp.lt.s32.totalorder %v4542_v19, 51 }
 0x2dc   : > { %1440 = vmatmul.mubr.bf16.gmra.mrb[4].mxu1 %v4028_v54  ;;  %v1354_v62 = vpop.permute.xlu1 %1353 }
 0x2dd   : > { %1482 = vmatprep.mubr.bf16.mxu1 %v4223_v13  ;;  %v1359_v40 = vpop.permute.xlu0 %1358 }
 0x2e4   : > { %3259 = vmatmul.mubr.msk.bf16.vlgmr.msra.gmra.mrb[0].mxu1 %vm8048_vm11, %v4029_v55  ;;  %vm7932_vm11 = vcmp.ge.s32.totalorder %v4551_v24, 3 }
 0x2e5   : > { %1492 = vmatprep.mubr.bf16.mxu1 %v4223_v13 }
 0x2ec   : > { %3260 = vmatmul.mubr.msk.bf16.gmra.mrb[4].mxu1 %vm8049_vm8, %v4030_v56  ;;  %vm7929_vm8 = vcmp.ge.s32.totalorder %v4548_v21, 2 }
 0x3b7   : > { %v1484_v57 = vpop.f32.mrb[0].mxu1 }
 0x3b8   : > { %v5109_v31 = vadd.f32 %v1484_v57, %v1344_v41  ;;  %v1486_v5 = vpop.f32.mrb[1].mxu1 }
 0x3b9   : > { %v5111_v6 = vadd.f32 %v1486_v5, %v1344_v41  ;;  %v1488_v3 = vpop.f32.mrb[2].mxu1 }
 0x3ba   : > { %v1490_v59 = vpop.f32.mrb[3].mxu1  ;;  %v5113_v60 = vadd.f32 %v1488_v3, %v1349_v58 }
 0x3bb   : > { %v5115_v0 = vadd.f32 %v1490_v59, %v1349_v58  ;;  %v1563_v13 = vmax.f32 %v5109_v31, %v5111_v6  ;;  %v1511_v1 = vadd.f32 %v5111_v6, %v5109_v31 }
 0x3bd   : > { %1564 = vmax.xlane.f32.xlu0 %v1563_v13  ;;  %1512 = vadd.xlane.f32.xlu1 %v1511_v1  ;;  %v1514_v7 = vadd.f32 %v5115_v0, %v5113_v60  ;;  %v1566_v10 = vmax.f32 %v5113_v60, %v5115_v0 }
 0x3bf   : > { %v1494_v63 = vpop.f32.mrb[4].mxu1 }
 0x3c0   : > { %v5125_v11 = vadd.f32 %v1494_v63, %v1354_v62  ;;  %v1496_v12 = vpop.f32.mrb[5].mxu1 }
 0x3c1   : > { %v5127_v22 = vadd.f32 %v1496_v12, %v1354_v62  ;;  %v1498_v16 = vpop.f32.mrb[6].mxu1  ;;  %1515 = vadd.xlane.f32.xlu0 %v1514_v7  ;;  %1567 = vmax.xlane.f32.xlu1 %v1566_v10 }
 0x3c2   : > { %v5129_v14 = vadd.f32 %v1498_v16, %v1359_v40  ;;  %v1500_v15 = vpop.f32.mrb[7].mxu1 }
 0x3c3   : > { %v5131_v26 = vadd.f32 %v1500_v15, %v1359_v40  ;;  %v1517_v27 = vadd.f32 %v5127_v22, %v5125_v11  ;;  %v1569_v30 = vmax.f32 %v5125_v11, %v5127_v22 }
 0x3c5   : > { %1518 = vadd.xlane.f32.xlu0 %v1517_v27  ;;  %v1520_v28 = vadd.f32 %v5131_v26, %v5129_v14  ;;  %v1572_v39 = vmax.f32 %v5129_v14, %v5131_v26 }
 0x3c7   : > { %1521 = vadd.xlane.f32.xlu1 %v1520_v28 }
 0x3c9   : > { %1570 = vmax.xlane.f32.xlu0 %v1569_v30 }
 0x3cb   : > { %1573 = vmax.xlane.f32.xlu1 %v1572_v39 }
 0x44a   : > { %v1565_v17 = vpop.xlane.xlu0 %1564  ;;  %v1513_v32 = vpop.xlane.xlu1 %1512 }
 0x44b   : > { %v1524_v34 = vmul.f32 0.00390625, %v1513_v32  ;;  %v1575_v47 = vmul.f32 %v1565_v17, %v1503_v42 }
 0x44d   : > { %v1528_v43 = vmul.f32 %v1524_v34, %v1503_v42  ;;  %v1579_v54 = vsel %vm1532_vm0, %v1575_v47, 0.0 }
 0x44e   : > { %v1516_v33 = vpop.xlane.xlu0 %1515  ;;  %v1568_v38 = vpop.xlane.xlu1 %1567 }
 0x44f   : > { %v1525_v29 = vmul.f32 0.00390625, %v1516_v33  ;;  %v1576_v8 = vmul.f32 %v1568_v38, %v1504_v37  ;;  %v1533_v51 = vsel %vm1532_vm0, %v1528_v43, 0.0  ;;  %v1507_v38 = vld [vmem:[%s7767_s6] sm:$0xff]  ;;  %v1510_v43 = vld [vmem:[%s7767_s6 + $0x18] sm:$0xff] }
 0x451   : > { %v1529_v44 = vmul.f32 %v1525_v29, %v1504_v37  ;;  %v1580_v61 = vsel %vm1532_vm0, %v1576_v8, 0.0  ;;  %v1508_v37 = vld [vmem:[%s7767_s6 + $0x8] sm:$0xff] }
 0x452   : > { %v1519_v36 = vpop.xlane.xlu0 %1518  ;;  %v1581_v57 = vadd.f32 %v1580_v61, %v1579_v54 }
 0x453   : > { %v1534_v45 = vsel %vm1532_vm0, %v1529_v44, 0.0  ;;  %v1526_v48 = vmul.f32 0.00390625, %v1519_v36  ;;  %v1509_v44 = vld [vmem:[%s7767_s6 + $0x10] sm:$0xff] }
 0x454   : > { %v1522_v49 = vpop.xlane.xlu1 %1521  ;;  %v1535_v53 = vadd.f32 %v1534_v45, %v1533_v51 }
 0x455   : > { %v1527_v52 = vmul.f32 0.00390625, %v1522_v49  ;;  %v1530_v2 = vmul.f32 %v1526_v48, %v1505_v9 }
 0x456   : > { %v1571_v4 = vpop.xlane.xlu0 %1570 }
 0x457   : > { %v1536_v55 = vsel %vm1532_vm0, %v1530_v2, 0.0  ;;  %v1577_v56 = vmul.f32 %v1571_v4, %v1505_v9  ;;  %v1531_v41 = vmul.f32 %v1527_v52, %v1506_v50 }
 0x458   : > { %v1537_v5 = vadd.f32 %v1536_v55, %v1535_v53  ;;  %v1574_v3 = vpop.xlane.xlu1 %1573 }
 0x459   : > { %v1582_v58 = vsel %vm1532_vm0, %v1577_v56, 0.0  ;;  %v1538_v59 = vsel %vm1532_vm0, %v1531_v41, 0.0  ;;  %v1578_v13 = vmul.f32 %v1574_v3, %v1506_v50 }
 0x45a   : > { %v1583_v1 = vadd.f32 %v1582_v58, %v1581_v57  ;;  %v1539_v62 = vadd.f32 %v1538_v59, %v1537_v5 }
 0x45b   : > { %v1584_v63 = vsel %vm1532_vm0, %v1578_v13, 0.0 }
 0x45c   : > { %v1540_v7 = vrot.slane %v1539_v62, 4  ;;  %v1585_v10 = vadd.f32 %v1584_v63, %v1583_v1 }
 0x45e   : > { %v1541_v12 = vadd.f32 %v1540_v7, %v1539_v62  ;;  %v1586_v40 = vrot.slane %v1585_v10, 4 }
 0x460   : > { %v1542_v16 = vrot.slane %v1541_v12, 2  ;;  %v1587_v15 = vadd.f32 %v1586_v40, %v1585_v10 }
 0x462   : > { %v1543_v27 = vadd.f32 %v1542_v16, %v1541_v12  ;;  %v1588_v28 = vrot.slane %v1587_v15, 2 }
 0x464   : > { %v1589_v30 = vadd.f32 %v1588_v28, %v1587_v15  ;;  %v1544_v39 = vrot.slane %v1543_v27, 1 }
 0x466   : > { %v1590_v17 = vrot.slane %v1589_v30, 1  ;;  %v1545_v34 = vadd.f32 %v1544_v39, %v1543_v27 }
 0x468   : > { %v1591_v32 = vadd.f32 %v1590_v17, %v1589_v30  ;;  %v1546_v8 = vmax.f32 %v1545_v34, 0.0 }
 0x46a   : > { %v1592_v33 = vmax.f32 %v1591_v32, 0.0  ;;  %v1548_v50 = vmul.f32 %v1546_v8, %v1508_v37  ;;  %v1547_v51 = vmul.f32 %v1546_v8, %v1507_v38  ;;  %v1550_v2 = vmul.f32 %v1546_v8, %v1510_v43 }
 0x46b   : > { %v1549_v53 = vmul.f32 %v1546_v8, %v1509_v44 }
 0x46c   : > { %v1594_v29 = vmul.f32 %v1592_v33, %v1508_v37  ;;  %v1593_v42 = vmul.f32 %v1592_v33, %v1507_v38  ;;  %v1596_v47 = vmul.f32 %v1592_v33, %v1510_v43  ;;  %v1595_v45 = vmul.f32 %v1592_v33, %v1509_v44 }
 0x46d   : > { %v1554_v61 = vsel %vm1532_vm0, %v1548_v50, 0.0  ;;  %v1551_v52 = vsel %vm1532_vm0, %v1547_v51, 0.0  ;;  %v1560_v4 = vsel %vm1532_vm0, %v1550_v2, 0.0  ;;  %v1557_v54 = vsel %vm1532_vm0, %v1549_v53, 0.0 }
 0x46e   : > { %v1600_v36 = vsel %vm1532_vm0, %v1594_v29, 0.0  ;;  %v1597_v9 = vsel %vm1532_vm0, %v1593_v42, 0.0  ;;  %v1606_v48 = vsel %vm1532_vm0, %v1596_v47, 0.0  ;;  %v1603_v49 = vsel %vm1532_vm0, %v1595_v45, 0.0  ;;  %vm5947_vm0 = vmand %vm7928_vm14, %vm1709_vm6 }
 0x46f   : > { %1601 = vadd.xlane.f32.xlu1 %v1600_v36  ;;  %1598 = vadd.xlane.f32.xlu0 %v1597_v9  ;;  %vm7930_vm14 = vcmp.lt.s32.totalorder %v4551_v24, 13 }
 0x473   : > { %1607 = vadd.xlane.f32.xlu1 %v1606_v48  ;;  %1604 = vadd.xlane.f32.xlu0 %v1603_v49 }
 0x477   : > { %1555 = vadd.xlane.f32.xlu1 %v1554_v61  ;;  %1552 = vadd.xlane.f32.xlu0 %v1551_v52 }
 0x47b   : > { %1561 = vadd.xlane.f32.xlu1 %v1560_v4  ;;  %1558 = vadd.xlane.f32.xlu0 %v1557_v54 }
 0x4fc   : > { %v1602_v55 = vpop.xlane.xlu1 %1601  ;;  %v1599_v56 = vpop.xlane.xlu0 %1598 }
 0x500   : > { %v1608_v41 = vpop.xlane.xlu1 %1607  ;;  %v1605_v57 = vpop.xlane.xlu0 %1604 }
 0x504   : > { %v1556_v5 = vpop.xlane.xlu1 %1555  ;;  %v1553_v3 = vpop.xlane.xlu0 %1552 }
 0x505   : > { %v1610_v58 = vadd.f32 %v1602_v55, %v1556_v5  ;;  %v1609_v59 = vadd.f32 %v1599_v56, %v1553_v3 }
 0x507   : > { %v3262_v13 = vmul.f32 -1.442695, %v1610_v58  ;;  %v3261_v1 = vmul.f32 -1.442695, %v1609_v59 }
 0x508   : > { %v1562_v62 = vpop.xlane.xlu1 %1561  ;;  %v1559_v63 = vpop.xlane.xlu0 %1558 }
 0x509   : > { %4031 = vpow2.f32 %v3262_v13  ;;  %v1612_v7 = vadd.f32 %v1608_v41, %v1562_v62  ;;  %v1611_v10 = vadd.f32 %v1605_v57, %v1559_v63 }
 0x50a   : > { %4033 = vpow2.f32 %v3261_v1 }
 0x50b   : > { %v3264_v12 = vmul.f32 -1.442695, %v1612_v7  ;;  %v3263_v40 = vmul.f32 -1.442695, %v1611_v10 }
 0x50d   : > { %4035 = vpow2.f32 %v3264_v12 }
 0x50e   : > { %4037 = vpow2.f32 %v3263_v40 }
 0x513   : > { %v4032_v16 = vpop.eup %4031 }
 0x514   : > { %v4034_v15 = vpop.eup %4033  ;;  %v1626_v27 = vadd.f32 1.0, %v4032_v16 }
 0x515   : > { %v1625_v28 = vadd.f32 1.0, %v4034_v15 }
 0x516   : > { %4039 = vrcp.f32 %v1626_v27 }
 0x517   : > { %v4036_v30 = vpop.eup %4035  ;;  %4041 = vrcp.f32 %v1625_v28 }
 0x518   : > { %v4038_v39 = vpop.eup %4037  ;;  %v1628_v17 = vadd.f32 1.0, %v4036_v30 }
 0x519   : > { %v1627_v32 = vadd.f32 1.0, %v4038_v39 }
 0x51a   : > { %4043 = vrcp.f32 %v1628_v17 }
 0x51b   : > { %4045 = vrcp.f32 %v1627_v32 }
 0x520   : > { %v4040_v34 = vpop.eup %4039 }
 0x521   : > { %v4042_v33 = vpop.eup %4041  ;;  %v5182_v29 = vmul.f32 %v4040_v34, %v5113_v60  ;;  %v5185_v42 = vmul.f32 %v4040_v34, %v5115_v0 }
 0x522   : > { %v5194_v8 = vmul.f32 %v4042_v33, %v5109_v31  ;;  %v5197_v36 = vmul.f32 %v4042_v33, %v5111_v6 }
 0x523   : > { %8050 = vst [vmem:[#allocation22_spill] sm:$0xff] %v5182_v29  ;;  %8051 = vst [vmem:[#allocation23_spill] sm:$0xff] %v5185_v42 }
 0x524   : > { %v4044_v37 = vpop.eup %4043  ;;  %8054 = vst [vmem:[#allocation26_spill] sm:$0xff] %v5194_v8  ;;  %8055 = vst [vmem:[#allocation27_spill] sm:$0xff] %v5197_v36  ;;  %v1645_v28 = vadd.f32 %v5182_v29, %v5194_v8  ;;  %v1654_v30 = vadd.f32 %v5185_v42, %v5197_v36 }
 0x525   : > { %v4046_v38 = vpop.eup %4045  ;;  %v5188_v43 = vmul.f32 %v4044_v37, %v5129_v14  ;;  %v5191_v44 = vmul.f32 %v4044_v37, %v5131_v26 }
 0x526   : > { %v5200_v9 = vmul.f32 %v4046_v38, %v5125_v11  ;;  %v5203_v60 = vmul.f32 %v4046_v38, %v5127_v22 }
 0x527   : > { %8052 = vst [vmem:[#allocation24_spill] sm:$0xff] %v5188_v43  ;;  %8053 = vst [vmem:[#allocation25_spill] sm:$0xff] %v5191_v44  ;;  %v1667_v0 = vmax.f32 %v5182_v29, %v5188_v43  ;;  %v1676_v14 = vmax.f32 %v5185_v42, %v5191_v44 }
 0x528   : > { %8056 = vst [vmem:[#allocation28_spill] sm:$0xff] %v5200_v9  ;;  %8057 = vst [vmem:[#allocation29_spill] sm:$0xff] %v5203_v60  ;;  %v1666_v26 = vmax.f32 %v5194_v8, %v5200_v9  ;;  %v1675_v31 = vmax.f32 %v5197_v36, %v5203_v60  ;;  %v1646_v39 = vadd.f32 %v1645_v28, %v5200_v9 }
 0x529   : > { %v1655_v17 = vadd.f32 %v1654_v30, %v5203_v60 }
 0x52a   : > { %v1668_v6 = vmax.f32 %v1666_v26, %v1667_v0  ;;  %v1677_v47 = vmax.f32 %v1675_v31, %v1676_v14  ;;  %v1647_v33 = vadd.f32 %v1646_v39, %v5188_v43 }
 0x52b   : > { %v1656_v37 = vadd.f32 %v1655_v17, %v5191_v44 }
 0x52c   : > { %v1669_v45 = vrot.slane %v1668_v6, 4  ;;  %v1678_v11 = vrot.slane %v1677_v47, 4  ;;  %v1648_v14 = vrot.slane %v1647_v33, 4 }
 0x52d   : > { %v1657_v26 = vrot.slane %v1656_v37, 4 }
 0x52e   : > { %v1670_v48 = vmax.f32 %v1668_v6, %v1669_v45  ;;  %v1679_v49 = vmax.f32 %v1677_v47, %v1678_v11  ;;  %v1649_v47 = vadd.f32 %v1648_v14, %v1647_v33 }
 0x52f   : > { %v1658_v45 = vadd.f32 %v1657_v26, %v1656_v37 }
 0x530   : > { %v1671_v22 = vrot.slane %v1670_v48, 2  ;;  %v1680_v50 = vrot.slane %v1679_v49, 2 }
 0x532   : > { %v1672_v51 = vmax.f32 %v1670_v48, %v1671_v22  ;;  %v1681_v61 = vmax.f32 %v1679_v49, %v1680_v50  ;;  %v1650_v49 = vrot.slane %v1649_v47, 2  ;;  %v1659_v22 = vrot.slane %v1658_v45, 2 }
 0x534   : > { %v1673_v52 = vrot.slane %v1672_v51, 1  ;;  %v1682_v2 = vrot.slane %v1681_v61, 1 }
 0x536   : > { %v5213_v53 = vmax.f32 %v1672_v51, %v1673_v52  ;;  %v5215_v4 = vmax.f32 %v1681_v61, %v1682_v2  ;;  %v1651_v61 = vadd.f32 %v1650_v49, %v1649_v47  ;;  %v1660_v52 = vadd.f32 %v1659_v22, %v1658_v45 }
 0x538   : > { %8058 = vst [vmem:[#allocation30_spill] sm:$0xff] %v5213_v53  ;;  %8059 = vst [vmem:[#allocation31_spill] sm:$0xff] %v5215_v4  ;;  %1697 = vrot.lane.b32.xlu0 %v5215_v4, %s4224_s7  ;;  %1695 = vrot.lane.b32.xlu1 %v5213_v53, %s4224_s7  ;;  %v1652_v30 = vrot.slane %v1651_v61, 1  ;;  %v1661_v39 = vrot.slane %v1660_v52, 1 }
 0x53a   : > { %v1653_v37 = vadd.f32 %v1652_v30, %v1651_v61  ;;  %v1662_v14 = vadd.f32 %v1661_v39, %v1660_v52 }
 0x53c   : > { %1730 = vrot.lane.b32.xlu0 %v5215_v4, %s4225_s29  ;;  %1728 = vrot.lane.b32.xlu1 %v5213_v53, %s4225_s29  ;;  %v5485_v45 = vmul.f32 0.03125, %v1653_v37  ;;  %v5487_v49 = vmul.f32 0.03125, %v1662_v14 }
 0x540   : > { %1761 = vrot.lane.b32.xlu0 %v5215_v4, %s4226_s11  ;;  %1759 = vrot.lane.b32.xlu1 %v5213_v53, %s4226_s11 }
 0x544   : > { %1790 = vrot.lane.b32.xlu0 %v5215_v4, %s4227_s12  ;;  %1788 = vrot.lane.b32.xlu1 %v5213_v53, %s4227_s12 }
 0x548   : > { %1817 = vrot.lane.b32.xlu0 %v5215_v4, %s7791_s14  ;;  %1815 = vrot.lane.b32.xlu1 %v5213_v53, %s7791_s14  ;;  %s7799_s14 = smov 34  }
 0x54c   : > { %1846 = vrot.lane.b32.xlu0 %v5215_v4, %s7793_s17  ;;  %1844 = vrot.lane.b32.xlu1 %v5213_v53, %s7793_s17  ;;  %s7801_s17 = smov 33  }
 0x550   : > { %1877 = vrot.lane.b32.xlu0 %v5215_v4, %s7795_s20  ;;  %1875 = vrot.lane.b32.xlu1 %v5213_v53, %s7795_s20  ;;  %s7803_s20 = smov 32  }
 0x554   : > { %1908 = vrot.lane.b32.xlu0 %v5215_v4, %s7797_s22  ;;  %1906 = vrot.lane.b32.xlu1 %v5213_v53, %s7797_s22  ;;  %s7805_s22 = smov 31  }
 0x558   : > { %1939 = vrot.lane.b32.xlu0 %v5215_v4, %s7799_s14  ;;  %1937 = vrot.lane.b32.xlu1 %v5213_v53, %s7799_s14  ;;  %s4236_s14 = smov 30  }
 0x55c   : > { %1968 = vrot.lane.b32.xlu0 %v5215_v4, %s7801_s17  ;;  %1966 = vrot.lane.b32.xlu1 %v5213_v53, %s7801_s17  ;;  %s4237_s17 = smov 29  }
 0x560   : > { %1997 = vrot.lane.b32.xlu0 %v5215_v4, %s7803_s20  ;;  %1995 = vrot.lane.b32.xlu1 %v5213_v53, %s7803_s20  ;;  %s7807_s20 = smov 19  }
 0x564   : > { %2024 = vrot.lane.b32.xlu0 %v5215_v4, %s7805_s22  ;;  %2022 = vrot.lane.b32.xlu1 %v5213_v53, %s7805_s22  ;;  %s4239_s22 = smov 18  }
 0x568   : > { %2053 = vrot.lane.b32.xlu0 %v5215_v4, %s4236_s14  ;;  %2051 = vrot.lane.b32.xlu1 %v5213_v53, %s4236_s14 }
 0x56c   : > { %2082 = vrot.lane.b32.xlu0 %v5215_v4, %s4237_s17  ;;  %2080 = vrot.lane.b32.xlu1 %v5213_v53, %s4237_s17 }
 0x570   : > { %2111 = vrot.lane.b32.xlu0 %v5215_v4, %s7807_s20  ;;  %2109 = vrot.lane.b32.xlu1 %v5213_v53, %s7807_s20  ;;  %s4240_s20 = smov 14  }
 0x574   : > { %2140 = vrot.lane.b32.xlu0 %v5215_v4, %s4239_s22  ;;  %2138 = vrot.lane.b32.xlu1 %v5213_v53, %s4239_s22 }
 0x578   : > { %2168 = vrot.lane.b32.xlu0 %v5215_v4, %s7809_s26  ;;  %2166 = vrot.lane.b32.xlu1 %v5213_v53, %s7809_s26  ;;  %s4241_s26 = smov 13  }
 0x57c   : > { %2194 = vrot.lane.b32.xlu0 %v5215_v4, %s7811_s10  ;;  %2192 = vrot.lane.b32.xlu1 %v5213_v53, %s7811_s10  ;;  %s7815_s10 = smov 3  }
 0x580   : > { %2220 = vrot.lane.b32.xlu0 %v5215_v4, %s7813_s13  ;;  %2218 = vrot.lane.b32.xlu1 %v5213_v53, %s7813_s13  ;;  %s7817_s13 = smov 2  }
 0x584   : > { %2247 = vrot.lane.b32.xlu0 %v5215_v4, %s4240_s20  ;;  %2245 = vrot.lane.b32.xlu1 %v5213_v53, %s4240_s20 }
 0x588   : > { %2276 = vrot.lane.b32.xlu0 %v5215_v4, %s4241_s26  ;;  %2274 = vrot.lane.b32.xlu1 %v5213_v53, %s4241_s26 }
 0x58c   : > { %2305 = vrot.lane.b32.xlu0 %v5215_v4, %s7815_s10  ;;  %2303 = vrot.lane.b32.xlu1 %v5213_v53, %s7815_s10  ;;  %s4244_s10 = smov 126  }
 0x590   : > { %2332 = vrot.lane.b32.xlu0 %v5215_v4, %s7817_s13  ;;  %2330 = vrot.lane.b32.xlu1 %v5213_v53, %s7817_s13  ;;  %s4245_s13 = smov 125  }
 0x594   : > { %2358 = vrot.lane.b32.xlu0 %v5215_v4, %s7819_s18  ;;  %2356 = vrot.lane.b32.xlu1 %v5213_v53, %s7819_s18  ;;  %s4246_s18 = smov 115  }
 0x598   : > { %2396 = vrot.lane.b32.xlu0 %v5215_v4, %s7821_s21  ;;  %2394 = vrot.lane.b32.xlu1 %v5213_v53, %s7821_s21  ;;  %s4247_s21 = smov 114  }
 0x59c   : > { %2423 = vrot.lane.b32.xlu0 %v5215_v4, %s4244_s10  ;;  %2421 = vrot.lane.b32.xlu1 %v5213_v53, %s4244_s10 }
 0x5a0   : > { %2450 = vrot.lane.b32.xlu0 %v5215_v4, %s4245_s13  ;;  %2448 = vrot.lane.b32.xlu1 %v5213_v53, %s4245_s13 }
 0x5a4   : > { %2477 = vrot.lane.b32.xlu0 %v5215_v4, %s4246_s18  ;;  %2475 = vrot.lane.b32.xlu1 %v5213_v53, %s4246_s18 }
 0x5a8   : > { %2506 = vrot.lane.b32.xlu0 %v5215_v4, %s4247_s21  ;;  %2504 = vrot.lane.b32.xlu1 %v5213_v53, %s4247_s21 }
 0x5aa   : > { %v5333_v54 = vpop.permute.xlu0 %1697  ;;  %v5335_v55 = vpop.permute.xlu1 %1695 }
 0x5ac   : > { %2534 = vrot.lane.b32.xlu0 %v5215_v4, %s7823_s23  ;;  %2532 = vrot.lane.b32.xlu1 %v5213_v53, %s7823_s23  ;;  %s7829_s23 = smov 110  }
 0x5ae   : > { %v5341_v56 = vpop.permute.xlu0 %1730  ;;  %v5343_v41 = vpop.permute.xlu1 %1728 }
 0x5b0   : > { %2560 = vrot.lane.b32.xlu0 %v5215_v4, %s7825_s24  ;;  %2558 = vrot.lane.b32.xlu1 %v5213_v53, %s7825_s24  ;;  %s7831_s24 = smov 109  }
 0x5b2   : > { %v5349_v57 = vpop.permute.xlu0 %1761  ;;  %v5351_v5 = vpop.permute.xlu1 %1759 }
 0x5b4   : > { %2586 = vrot.lane.b32.xlu0 %v5215_v4, %s7827_s19  ;;  %2584 = vrot.lane.b32.xlu1 %v5213_v53, %s7827_s19  ;;  %s7833_s19 = smov 99  }
 0x5b6   : > { %v5357_v3 = vpop.permute.xlu0 %1790  ;;  %v5359_v58 = vpop.permute.xlu1 %1788 }
 0x5b8   : > { %2613 = vrot.lane.b32.xlu0 %v5215_v4, %s7829_s23  ;;  %2611 = vrot.lane.b32.xlu1 %v5213_v53, %s7829_s23  ;;  %s4251_s23 = smov 98  }
 0x5ba   : > { %v5365_v59 = vpop.permute.xlu0 %1817  ;;  %v5367_v13 = vpop.permute.xlu1 %1815 }
 0x5bc   : > { %2642 = vrot.lane.b32.xlu0 %v5215_v4, %s7831_s24  ;;  %2640 = vrot.lane.b32.xlu1 %v5213_v53, %s7831_s24  ;;  %s7835_s24 = smov 97  }
 0x5be   : > { %v5373_v1 = vpop.permute.xlu0 %1846  ;;  %v5375_v62 = vpop.permute.xlu1 %1844 }
 0x5c0   : > { %2671 = vrot.lane.b32.xlu0 %v5215_v4, %s7833_s19  ;;  %2669 = vrot.lane.b32.xlu1 %v5213_v53, %s7833_s19  ;;  %s7837_s19 = smov 96  }
 0x5c2   : > { %v5381_v63 = vpop.permute.xlu0 %1877  ;;  %v5383_v7 = vpop.permute.xlu1 %1875 }
 0x5c4   : > { %2702 = vrot.lane.b32.xlu0 %v5215_v4, %s4251_s23  ;;  %2700 = vrot.lane.b32.xlu1 %v5213_v53, %s4251_s23 }
 0x5c6   : > { %v5389_v10 = vpop.permute.xlu0 %1908  ;;  %v5391_v12 = vpop.permute.xlu1 %1906 }
 0x5c8   : > { %2731 = vrot.lane.b32.xlu0 %v5215_v4, %s7835_s24  ;;  %2729 = vrot.lane.b32.xlu1 %v5213_v53, %s7835_s24  ;;  %s7839_s24 = smov 95  }
 0x5ca   : > { %v5397_v40 = vpop.permute.xlu0 %1939  ;;  %v5399_v16 = vpop.permute.xlu1 %1937 }
 0x5cc   : > { %2760 = vrot.lane.b32.xlu0 %v5215_v4, %s7837_s19  ;;  %2758 = vrot.lane.b32.xlu1 %v5213_v53, %s7837_s19  ;;  %s7841_s19 = smov 94  }
 0x5ce   : > { %v5405_v15 = vpop.permute.xlu0 %1968  ;;  %v5407_v27 = vpop.permute.xlu1 %1966 }
 0x5d0   : > { %2787 = vrot.lane.b32.xlu0 %v5215_v4, %s7839_s24  ;;  %2785 = vrot.lane.b32.xlu1 %v5213_v53, %s7839_s24  ;;  %s7843_s24 = smov 93  }
 0x5d2   : > { %v5419_v32 = vpop.permute.xlu0 %1997  ;;  %v5421_v34 = vpop.permute.xlu1 %1995 }
 0x5d4   : > { %2816 = vrot.lane.b32.xlu0 %v5215_v4, %s7841_s19  ;;  %2814 = vrot.lane.b32.xlu1 %v5213_v53, %s7841_s19  ;;  %s7845_s19 = smov 83  }
 0x5d6   : > { %v5429_v38 = vpop.permute.xlu0 %2024  ;;  %v5431_v0 = vpop.permute.xlu1 %2022 }
 0x5d8   : > { %2845 = vrot.lane.b32.xlu0 %v5215_v4, %s7843_s24  ;;  %2843 = vrot.lane.b32.xlu1 %v5213_v53, %s7843_s24  ;;  %s7847_s24 = smov 82  }
 0x5da   : > { %v5437_v31 = vpop.permute.xlu0 %2053  ;;  %v5439_v6 = vpop.permute.xlu1 %2051 }
 0x5dc   : > { %2874 = vrot.lane.b32.xlu0 %v5215_v4, %s7845_s19  ;;  %2872 = vrot.lane.b32.xlu1 %v5213_v53, %s7845_s19  ;;  %s7849_s19 = smov 81  }
 0x5de   : > { %v5445_v11 = vpop.permute.xlu0 %2082  ;;  %v5447_v48 = vpop.permute.xlu1 %2080 }
 0x5e0   : > { %2905 = vrot.lane.b32.xlu0 %v5215_v4, %s7847_s24  ;;  %2903 = vrot.lane.b32.xlu1 %v5213_v53, %s7847_s24  ;;  %s7851_s24 = smov 80  }
 0x5e2   : > { %v5453_v50 = vpop.permute.xlu0 %2111  ;;  %v5455_v51 = vpop.permute.xlu1 %2109 }
 0x5e4   : > { %2934 = vrot.lane.b32.xlu0 %v5215_v4, %s7849_s19  ;;  %2932 = vrot.lane.b32.xlu1 %v5213_v53, %s7849_s19  ;;  %s4261_s19 = smov 79  }
 0x5e6   : > { %v5461_v2 = vpop.permute.xlu0 %2140  ;;  %v5463_v28 = vpop.permute.xlu1 %2138 }
 0x5e8   : > { %2963 = vrot.lane.b32.xlu0 %v5215_v4, %s7851_s24  ;;  %2961 = vrot.lane.b32.xlu1 %v5213_v53, %s7851_s24  ;;  %s7904_s24 = smov 78  }
 0x5ea   : > { %v5469_v17 = vpop.permute.xlu0 %2168  ;;  %v5471_v33 = vpop.permute.xlu1 %2166 }
 0x5ec   : > { %2990 = vrot.lane.b32.xlu0 %v5215_v4, %s4261_s19  ;;  %2988 = vrot.lane.b32.xlu1 %v5213_v53, %s4261_s19 }
 0x5ee   : > { %v5477_v26 = vpop.permute.xlu0 %2194  ;;  %v5479_v47 = vpop.permute.xlu1 %2192 }
 0x5f0   : > { %3019 = vrot.lane.b32.xlu0 %v5215_v4, %s7904_s24  ;;  %3017 = vrot.lane.b32.xlu1 %v5213_v53, %s7904_s24  ;;  %s5723_s24 = sld [smem:[#allocation9 + $0x38]] }
 0x5f2   : > { %v5489_v22 = vpop.permute.xlu0 %2220  ;;  %v5491_v18 = vpop.permute.xlu1 %2218 }
 0x5f4   : > { %1686 = vrot.lane.b32.xlu1 %v5487_v49, %s4224_s7  ;;  %1684 = vrot.lane.b32.xlu0 %v5485_v45, %s4224_s7  ;;  %s8068_s7 = smov 47  }
 0x5f6   : > { %v5497_v61 = vpop.permute.xlu0 %2247  ;;  %v5499_v52 = vpop.permute.xlu1 %2245 }
 0x5f7   : > { %8060 = vst [vmem:[#allocation32_spill] sm:$0xff] %v5497_v61  ;;  %8061 = vst [vmem:[#allocation33_spill] sm:$0xff] %v5499_v52 }
 0x5f8   : > { %1717 = vrot.lane.b32.xlu1 %v5485_v45, %s4225_s29  ;;  %1719 = vrot.lane.b32.xlu0 %v5487_v49, %s4225_s29  ;;  %s8071_s29 = smov 46  }
 0x5fa   : > { %v5505_v30 = vpop.permute.xlu0 %2276  ;;  %v5507_v39 = vpop.permute.xlu1 %2274 }
 0x5fb   : > { %8062 = vst [vmem:[#allocation34_spill] sm:$0xff] %v5505_v30  ;;  %8063 = vst [vmem:[#allocation35_spill] sm:$0xff] %v5507_v39 }
 0x5fc   : > { %1748 = vrot.lane.b32.xlu1 %v5485_v45, %s4226_s11  ;;  %1750 = vrot.lane.b32.xlu0 %v5487_v49, %s4226_s11  ;;  %s8074_s11 = smov 45  }
 0x5fe   : > { %v5513_v37 = vpop.permute.xlu0 %2305  ;;  %v5515_v14 = vpop.permute.xlu1 %2303 }
 0x5ff   : > { %8064 = vst [vmem:[#allocation36_spill] sm:$0xff] %v5513_v37  ;;  %8065 = vst [vmem:[#allocation37_spill] sm:$0xff] %v5515_v14 }
 0x600   : > { %1777 = vrot.lane.b32.xlu1 %v5485_v45, %s4227_s12  ;;  %1779 = vrot.lane.b32.xlu0 %v5487_v49, %s4227_s12  ;;  %s8077_s12 = smov 35  }
 0x602   : > { %v5521_v44 = vpop.permute.xlu0 %2332  ;;  %v5523_v60 = vpop.permute.xlu1 %2330 }
 0x603   : > { %8066 = vst [vmem:[#allocation38_spill] sm:$0xff] %v5521_v44  ;;  %8067 = vst [vmem:[#allocation39_spill] sm:$0xff] %v5523_v60  ;;  %v1699_v44 = vsel %vm1688_vm5, %v5335_v55, %v5333_v54 }
 0x604   : > { %1804 = vrot.lane.b32.xlu1 %v5485_v45, %s8068_s7  ;;  %1806 = vrot.lane.b32.xlu0 %v5487_v49, %s8068_s7  ;;  %s8080_s7 = smov 34  }
 0x606   : > { %v5529_v42 = vpop.permute.xlu0 %2358  ;;  %v5531_v36 = vpop.permute.xlu1 %2356 }
 0x607   : > { %8069 = vst [vmem:[#allocation40_spill] sm:$0xff] %v5529_v42  ;;  %8070 = vst [vmem:[#allocation41_spill] sm:$0xff] %v5531_v36 }
 0x608   : > { %1833 = vrot.lane.b32.xlu1 %v5485_v45, %s8071_s29  ;;  %1835 = vrot.lane.b32.xlu0 %v5487_v49, %s8071_s29  ;;  %s8083_s29 = smov 33  }
 0x60a   : > { %v5537_v43 = vpop.permute.xlu0 %2396  ;;  %v5539_v9 = vpop.permute.xlu1 %2394 }
 0x60b   : > { %8072 = vst [vmem:[#allocation42_spill] sm:$0xff] %v5537_v43  ;;  %8073 = vst [vmem:[#allocation43_spill] sm:$0xff] %v5539_v9 }
 0x60c   : > { %1864 = vrot.lane.b32.xlu1 %v5485_v45, %s8074_s11  ;;  %1866 = vrot.lane.b32.xlu0 %v5487_v49, %s8074_s11  ;;  %s8086_s11 = smov 32  }
 0x60e   : > { %v5545_v29 = vpop.permute.xlu0 %2423  ;;  %v5547_v8 = vpop.permute.xlu1 %2421 }
 0x60f   : > { %8075 = vst [vmem:[#allocation44_spill] sm:$0xff] %v5545_v29  ;;  %8076 = vst [vmem:[#allocation45_spill] sm:$0xff] %v5547_v8 }
 0x610   : > { %1895 = vrot.lane.b32.xlu1 %v5485_v45, %s8077_s12  ;;  %1897 = vrot.lane.b32.xlu0 %v5487_v49, %s8077_s12  ;;  %s8089_s12 = smov 31  }
 0x612   : > { %v5553_v25 = vpop.permute.xlu0 %2450  ;;  %v5555_v23 = vpop.permute.xlu1 %2448 }
 0x613   : > { %8078 = vst [vmem:[#allocation46_spill] sm:$0xff] %v5553_v25  ;;  %8079 = vst [vmem:[#allocation47_spill] sm:$0xff] %v5555_v23 }
 0x614   : > { %1926 = vrot.lane.b32.xlu1 %v5485_v45, %s8080_s7  ;;  %1928 = vrot.lane.b32.xlu0 %v5487_v49, %s8080_s7  ;;  %s8096_s7 = smov 19  }
 0x616   : > { %v5561_v20 = vpop.permute.xlu0 %2477  ;;  %v5563_v29 = vpop.permute.xlu1 %2475 }
 0x617   : > { %8081 = vst [vmem:[#allocation48_spill] sm:$0xff] %v5561_v20  ;;  %8082 = vst [vmem:[#allocation49_spill] sm:$0xff] %v5563_v29 }
 0x618   : > { %1955 = vrot.lane.b32.xlu1 %v5485_v45, %s8083_s29  ;;  %1957 = vrot.lane.b32.xlu0 %v5487_v49, %s8083_s29  ;;  %s8114_s29 = smov 3  }
 0x61a   : > { %v5569_v8 = vpop.permute.xlu0 %2506  ;;  %v5571_v25 = vpop.permute.xlu1 %2504 }
 0x61b   : > { %8084 = vst [vmem:[#allocation50_spill] sm:$0xff] %v5569_v8  ;;  %8085 = vst [vmem:[#allocation51_spill] sm:$0xff] %v5571_v25 }
 0x61c   : > { %1984 = vrot.lane.b32.xlu1 %v5485_v45, %s8086_s11  ;;  %1986 = vrot.lane.b32.xlu0 %v5487_v49, %s8086_s11  ;;  %s8123_s11 = smov 127  }
 0x61e   : > { %v5577_v23 = vpop.permute.xlu0 %2534  ;;  %v5579_v20 = vpop.permute.xlu1 %2532 }
 0x61f   : > { %8087 = vst [vmem:[#allocation52_spill] sm:$0xff] %v5577_v23  ;;  %8088 = vst [vmem:[#allocation53_spill] sm:$0xff] %v5579_v20 }
 0x620   : > { %2011 = vrot.lane.b32.xlu1 %v5485_v45, %s8089_s12  ;;  %2013 = vrot.lane.b32.xlu0 %v5487_v49, %s8089_s12  ;;  %s3312_s12 = sld [smem:[#allocation9 + $0x18]] }
 0x622   : > { %v5585_v29 = vpop.permute.xlu0 %2560  ;;  %v5587_v8 = vpop.permute.xlu1 %2558 }
 0x623   : > { %8090 = vst [vmem:[#allocation54_spill] sm:$0xff] %v5585_v29  ;;  %8091 = vst [vmem:[#allocation55_spill] sm:$0xff] %v5587_v8 }
 0x624   : > { %2040 = vrot.lane.b32.xlu1 %v5485_v45, %s4236_s14  ;;  %2042 = vrot.lane.b32.xlu0 %v5487_v49, %s4236_s14  ;;  %s8101_s14 = smov 17  }
 0x626   : > { %v5593_v25 = vpop.permute.xlu0 %2586  ;;  %v5595_v23 = vpop.permute.xlu1 %2584 }
 0x627   : > { %8092 = vst [vmem:[#allocation56_spill] sm:$0xff] %v5593_v25  ;;  %8093 = vst [vmem:[#allocation57_spill] sm:$0xff] %v5595_v23 }
 0x628   : > { %2069 = vrot.lane.b32.xlu1 %v5485_v45, %s4237_s17  ;;  %2071 = vrot.lane.b32.xlu0 %v5487_v49, %s4237_s17  ;;  %s8104_s17 = smov 16  }
 0x62a   : > { %v5601_v20 = vpop.permute.xlu0 %2613  ;;  %v5603_v29 = vpop.permute.xlu1 %2611 }
 0x62b   : > { %8094 = vst [vmem:[#allocation58_spill] sm:$0xff] %v5601_v20  ;;  %8095 = vst [vmem:[#allocation59_spill] sm:$0xff] %v5603_v29 }
 0x62c   : > { %2098 = vrot.lane.b32.xlu1 %v5485_v45, %s8096_s7  ;;  %2100 = vrot.lane.b32.xlu0 %v5487_v49, %s8096_s7  ;;  %s3313_s7 = sld [smem:[#allocation9 + $0x49]] }
 0x62e   : > { %v5609_v8 = vpop.permute.xlu0 %2642  ;;  %v5611_v25 = vpop.permute.xlu1 %2640 }
 0x62f   : > { %8097 = vst [vmem:[#allocation60_spill] sm:$0xff] %v5609_v8  ;;  %8098 = vst [vmem:[#allocation61_spill] sm:$0xff] %v5611_v25 }
 0x630   : > { %2127 = vrot.lane.b32.xlu1 %v5485_v45, %s4239_s22  ;;  %2129 = vrot.lane.b32.xlu0 %v5487_v49, %s4239_s22  ;;  %s8107_s22 = smov 15  }
 0x632   : > { %v5617_v23 = vpop.permute.xlu0 %2671  ;;  %v5619_v20 = vpop.permute.xlu1 %2669 }
 0x633   : > { %8099 = vst [vmem:[#allocation62_spill] sm:$0xff] %v5617_v23  ;;  %8100 = vst [vmem:[#allocation63_spill] sm:$0xff] %v5619_v20 }
 0x634   : > { %2156 = vrot.lane.b32.xlu1 %v5485_v45, %s8101_s14  ;;  %2158 = vrot.lane.b32.xlu0 %v5487_v49, %s8101_s14  ;;  %s5697_s14 = sld [smem:[#allocation9 + $0x31]] }
 0x636   : > { %v5625_v29 = vpop.permute.xlu0 %2702  ;;  %v5627_v8 = vpop.permute.xlu1 %2700 }
 0x637   : > { %8102 = vst [vmem:[#allocation64_spill] sm:$0xff] %v5625_v29  ;;  %8103 = vst [vmem:[#allocation65_spill] sm:$0xff] %v5627_v8 }
 0x638   : > { %2182 = vrot.lane.b32.xlu1 %v5485_v45, %s8104_s17  ;;  %2184 = vrot.lane.b32.xlu0 %v5487_v49, %s8104_s17 }
 0x63a   : > { %v5633_v25 = vpop.permute.xlu0 %2731  ;;  %v5635_v23 = vpop.permute.xlu1 %2729 }
 0x63b   : > { %8105 = vst [vmem:[#allocation66_spill] sm:$0xff] %v5633_v25  ;;  %8106 = vst [vmem:[#allocation67_spill] sm:$0xff] %v5635_v23 }
 0x63c   : > { %2208 = vrot.lane.b32.xlu1 %v5485_v45, %s8107_s22  ;;  %2210 = vrot.lane.b32.xlu0 %v5487_v49, %s8107_s22  ;;  %s5703_s22 = sld [smem:[#allocation9 + $0x32]] }
 0x63e   : > { %v5641_v20 = vpop.permute.xlu0 %2760  ;;  %v5643_v29 = vpop.permute.xlu1 %2758 }
 0x63f   : > { %8108 = vst [vmem:[#allocation68_spill] sm:$0xff] %v5641_v20  ;;  %8109 = vst [vmem:[#allocation69_spill] sm:$0xff] %v5643_v29 }
 0x640   : > { %2234 = vrot.lane.b32.xlu1 %v5485_v45, %s4240_s20  ;;  %2236 = vrot.lane.b32.xlu0 %v5487_v49, %s4240_s20  ;;  %s8117_s20 = smov 2  }
 0x642   : > { %v5649_v8 = vpop.permute.xlu0 %2787  ;;  %v5651_v25 = vpop.permute.xlu1 %2785  ;;  %v1735_v36 = vstv %s5703_s22  ;;  %s8135_s22 = smov 112  }
 0x643   : > { %8110 = vst [vmem:[#allocation70_spill] sm:$0xff] %v5649_v8  ;;  %8111 = vst [vmem:[#allocation71_spill] sm:$0xff] %v5651_v25 }
 0x644   : > { %2263 = vrot.lane.b32.xlu1 %v5485_v45, %s4241_s26  ;;  %2265 = vrot.lane.b32.xlu0 %v5487_v49, %s4241_s26  ;;  %s8120_s26 = smov 1  }
 0x646   : > { %v5657_v23 = vpop.permute.xlu0 %2816  ;;  %v5659_v20 = vpop.permute.xlu1 %2814 }
 0x647   : > { %8112 = vst [vmem:[#allocation72_spill] sm:$0xff] %v5657_v23  ;;  %8113 = vst [vmem:[#allocation73_spill] sm:$0xff] %v5659_v20 }
 0x648   : > { %2292 = vrot.lane.b32.xlu1 %v5485_v45, %s8114_s29  ;;  %2294 = vrot.lane.b32.xlu0 %v5487_v49, %s8114_s29  ;;  %s5705_s29 = sld [smem:[#allocation9 + $0x33]] }
 0x64a   : > { %v5665_v29 = vpop.permute.xlu0 %2845  ;;  %v5667_v8 = vpop.permute.xlu1 %2843 }
 0x64b   : > { %8115 = vst [vmem:[#allocation74_spill] sm:$0xff] %v5665_v29  ;;  %8116 = vst [vmem:[#allocation75_spill] sm:$0xff] %v5667_v8 }
 0x64c   : > { %2319 = vrot.lane.b32.xlu1 %v5485_v45, %s8117_s20  ;;  %2321 = vrot.lane.b32.xlu0 %v5487_v49, %s8117_s20  ;;  %s5711_s20 = sld [smem:[#allocation9 + $0x34]] }
 0x64e   : > { %v5673_v25 = vpop.permute.xlu0 %2874  ;;  %v5675_v23 = vpop.permute.xlu1 %2872 }
 0x64f   : > { %8118 = vst [vmem:[#allocation76_spill] sm:$0xff] %v5673_v25  ;;  %8119 = vst [vmem:[#allocation77_spill] sm:$0xff] %v5675_v23 }
 0x650   : > { %2346 = vrot.lane.b32.xlu1 %v5485_v45, %s8120_s26  ;;  %2348 = vrot.lane.b32.xlu0 %v5487_v49, %s8120_s26  ;;  %s5715_s26 = sld [smem:[#allocation9 + $0x36]] }
 0x652   : > { %v5681_v20 = vpop.permute.xlu0 %2905  ;;  %v5683_v29 = vpop.permute.xlu1 %2903 }
 0x653   : > { %8121 = vst [vmem:[#allocation78_spill] sm:$0xff] %v5681_v20  ;;  %8122 = vst [vmem:[#allocation79_spill] sm:$0xff] %v5683_v29 }
 0x654   : > { %2384 = vrot.lane.b32.xlu1 %v5485_v45, %s8123_s11  ;;  %2386 = vrot.lane.b32.xlu0 %v5487_v49, %s8123_s11  ;;  %s5721_s11 = sld [smem:[#allocation9 + $0x37]] }
 0x656   : > { %v5689_v8 = vpop.permute.xlu0 %2934  ;;  %v5691_v25 = vpop.permute.xlu1 %2932  ;;  %v1851_v37 = vstv %s5715_s26  ;;  %s8136_s26 = smov 111  }
 0x657   : > { %8124 = vst [vmem:[#allocation80_spill] sm:$0xff] %v5689_v8  ;;  %8125 = vst [vmem:[#allocation81_spill] sm:$0xff] %v5691_v25  ;;  %v2373_v25 = vstv %s3312_s12  ;;  %v2377_v8 = vstv %s3313_s7  ;;  %s5786_s12 = sld [smem:[#allocation9 + $0x3b]]  ;;  %s8134_s7 = smov 113  }
 0x658   : > { %2410 = vrot.lane.b32.xlu1 %v5485_v45, %s4244_s10  ;;  %2412 = vrot.lane.b32.xlu0 %v5487_v49, %s4244_s10  ;;  %s5713_s10 = sld [smem:[#allocation9 + $0x35]]  ;;  %v2374_v23 = vmul.f32 %v2373_v25, %v5485_v45  ;;  %v2378_v42 = vmul.f32 %v2377_v8, %v5213_v53  ;;  %v2379_v60 = vmul.f32 %v2377_v8, %v5215_v4 }
 0x65a   : > { %v5699_v29 = vpop.permute.xlu0 %2963  ;;  %v5701_v20 = vpop.permute.xlu1 %2961 }
 0x65b   : > { %8126 = vst [vmem:[#allocation82_spill] sm:$0xff] %v5699_v29  ;;  %8127 = vst [vmem:[#allocation83_spill] sm:$0xff] %v5701_v20 }
 0x65c   : > { %2437 = vrot.lane.b32.xlu1 %v5485_v45, %s4245_s13  ;;  %2439 = vrot.lane.b32.xlu0 %v5487_v49, %s4245_s13  ;;  %s5729_s13 = sld [smem:[#allocation9 + $0x39]] }
 0x65e   : > { %v5717_v29 = vpop.permute.xlu0 %2990  ;;  %v5719_v20 = vpop.permute.xlu1 %2988  ;;  %v1822_v14 = vstv %s5713_s10  ;;  %s5867_s10 = sld [smem:[#allocation9 + $0x3]] }
 0x65f   : > { %8128 = vst [vmem:[#allocation84_spill] sm:$0xff] %v5717_v29  ;;  %8129 = vst [vmem:[#allocation85_spill] sm:$0xff] %v5719_v20  ;;  %v2375_v29 = vmul.f32 %v2373_v25, %v5487_v49  ;;  %v1702_v20 = vstv %s5697_s14  ;;  %v1766_v25 = vstv %s5705_s29  ;;  %s5813_s14 = sld [smem:[#allocation9 + $0x1]]  ;;  %s5854_s29 = sld [smem:[#allocation9 + $0x4]] }
 0x660   : > { %2464 = vrot.lane.b32.xlu1 %v5485_v45, %s4246_s18  ;;  %2466 = vrot.lane.b32.xlu0 %v5487_v49, %s4246_s18  ;;  %s5747_s18 = sld [smem:[#allocation9 + $0x3a]]  ;;  %v5805_v46 = vmul.f32 %v1702_v20, %v1699_v44 }
 0x661   : > { %v5755_v8 = vadd.f32 %v2379_v60, %v2375_v29  ;;  %v1733_v29 = vsel %vm1721_vm3, %v5341_v56, %v5343_v41 }
 0x662   : > { %v5735_v9 = vpop.permute.xlu0 %3019  ;;  %v5737_v43 = vpop.permute.xlu1 %3017  ;;  %v5807_v39 = vmul.f32 %v1735_v36, %v1733_v29 }
 0x663   : > { %8130 = vst [vmem:[#allocation86_spill] sm:$0xff] %v5735_v9  ;;  %8131 = vst [vmem:[#allocation87_spill] sm:$0xff] %v5737_v43  ;;  %v1795_v43 = vstv %s5711_s20  ;;  %v5757_v9 = vadd.f32 %v2378_v42, %v2374_v23  ;;  %v1700_v23 = vsel %vm1688_vm5, %v5333_v54, %v5335_v55  ;;  %v1732_v54 = vsel %vm1721_vm3, %v5343_v41, %v5341_v56  ;;  %s5865_s20 = sld [smem:[#allocation9 + $0x2]] }
 0x664   : > { %2493 = vrot.lane.b32.xlu1 %v5485_v45, %s4247_s21  ;;  %2495 = vrot.lane.b32.xlu0 %v5487_v49, %s4247_s21  ;;  %8132 = vst [vmem:[#allocation88_spill] sm:$0xff] %v5755_v8  ;;  %s5766_s21 = sld [smem:[#allocation9]]  ;;  %v1703_v8 = vmul.f32 %v1702_v20, %v1700_v23  ;;  %v1793_v56 = vsel %vm1781_vm12, %v5357_v3, %v5359_v58 }
 0x665   : > { %8133 = vst [vmem:[#allocation89_spill] sm:$0xff] %v5757_v9  ;;  %v1882_v9 = vstv %s5721_s11  ;;  %v1820_v20 = vsel %vm1808_vm2, %v5365_v59, %v5367_v13  ;;  %v5829_v23 = vmul.f32 %v1735_v36, %v1732_v54  ;;  %v1848_v36 = vsel %vm1837_vm1, %v5375_v62, %v5373_v1  ;;  %s5890_s11 = sld [smem:[#allocation9 + $0x5]] }
 0x666   : > { %v1687_v4 = vpop.permute.xlu1 %1686  ;;  %v1685_v53 = vpop.permute.xlu0 %1684 }
 0x667   : > { %v5778_v42 = vsel %vm1688_vm5, %v1685_v53, %v1687_v4  ;;  %v1690_v60 = vsel %vm1688_vm5, %v1687_v4, %v1685_v53  ;;  %v1763_v53 = vsel %vm1752_vm9, %v5351_v5, %v5349_v57  ;;  %v1764_v4 = vsel %vm1752_vm9, %v5349_v57, %v5351_v5 }
 0x668   : > { %2522 = vrot.lane.b32.xlu1 %v5485_v45, %s8134_s7  ;;  %2524 = vrot.lane.b32.xlu0 %v5487_v49, %s8134_s7  ;;  %v1792_v57 = vsel %vm1781_vm12, %v5359_v58, %v5357_v3  ;;  %v5831_v29 = vmul.f32 %v1766_v25, %v1764_v4  ;;  %v5833_v55 = vmul.f32 %v1766_v25, %v1763_v53  ;;  %vm7931_vm5 = vcmp.ge.s32.totalorder %v4551_v24, 2  ;;  %s8143_s7 = smov 109  }
 0x669   : > { %v5840_v58 = vmul.f32 %v1795_v43, %v1793_v56  ;;  %v1849_v25 = vsel %vm1837_vm1, %v5373_v1, %v5375_v62  ;;  %v5856_v54 = vmul.f32 %v1795_v43, %v1792_v57  ;;  %v5858_v53 = vmul.f32 %v1822_v14, %v1820_v20 }
 0x66a   : > { %v1718_v41 = vpop.permute.xlu1 %1717  ;;  %v1720_v30 = vpop.permute.xlu0 %1719  ;;  %v1879_v43 = vsel %vm1868_vm15, %v5383_v7, %v5381_v63  ;;  %v1911_v1 = vsel %vm1899_vm7, %v5389_v10, %v5391_v12  ;;  %v5881_v20 = vmul.f32 %v1851_v37, %v1849_v25  ;;  %v5883_v3 = vmul.f32 %v1851_v37, %v1848_v36 }
 0x66b   : > { %v5825_v44 = vsel %vm1721_vm3, %v1718_v41, %v1720_v30  ;;  %v1723_v5 = vsel %vm1721_vm3, %v1720_v30, %v1718_v41  ;;  %v1819_v30 = vsel %vm1808_vm2, %v5367_v13, %v5365_v59  ;;  %v1880_v59 = vsel %vm1868_vm15, %v5381_v63, %v5383_v7 }
 0x66c   : > { %2548 = vrot.lane.b32.xlu1 %v5485_v45, %s8135_s22  ;;  %2550 = vrot.lane.b32.xlu0 %v5487_v49, %s8135_s22  ;;  %v1692_v13 = vstv %s5766_s21  ;;  %v1824_v57 = vmul.f32 %v1822_v14, %v1819_v30  ;;  %v5892_v63 = vmul.f32 %v1882_v9, %v1880_v59  ;;  %v1910_v7 = vsel %vm1899_vm7, %v5391_v12, %v5389_v10  ;;  %s8140_s21 = smov 110   ;;  %s8150_s22 = smov 99  }
 0x66d   : > { %v1942_v37 = vsel %vm7927_vm10, %v5397_v40, %v5399_v16  ;;  %v1693_v14 = vmul.f32 %v1692_v13, %v1690_v60  ;;  %v5902_v30 = vmul.f32 %v1882_v9, %v1879_v43  ;;  %v8137_v36 = vstv %s5723_s24  ;;  %s5941_s24 = sld [smem:[#allocation9 + $0x6]] }
 0x66e   : > { %v1749_v4 = vpop.permute.xlu1 %1748  ;;  %v1751_v56 = vpop.permute.xlu0 %1750  ;;  %v5906_v25 = vmul.f32 %v8137_v36, %v1911_v1  ;;  %v1725_v59 = vstv %s5813_s14  ;;  %v1694_v10 = vmul.f32 %v1692_v13, %v5778_v42  ;;  %v8138_v60 = vmov %v8137_v36  ;;  %s5980_s14 = sld [smem:[#allocation9 + $0x7]] }
 0x66f   : > { %v1753_v62 = vsel %vm1752_vm9, %v1749_v4, %v1751_v56  ;;  %v1754_v41 = vsel %vm1752_vm9, %v1751_v56, %v1749_v4  ;;  %v5922_v43 = vmul.f32 %v8138_v60, %v1910_v7  ;;  %v5928_v1 = vsel %vm7927_vm10, %v5399_v16, %v5397_v40 }
 0x670   : > { %2574 = vrot.lane.b32.xlu1 %v5485_v45, %s8136_s26  ;;  %2576 = vrot.lane.b32.xlu0 %v5487_v49, %s8136_s26  ;;  %v8139_v42 = vstv %s5729_s13  ;;  %v1705_v36 = vadd.f32 %v1703_v8, %v1693_v14  ;;  %v1726_v7 = vmul.f32 %v1725_v59, %v1723_v5  ;;  %v1756_v16 = vstv %s5865_s20  ;;  %s6054_s20 = sld [smem:[#allocation9 + $0x3c]]  ;;  %s6070_s26 = sld [smem:[#allocation9 + $0x9]] }
 0x671   : > { %v5932_v13 = vmul.f32 %v8139_v42, %v1942_v37  ;;  %vm7934_vm3 = vcmp.lt.s32.totalorder %v4548_v21, 14  ;;  %v1706_v5 = vadd.f32 %v5805_v46, %v1694_v10  ;;  %v1841_v37 = vstv %s5890_s11  ;;  %s6113_s11 = sld [smem:[#allocation9 + $0xa]] }
 0x672   : > { %v1778_v4 = vpop.permute.xlu1 %1777  ;;  %v1780_v56 = vpop.permute.xlu0 %1779  ;;  %vm1857_vm9 = vcmp.lt.s32.totalorder %v4551_v24, 14  ;;  %v1713_v46 = vsel %vm5947_vm0, %v1705_v36, 0.0  ;;  %vm7933_vm10 = vcmp.lt.s32.totalorder %v4548_v21, 13  ;;  %vm5986_vm0 = vmand %vm7929_vm8, %vm1709_vm6  ;;  %v1757_v10 = vmul.f32 %v1756_v16, %v1754_v41 }
 0x673   : > { %v5914_v12 = vsel %vm1781_vm12, %v1778_v4, %v1780_v56  ;;  %v5918_v9 = vsel %vm1781_vm12, %v1780_v56, %v1778_v4  ;;  %v1812_v4 = vstv %s5854_s29  ;;  %v1727_v56 = vmul.f32 %v1725_v59, %v5825_v44  ;;  %s6022_s29 = sld [smem:[#allocation9 + $0x8]] }
 0x674   : > { %2600 = vrot.lane.b32.xlu1 %v5485_v45, %s8140_s21  ;;  %2602 = vrot.lane.b32.xlu0 %v5487_v49, %s8140_s21  ;;  %v1738_v44 = vadd.f32 %v5807_v39, %v1726_v7  ;;  %vm8144_vm12 = vcmp.lt.s32.totalorder %v4548_v21, 15  ;;  %v1758_v36 = vmul.f32 %v1756_v16, %v1753_v62  ;;  %vm8149_vm8 = vcmp.lt.s32.totalorder %v4551_v24, 15  ;;  %s6142_s21 = sld [smem:[#allocation9 + $0x3e]] }
 0x676   : > { %v1805_v8 = vpop.permute.xlu1 %1804  ;;  %v1807_v14 = vpop.permute.xlu0 %1806  ;;  %v1770_v59 = vadd.f32 %v5833_v55, %v1758_v36  ;;  %v8156_v55 = vstv %s5867_s10  ;;  %s6098_s10 = sld [smem:[#allocation9 + $0x3d]] }
 0x677   : > { %v1809_v60 = vsel %vm1808_vm2, %v1805_v8, %v1807_v14  ;;  %v1810_v42 = vsel %vm1808_vm2, %v1807_v14, %v1805_v8  ;;  %vm5974_vm2 = vmand %vm8144_vm12, %vm1709_vm6  ;;  %vm1959_vm12 = vcmp.lt.s32.totalorder %v4542_v19, 33  ;;  %v1714_v14 = vsel %vm7932_vm11, %v1706_v5, 0.0 }
 0x678   : > { %v1813_v52 = vmul.f32 %v1812_v4, %v1810_v42  ;;  %v1814_v61 = vmul.f32 %v1812_v4, %v1809_v60  ;;  %2629 = vrot.lane.b32.xlu1 %v5485_v45, %s8143_s7  ;;  %2631 = vrot.lane.b32.xlu0 %v5487_v49, %s8143_s7  ;;  %v1739_v60 = vadd.f32 %v5829_v23, %v1727_v56  ;;  %v1744_v23 = vsel %vm5986_vm0, %v1738_v44, 0.0  ;;  %s6186_s7 = sld [smem:[#allocation9 + $0x3f]] }
 0x679   : > { %v1872_v5 = vstv %s5941_s24  ;;  %v1769_v56 = vadd.f32 %v5831_v29, %v1757_v10  ;;  %v1786_v29 = vmul.f32 %v8156_v55, %v5918_v9  ;;  %vm1988_vm0 = vcmp.lt.s32.totalorder %v4542_v19, 32  ;;  %s6157_s24 = sld [smem:[#allocation9 + $0xb]] }
 0x67a   : > { %v1825_v7 = vadd.f32 %v5858_v53, %v1813_v52  ;;  %v1826_v4 = vadd.f32 %v1824_v57, %v1814_v61  ;;  %v1834_v40 = vpop.permute.xlu1 %1833  ;;  %v1836_v8 = vpop.permute.xlu0 %1835 }
 0x67b   : > { %v1838_v42 = vsel %vm1837_vm1, %v1834_v40, %v1836_v8  ;;  %v1839_v41 = vsel %vm1837_vm1, %v1836_v8, %v1834_v40  ;;  %vm6017_vm1 = vmand %vm7934_vm3, %vm1709_vm6 }
 0x67c   : > { %v1829_v52 = vsel %vm5974_vm2, %v1825_v7, 0.0  ;;  %v1830_v61 = vsel %vm8149_vm8, %v1826_v4, 0.0  ;;  %v1842_v53 = vmul.f32 %v1841_v37, %v1839_v41  ;;  %v1843_v62 = vmul.f32 %v1841_v37, %v1838_v42  ;;  %2658 = vrot.lane.b32.xlu1 %v5485_v45, %s8150_s22  ;;  %2660 = vrot.lane.b32.xlu0 %v5487_v49, %s8150_s22  ;;  %s6231_s22 = sld [smem:[#allocation9 + $0x40]] }
 0x67d   : > { %v6009_v57 = vadd.f32 %v1829_v52, %v1713_v46  ;;  %v6011_v16 = vadd.f32 %v1830_v61, %v1714_v14  ;;  %v1745_v4 = vsel %vm7931_vm5, %v1739_v60, 0.0  ;;  %vm8153_vm8 = vcmp.ge.s32.totalorder %v4548_v21, 1 }
 0x67e   : > { %v1854_v46 = vadd.f32 %v5881_v20, %v1842_v53  ;;  %v1855_v44 = vadd.f32 %v5883_v3, %v1843_v62  ;;  %v1865_v39 = vpop.permute.xlu1 %1864  ;;  %v1867_v7 = vpop.permute.xlu0 %1866  ;;  %vm6034_vm2 = vmand %vm8153_vm8, %vm1709_vm6  ;;  %v1903_v41 = vstv %s5980_s14  ;;  %vm8159_vm8 = vcmp.ge.s32.totalorder %v4551_v24, 1  ;;  %s6203_s14 = sld [smem:[#allocation9 + $0xc]] }
 0x67f   : > { %v1869_v3 = vsel %vm1868_vm15, %v1865_v39, %v1867_v7  ;;  %v1870_v20 = vsel %vm1868_vm15, %v1867_v7, %v1865_v39  ;;  %vm6064_vm15 = vmand %vm7933_vm10, %vm1709_vm6  ;;  %v1773_v52 = vsel %vm6034_vm2, %v1769_v56, 0.0  ;;  %v1774_v61 = vsel %vm8159_vm8, %v1770_v59, 0.0 }
 0x680   : > { %v1860_v10 = vsel %vm6017_vm1, %v1854_v46, 0.0  ;;  %v1861_v36 = vsel %vm1857_vm9, %v1855_v44, 0.0  ;;  %v1873_v8 = vmul.f32 %v1872_v5, %v1870_v20  ;;  %v1874_v14 = vmul.f32 %v1872_v5, %v1869_v3  ;;  %2689 = vrot.lane.b32.xlu1 %v5485_v45, %s4251_s23  ;;  %2691 = vrot.lane.b32.xlu0 %v5487_v49, %s4251_s23  ;;  %s8161_s23 = smov 97  }
 0x681   : > { %v6056_v9 = vadd.f32 %v1860_v10, %v1744_v23  ;;  %v6058_v60 = vadd.f32 %v1861_v36, %v1745_v4  ;;  %vm1918_vm1 = vcmp.ge.s32.totalorder %v4542_v19, 32  ;;  %v8160_v5 = vmov %v8156_v55 }
 0x682   : > { %v1885_v53 = vadd.f32 %v5892_v63, %v1873_v8  ;;  %v1886_v62 = vadd.f32 %v5902_v30, %v1874_v14  ;;  %v1896_v23 = vpop.permute.xlu1 %1895  ;;  %v1898_v37 = vpop.permute.xlu0 %1897  ;;  %v1787_v46 = vmul.f32 %v8160_v5, %v5914_v12  ;;  %v1798_v44 = vadd.f32 %v5840_v58, %v1786_v29 }
 0x683   : > { %v1900_v39 = vsel %vm1899_vm7, %v1896_v23, %v1898_v37  ;;  %v1901_v56 = vsel %vm1899_vm7, %v1898_v37, %v1896_v23  ;;  %vm2015_vm2 = vcmp.lt.s32.totalorder %v4542_v19, 31  ;;  %v8162_v58 = vstv %s5729_s13  ;;  %s8168_s13 = smov 96  }
 0x684   : > { %v1891_v63 = vsel %vm6064_vm15, %v1885_v53, 0.0  ;;  %v1892_v30 = vsel %vm7930_vm14, %v1886_v62, 0.0  ;;  %v1904_v59 = vmul.f32 %v1903_v41, %v1901_v56  ;;  %v1905_v7 = vmul.f32 %v1903_v41, %v1900_v39  ;;  %2718 = vrot.lane.b32.xlu1 %v5485_v45, %s8161_s23  ;;  %2720 = vrot.lane.b32.xlu0 %v5487_v49, %s8161_s23  ;;  %s6279_s23 = sld [smem:[#allocation9 + $0xe]] }
 0x685   : > { %v1946_v12 = vmul.f32 %v8162_v58, %v5928_v1  ;;  %v6100_v4 = vadd.f32 %v1891_v63, %v1773_v52  ;;  %v6102_v40 = vadd.f32 %v1892_v30, %v1774_v61  ;;  %vm8163_vm7 = vcmp.ge.s32.totalorder %v4548_v21, 3 }
 0x686   : > { %vm6108_vm15 = vmand %vm8163_vm7, %vm1918_vm1  ;;  %v1934_v29 = vstv %s6022_s29  ;;  %v1970_v1 = vsel %vm1959_vm12, %v5407_v27, %v5405_v15  ;;  %v1971_v3 = vsel %vm1959_vm12, %v5405_v15, %v5407_v27  ;;  %v1916_v20 = vadd.f32 %v5906_v25, %v1904_v59  ;;  %v1927_v36 = vpop.permute.xlu1 %1926  ;;  %v1929_v8 = vpop.permute.xlu0 %1928  ;;  %s6240_s29 = sld [smem:[#allocation9 + $0xd]] }
 0x687   : > { %v1917_v10 = vadd.f32 %v5922_v43, %v1905_v7  ;;  %v1799_v14 = vadd.f32 %v5856_v54, %v1787_v46  ;;  %v1800_v42 = vsel %vm1709_vm6, %v1798_v44, 0.0  ;;  %vm8166_vm8 = vcmp.lt.s32.totalorder %v4542_v19, 34 }
 0x688   : > { %v1931_v41 = vsel %vm8166_vm8, %v1927_v36, %v1929_v8  ;;  %vm8167_vm7 = vmmov %vm8166_vm8  ;;  %vm2044_vm14 = vcmp.lt.s32.totalorder %v4542_v19, 30  ;;  %v1922_v27 = vsel %vm6108_vm15, %v1916_v20, 0.0  ;;  %2747 = vrot.lane.b32.xlu1 %v5485_v45, %s8168_s13  ;;  %2749 = vrot.lane.b32.xlu0 %v5487_v49, %s8168_s13  ;;  %v2029_v52 = vstv %s6054_s20  ;;  %s8182_s20 = smov 93   ;;  %s6319_s13 = sld [smem:[#allocation9 + $0xf]] }
 0x689   : > { %v1932_v15 = vsel %vm8167_vm7, %v1929_v8, %v1927_v36  ;;  %v1923_v54 = vsel %vm7932_vm11, %v1917_v10, 0.0  ;;  %v1936_v43 = vmul.f32 %v1934_v29, %v1931_v41  ;;  %v6144_v61 = vadd.f32 %v1922_v27, %v1800_v42 }
 0x68a   : > { %v1935_v25 = vmul.f32 %v1934_v29, %v1932_v15  ;;  %v6146_v53 = vadd.f32 %v1923_v54, %v1799_v14  ;;  %vm8169_vm6 = vcmp.ge.s32.totalorder %v4548_v21, 2  ;;  %v1963_v23 = vstv %s6070_s26  ;;  %v1956_v63 = vpop.permute.xlu1 %1955  ;;  %v1958_v30 = vpop.permute.xlu0 %1957  ;;  %s6265_s26 = sld [smem:[#allocation9 + $0x41]] }
 0x68b   : > { %vm6152_vm15 = vmand %vm8169_vm6, %vm1918_vm1  ;;  %v8172_v37 = vstv %s5747_s18  ;;  %v1948_v56 = vadd.f32 %v1946_v12, %v1936_v43  ;;  %v1999_v59 = vsel %vm1988_vm0, %v5421_v34, %v5419_v32  ;;  %v2000_v7 = vsel %vm1988_vm0, %v5419_v32, %v5421_v34  ;;  %s8174_s18 = smov 95  }
 0x68c   : > { %v1974_v5 = vmul.f32 %v8172_v37, %v1971_v3  ;;  %v8173_v46 = vmov %v8172_v37  ;;  %v1947_v39 = vadd.f32 %v5932_v13, %v1935_v25  ;;  %v1960_v58 = vsel %vm1959_vm12, %v1956_v63, %v1958_v30  ;;  %2774 = vrot.lane.b32.xlu1 %v5485_v45, %s8174_s18  ;;  %2776 = vrot.lane.b32.xlu0 %v5487_v49, %s8174_s18  ;;  %s6359_s18 = sld [smem:[#allocation9 + $0x10]] }
 0x68d   : > { %v1975_v44 = vmul.f32 %v8173_v46, %v1970_v1  ;;  %v1961_v13 = vsel %vm1959_vm12, %v1958_v30, %v1956_v63  ;;  %vm2073_vm8 = vcmp.lt.s32.totalorder %v4542_v19, 29  ;;  %v1952_v55 = vsel %vm7931_vm5, %v1948_v56, 0.0 }
 0x68e   : > { %v1951_v12 = vsel %vm6152_vm15, %v1947_v39, 0.0  ;;  %v1964_v29 = vmul.f32 %v1963_v23, %v1961_v13  ;;  %v1965_v1 = vmul.f32 %v1963_v23, %v1960_v58  ;;  %v2058_v32 = vstv %s6098_s10  ;;  %v1987_v15 = vpop.permute.xlu0 %1986  ;;  %s8187_s10 = smov 83  }
 0x68f   : > { %v6189_v34 = vadd.f32 %v1951_v12, %v6009_v57  ;;  %v6192_v3 = vadd.f32 %v1952_v55, %v6011_v16  ;;  %vm8175_vm12 = vcmp.ge.s32.totalorder %v4548_v21, 1  ;;  %v1992_v10 = vstv %s6113_s11  ;;  %v1985_v16 = vpop.permute.xlu1 %1984  ;;  %s6302_s11 = sld [smem:[#allocation9 + $0x42]] }
 0x690   : > { %vm6198_vm7 = vmand %vm8175_vm12, %vm1918_vm1  ;;  %v8178_v36 = vstv %s5786_s12  ;;  %v1976_v57 = vadd.f32 %v1974_v5, %v1964_v29  ;;  %v1977_v41 = vadd.f32 %v1975_v44, %v1965_v1  ;;  %v2026_v27 = vsel %vm2015_vm2, %v5431_v0, %v5429_v38  ;;  %s8181_s12 = smov 94  }
 0x691   : > { %v2003_v8 = vmul.f32 %v8178_v36, %v2000_v7  ;;  %v8179_v14 = vmov %v8178_v36  ;;  %v2027_v54 = vsel %vm2015_vm2, %v5429_v38, %v5431_v0  ;;  %v1989_v25 = vsel %vm1988_vm0, %v1985_v16, %v1987_v15  ;;  %2803 = vrot.lane.b32.xlu1 %v5485_v45, %s8181_s12  ;;  %2805 = vrot.lane.b32.xlu0 %v5487_v49, %s8181_s12  ;;  %s6399_s12 = sld [smem:[#allocation9 + $0x11]] }
 0x692   : > { %v2004_v42 = vmul.f32 %v8179_v14, %v1999_v59  ;;  %v1990_v43 = vsel %vm1988_vm0, %v1987_v15, %v1985_v16  ;;  %vm2102_vm6 = vcmp.lt.s32.totalorder %v4542_v19, 19  ;;  %v1980_v62 = vsel %vm6198_vm7, %v1976_v57, 0.0  ;;  %v2014_v7 = vpop.permute.xlu0 %2013 }
 0x693   : > { %vm8180_vm15 = vcmp.ge.s32.totalorder %v4551_v24, 1  ;;  %v1993_v37 = vmul.f32 %v1992_v10, %v1990_v43  ;;  %v1994_v5 = vmul.f32 %v1992_v10, %v1989_v25  ;;  %v2087_v38 = vstv %s6142_s21  ;;  %v2012_v59 = vpop.permute.xlu1 %2011  ;;  %s8190_s21 = smov 82  }
 0x694   : > { %v1981_v23 = vsel %vm8180_vm15, %v1977_v41, 0.0  ;;  %v6234_v0 = vadd.f32 %v1980_v62, %v6056_v9  ;;  %v2019_v44 = vstv %s6157_s24  ;;  %v2030_v39 = vmul.f32 %v2029_v52, %v2027_v54  ;;  %s6342_s24 = sld [smem:[#allocation9 + $0x43]] }
 0x695   : > { %v6237_v46 = vadd.f32 %v1981_v23, %v6058_v60  ;;  %v2031_v56 = vmul.f32 %v2029_v52, %v2026_v27  ;;  %v2005_v63 = vadd.f32 %v2003_v8, %v1993_v37  ;;  %v2006_v30 = vadd.f32 %v2004_v42, %v1994_v5  ;;  %2832 = vrot.lane.b32.xlu1 %v5485_v45, %s8182_s20 }
 0x696   : > { %v2055_v9 = vsel %vm2044_vm14, %v5439_v6, %v5437_v31  ;;  %v2056_v60 = vsel %vm2044_vm14, %v5437_v31, %v5439_v6  ;;  %v2016_v58 = vsel %vm2015_vm2, %v2012_v59, %v2014_v7  ;;  %v2017_v52 = vsel %vm2015_vm2, %v2014_v7, %v2012_v59  ;;  %2834 = vrot.lane.b32.xlu0 %v5487_v49, %s8182_s20  ;;  %v2043_v42 = vpop.permute.xlu0 %2042  ;;  %s6440_s20 = sld [smem:[#allocation9 + $0x12]] }
 0x697   : > { %v2007_v13 = vsel %vm1918_vm1, %v2005_v63, 0.0  ;;  %v6257_v12 = vadd.f32 %v2006_v30, %v6102_v40  ;;  %v2020_v55 = vmul.f32 %v2019_v44, %v2017_v52  ;;  %v2021_v29 = vmul.f32 %v2019_v44, %v2016_v58  ;;  %v2041_v14 = vpop.permute.xlu1 %2040 }
 0x698   : > { %v2116_v31 = vstv %s6186_s7  ;;  %vm2131_vm0 = vcmp.lt.s32.totalorder %v4542_v19, 18  ;;  %v6268_v6 = vadd.f32 %v2007_v13, %v6100_v4  ;;  %vm8183_vm2 = vcmp.lt.s32.totalorder %v4548_v21, 15  ;;  %s8194_s7 = smov 81  }
 0x699   : > { %vm6274_vm12 = vmand %vm8183_vm2, %vm1918_vm1  ;;  %v2048_v1 = vstv %s6203_s14  ;;  %v2059_v20 = vmul.f32 %v2058_v32, %v2056_v60  ;;  %v2060_v10 = vmul.f32 %v2058_v32, %v2055_v9  ;;  %v2032_v36 = vadd.f32 %v2030_v39, %v2020_v55  ;;  %2861 = vrot.lane.b32.xlu1 %v5485_v45, %s8187_s10  ;;  %s6382_s14 = sld [smem:[#allocation9 + $0x44]] }
 0x69a   : > { %v2033_v8 = vadd.f32 %v2031_v56, %v2021_v29  ;;  %v2084_v4 = vsel %vm2073_vm8, %v5447_v48, %v5445_v11  ;;  %v2085_v57 = vsel %vm2073_vm8, %v5445_v11, %v5447_v48  ;;  %v2045_v41 = vsel %vm2044_vm14, %v2041_v14, %v2043_v42  ;;  %2863 = vrot.lane.b32.xlu0 %v5487_v49, %s8187_s10  ;;  %v2072_v39 = vpop.permute.xlu0 %2071  ;;  %s6475_s10 = sld [smem:[#allocation9 + $0x13]] }
 0x69b   : > { %v2046_v32 = vsel %vm2044_vm14, %v2043_v42, %v2041_v14  ;;  %v2036_v16 = vsel %vm6274_vm12, %v2032_v36, 0.0  ;;  %vm8186_vm7 = vcmp.lt.s32.totalorder %v4551_v24, 15  ;;  %v2050_v54 = vmul.f32 %v2048_v1, %v2045_v41  ;;  %vm6314_vm14 = vmand %vm7934_vm3, %vm1918_vm1  ;;  %v2070_v44 = vpop.permute.xlu1 %2069 }
 0x69c   : > { %v2037_v15 = vsel %vm8186_vm7, %v2033_v8, 0.0  ;;  %v2049_v27 = vmul.f32 %v2048_v1, %v2046_v32  ;;  %v2145_v11 = vstv %s6231_s22  ;;  %v6305_v48 = vadd.f32 %v2036_v16, %v6144_v61  ;;  %s8201_s22 = smov 80  }
 0x69d   : > { %v6308_v25 = vadd.f32 %v2037_v15, %v6146_v53  ;;  %v2077_v62 = vstv %s6240_s29  ;;  %v2088_v23 = vmul.f32 %v2087_v38, %v2085_v57  ;;  %v2089_v37 = vmul.f32 %v2087_v38, %v2084_v4  ;;  %2892 = vrot.lane.b32.xlu1 %v5485_v45, %s8190_s21  ;;  %s6423_s29 = sld [smem:[#allocation9 + $0x45]] }
 0x69e   : > { %v2061_v5 = vadd.f32 %v2059_v20, %v2049_v27  ;;  %v2062_v61 = vadd.f32 %v2060_v10, %v2050_v54  ;;  %v2113_v53 = vsel %vm2102_vm6, %v5455_v51, %v5453_v50  ;;  %v2114_v56 = vsel %vm2102_vm6, %v5453_v50, %v5455_v51  ;;  %2894 = vrot.lane.b32.xlu0 %v5487_v49, %s8190_s21  ;;  %v2101_v1 = vpop.permute.xlu0 %2100  ;;  %s4263_s21 = smov 77  }
 0x69f   : > { %v2074_v63 = vsel %vm2073_vm8, %v2070_v44, %v2072_v39  ;;  %v2075_v38 = vsel %vm2073_vm8, %v2072_v39, %v2070_v44  ;;  %v2173_v50 = vstv %s6265_s26  ;;  %vm6354_vm8 = vmand %vm7933_vm10, %vm1918_vm1  ;;  %v2106_v52 = vstv %s6279_s23  ;;  %v2099_v40 = vpop.permute.xlu1 %2098  ;;  %s6455_s26 = sld [smem:[#allocation9 + $0x46]]  ;;  %s6466_s23 = sld [smem:[#allocation9 + $0x47]] }
 0x6a0   : > { %v2065_v30 = vsel %vm6314_vm14, %v2061_v5, 0.0  ;;  %v2066_v59 = vsel %vm1857_vm9, %v2062_v61, 0.0  ;;  %v2078_v7 = vmul.f32 %v2077_v62, %v2075_v38  ;;  %v2079_v9 = vmul.f32 %v2077_v62, %v2074_v63 }
 0x6a1   : > { %v6345_v51 = vadd.f32 %v2065_v30, %v6189_v34  ;;  %v6348_v60 = vadd.f32 %v2066_v59, %v6192_v3  ;;  %v2117_v13 = vmul.f32 %v2116_v31, %v2114_v56  ;;  %v2118_v55 = vmul.f32 %v2116_v31, %v2113_v53  ;;  %2921 = vrot.lane.b32.xlu1 %v5485_v45, %s8194_s7 }
 0x6a2   : > { %v2090_v29 = vadd.f32 %v2088_v23, %v2078_v7  ;;  %v2091_v34 = vadd.f32 %v2089_v37, %v2079_v9  ;;  %v2142_v3 = vsel %vm2131_vm0, %v5463_v28, %v5461_v2  ;;  %v2143_v20 = vsel %vm2131_vm0, %v5461_v2, %v5463_v28  ;;  %2923 = vrot.lane.b32.xlu0 %v5487_v49, %s8194_s7  ;;  %v2130_v54 = vpop.permute.xlu0 %2129  ;;  %s6559_s7 = sld [smem:[#allocation9 + $0x4b]] }
 0x6a3   : > { %v2103_v10 = vsel %vm2102_vm6, %v2099_v40, %v2101_v1  ;;  %v2104_v31 = vsel %vm2102_vm6, %v2101_v1, %v2099_v40  ;;  %vm8193_vm1 = vcmp.lt.s32.totalorder %v4551_v24, 13  ;;  %v2199_v2 = vstv %s6302_s11  ;;  %v2128_v27 = vpop.permute.xlu1 %2127  ;;  %s8215_s11 = smov 78  }
 0x6a4   : > { %v2094_v36 = vsel %vm6354_vm8, %v2090_v29, 0.0  ;;  %v2095_v8 = vsel %vm8193_vm1, %v2091_v34, 0.0  ;;  %v2107_v14 = vmul.f32 %v2106_v52, %v2104_v31  ;;  %v2108_v42 = vmul.f32 %v2106_v52, %v2103_v10 }
 0x6a5   : > { %v6385_v28 = vadd.f32 %v2094_v36, %v6234_v0  ;;  %v6388_v4 = vadd.f32 %v2095_v8, %v6237_v46  ;;  %vm8195_vm6 = vcmp.ge.s32.totalorder %v4542_v19, 16  ;;  %vm8196_vm15 = vcmp.ge.s32.totalorder %v4548_v21, 3  ;;  %2950 = vrot.lane.b32.xlu1 %v5485_v45, %s8201_s22 }
 0x6a6   : > { %vm6394_vm2 = vmand %vm8196_vm15, %vm8195_vm6  ;;  %v2135_v41 = vstv %s6319_s13  ;;  %v2146_v32 = vmul.f32 %v2145_v11, %v2143_v20  ;;  %v2147_v16 = vmul.f32 %v2145_v11, %v2142_v3  ;;  %v2119_v15 = vadd.f32 %v2117_v13, %v2107_v14  ;;  %2952 = vrot.lane.b32.xlu0 %v5487_v49, %s8201_s22  ;;  %v2159_v59 = vpop.permute.xlu0 %2158  ;;  %s6508_s13 = sld [smem:[#allocation9 + $0x14]]  ;;  %s6612_s22 = sld [smem:[#allocation9 + $0x17]] }
 0x6a7   : > { %v2120_v0 = vadd.f32 %v2118_v55, %v2108_v42  ;;  %vm8199_vm12 = vcmp.lt.s32.totalorder %v4542_v19, 17  ;;  %v2132_v62 = vsel %vm2131_vm0, %v2128_v27, %v2130_v54  ;;  %v2133_v11 = vsel %vm2131_vm0, %v2130_v54, %v2128_v27  ;;  %vm8202_vm0 = vmmov %vm8195_vm6  ;;  %v2157_v30 = vpop.permute.xlu1 %2156 }
 0x6a8   : > { %v2170_v46 = vsel %vm8199_vm12, %v5471_v33, %v5469_v17  ;;  %vm8200_vm7 = vmmov %vm8199_vm12  ;;  %vm2238_vm14 = vcmp.lt.s32.totalorder %v4542_v19, 14  ;;  %v2123_v23 = vsel %vm6394_vm2, %v2119_v15, 0.0  ;;  %v2136_v5 = vmul.f32 %v2135_v41, %v2133_v11 }
 0x6a9   : > { %v2171_v43 = vsel %vm8200_vm7, %v5469_v17, %v5471_v33  ;;  %v2124_v37 = vsel %vm7932_vm11, %v2120_v0, 0.0  ;;  %v2137_v61 = vmul.f32 %v2135_v41, %v2132_v62  ;;  %v2225_v17 = vstv %s6342_s24  ;;  %vm8208_vm2 = vmmov %vm8200_vm7  ;;  %2977 = vrot.lane.b32.xlu1 %v5485_v45, %s4261_s19  ;;  %s6532_s24 = sld [smem:[#allocation9 + $0x4a]] }
 0x6aa   : > { %v6426_v33 = vadd.f32 %v2123_v23, %v6268_v6  ;;  %v6429_v44 = vadd.f32 %v2124_v37, %v6257_v12  ;;  %vm8203_vm8 = vcmp.ge.s32.totalorder %v4548_v21, 2  ;;  %v2163_v53 = vstv %s6359_s18  ;;  %vm8209_vm12 = vmmov %vm8208_vm2  ;;  %2979 = vrot.lane.b32.xlu0 %v5487_v49, %s4261_s19  ;;  %v2185_v31 = vpop.permute.xlu0 %2184  ;;  %s6490_s19 = sld [smem:[#allocation9 + $0x48]]  ;;  %s6538_s18 = sld [smem:[#allocation9 + $0x15]] }
 0x6ab   : > { %vm6435_vm1 = vmand %vm8203_vm8, %vm8202_vm0  ;;  %v2174_v56 = vmul.f32 %v2173_v50, %v2171_v43  ;;  %v2175_v63 = vmul.f32 %v2173_v50, %v2170_v46  ;;  %v2148_v38 = vadd.f32 %v2146_v32, %v2136_v5  ;;  %v2149_v6 = vadd.f32 %v2147_v16, %v2137_v61  ;;  %v2183_v10 = vpop.permute.xlu1 %2182  ;;  %v8216_v46 = vld [vmem:[#allocation32_spill] sm:$0xff]  ;;  %v8217_v43 = vld [vmem:[#allocation33_spill] sm:$0xff] }
 0x6ac   : > { %vm8206_vm6 = vcmp.lt.s32.totalorder %v4542_v19, 16  ;;  %v2160_v9 = vsel %vm8208_vm2, %v2157_v30, %v2159_v59  ;;  %v2161_v50 = vsel %vm8209_vm12, %v2159_v59, %v2157_v30  ;;  %vm2267_vm7 = vcmp.lt.s32.totalorder %v4542_v19, 13 }
 0x6ad   : > { %v2196_v12 = vsel %vm8206_vm6, %v5479_v47, %v5477_v26  ;;  %vm8207_vm15 = vmmov %vm8206_vm6  ;;  %v2152_v58 = vsel %vm6435_vm1, %v2148_v38, 0.0  ;;  %v2153_v52 = vsel %vm7931_vm5, %v2149_v6, 0.0  ;;  %v2164_v13 = vmul.f32 %v2163_v53, %v2161_v50  ;;  %3006 = vrot.lane.b32.xlu1 %v5485_v45, %s8215_s11 }
 0x6ae   : > { %v2197_v7 = vsel %vm8207_vm15, %v5477_v26, %v5479_v47  ;;  %v2165_v55 = vmul.f32 %v2163_v53, %v2160_v9  ;;  %v2252_v26 = vstv %s6382_s14  ;;  %v6469_v47 = vadd.f32 %v2152_v58, %v6305_v48  ;;  %vm8212_vm1 = vmmov %vm8206_vm6  ;;  %3008 = vrot.lane.b32.xlu0 %v5487_v49, %s8215_s11  ;;  %v2211_v54 = vpop.permute.xlu0 %2210  ;;  %s6576_s14 = sld [smem:[#allocation9 + $0x16]]  ;;  %s6726_s11 = sld [smem:[#allocation9 + $0x1c]] }
 0x6af   : > { %v6472_v29 = vadd.f32 %v2153_v52, %v6308_v25  ;;  %v2189_v34 = vstv %s6399_s12  ;;  %v2200_v40 = vmul.f32 %v2199_v2, %v2197_v7  ;;  %v2201_v1 = vmul.f32 %v2199_v2, %v2196_v12  ;;  %vm8213_vm6 = vmmov %vm8212_vm1  ;;  %v2209_v27 = vpop.permute.xlu1 %2208  ;;  %v8222_v12 = vld [vmem:[#allocation35_spill] sm:$0xff]  ;;  %s6595_s12 = sld [smem:[#allocation9 + $0x4c]] }
 0x6b0   : > { %v2176_v3 = vadd.f32 %v2174_v56, %v2164_v13  ;;  %v2177_v20 = vadd.f32 %v2175_v63, %v2165_v55  ;;  %vm8210_vm0 = vcmp.lt.s32.totalorder %v4542_v19, 15  ;;  %v2186_v36 = vsel %vm8212_vm1, %v2183_v10, %v2185_v31 }
 0x6b1   : > { %v2222_v48 = vsel %vm8210_vm0, %v5491_v18, %v5489_v22  ;;  %vm8211_vm8 = vmmov %vm8210_vm0  ;;  %v2187_v8 = vsel %vm8213_vm6, %v2185_v31, %v2183_v10  ;;  %vm2296_vm15 = vcmp.lt.s32.totalorder %v4542_v19, 3  ;;  %vm8214_vm2 = vcmp.ge.s32.totalorder %v4551_v24, 1  ;;  %3035 = vrot.lane.b32.xlu1 %v5485_v45, %s4263_s21  ;;  %v8221_v45 = vld [vmem:[#allocation34_spill] sm:$0xff] }
 0x6b2   : > { %v2223_v25 = vsel %vm8211_vm8, %v5489_v22, %v5491_v18  ;;  %v2178_v14 = vsel %vm4561_vm4, %v2176_v3, 0.0  ;;  %v2179_v42 = vsel %vm8214_vm2, %v2177_v20, 0.0  ;;  %v2190_v2 = vmul.f32 %v2189_v34, %v2187_v8  ;;  %vm8218_vm4 = vmmov %vm8210_vm0  ;;  %3037 = vrot.lane.b32.xlu0 %v5487_v49, %s4263_s21  ;;  %v2237_v59 = vpop.permute.xlu0 %2236  ;;  %v8230_v8 = vld [vmem:[#allocation36_spill] sm:$0xff] }
 0x6b3   : > { %v2191_v57 = vmul.f32 %v2189_v34, %v2186_v36  ;;  %v2281_v18 = vstv %s6423_s29  ;;  %v6502_v22 = vadd.f32 %v2178_v14, %v6345_v51  ;;  %v6505_v41 = vadd.f32 %v2179_v42, %v6348_v60  ;;  %vm8219_vm12 = vmmov %vm8210_vm0  ;;  %v2235_v30 = vpop.permute.xlu1 %2234  ;;  %v8226_v34 = vld [vmem:[#allocation31_spill] sm:$0xff]  ;;  %v8231_v14 = vld [vmem:[#allocation37_spill] sm:$0xff]  ;;  %s6632_s29 = sld [smem:[#allocation9 + $0x4d]] }
 0x6b4   : > { %v2215_v35 = vstv %s6440_s20  ;;  %v2226_v32 = vmul.f32 %v2225_v17, %v2223_v25  ;;  %v2227_v16 = vmul.f32 %v2225_v17, %v2222_v48  ;;  %v2202_v15 = vadd.f32 %v2200_v40, %v2190_v2  ;;  %s6641_s20 = sld [smem:[#allocation9 + $0x19]] }
 0x6b5   : > { %v2203_v0 = vadd.f32 %v2201_v1, %v2191_v57  ;;  %v2249_v51 = vsel %vm2238_vm14, %v8217_v43, %v8216_v46  ;;  %v2250_v60 = vsel %vm2238_vm14, %v8216_v46, %v8217_v43  ;;  %v2212_v62 = vsel %vm8218_vm4, %v2209_v27, %v2211_v54 }
 0x6b6   : > { %v2213_v11 = vsel %vm8219_vm12, %v2211_v54, %v2209_v27  ;;  %vm2323_vm0 = vcmp.lt.s32.totalorder %v4542_v19, 2  ;;  %vm8220_vm8 = vcmp.ge.s32.totalorder %v4542_v19, 16  ;;  %v2217_v61 = vmul.f32 %v2215_v35, %v2212_v62  ;;  %3048 = vrot.lane.b32.xlu0 %v8226_v34, %s4263_s21 }
 0x6b7   : > { %v2204_v23 = vsel %vm8220_vm8, %v2202_v15, 0.0  ;;  %v6526_v37 = vadd.f32 %v2203_v0, %v6388_v4  ;;  %v2216_v5 = vmul.f32 %v2215_v35, %v2213_v11  ;;  %v2310_v17 = vstv %s6455_s26  ;;  %v2264_v36 = vpop.permute.xlu1 %2263  ;;  %vm8232_vm6 = vmmov %vm8220_vm8  ;;  %s6665_s26 = sld [smem:[#allocation9 + $0x4e]] }
 0x6b8   : > { %v2337_v39 = vstv %s6466_s23  ;;  %v6535_v53 = vadd.f32 %v2204_v23, %v6385_v28  ;;  %v2242_v56 = vstv %s6475_s10  ;;  %v2253_v63 = vmul.f32 %v2252_v26, %v2250_v60  ;;  %v8235_v23 = vld [vmem:[#allocation38_spill] sm:$0xff]  ;;  %s6670_s23 = sld [smem:[#allocation9 + $0x1a]]  ;;  %s6698_s10 = sld [smem:[#allocation9 + $0x1b]] }
 0x6b9   : > { %v2254_v4 = vmul.f32 %v2252_v26, %v2249_v51  ;;  %v2228_v38 = vadd.f32 %v2226_v32, %v2216_v5  ;;  %v2229_v6 = vadd.f32 %v2227_v16, %v2217_v61  ;;  %v2278_v49 = vsel %vm2267_vm7, %v8222_v12, %v8221_v45  ;;  %v8225_v26 = vld [vmem:[#allocation30_spill] sm:$0xff]  ;;  %v8236_v5 = vld [vmem:[#allocation39_spill] sm:$0xff] }
 0x6ba   : > { %v2279_v28 = vsel %vm2267_vm7, %v8221_v45, %v8222_v12  ;;  %v2239_v7 = vsel %vm2238_vm14, %v2235_v30, %v2237_v59  ;;  %v2240_v9 = vsel %vm2238_vm14, %v2237_v59, %v2235_v30  ;;  %vm8224_vm1 = vcmp.lt.s32.totalorder %v4551_v24, 15  ;;  %3046 = vrot.lane.b32.xlu1 %v8225_v26, %s4263_s21  ;;  %s6780_s21 = sld [smem:[#allocation9 + $0x50]] }
 0x6bb   : > { %v2230_v58 = vsel %vm4651_vm13, %v2228_v38, 0.0  ;;  %v2231_v52 = vsel %vm8224_vm1, %v2229_v6, 0.0  ;;  %v2243_v13 = vmul.f32 %v2242_v56, %v2240_v9  ;;  %v2244_v55 = vmul.f32 %v2242_v56, %v2239_v7  ;;  %vm8227_vm13 = vmmov %vm8220_vm8  ;;  %v2293_v11 = vpop.permute.xlu1 %2292 }
 0x6bc   : > { %v2363_v40 = vstv %s6490_s19  ;;  %v6562_v1 = vadd.f32 %v2230_v58, %v6426_v33  ;;  %v6565_v3 = vadd.f32 %v2231_v52, %v6429_v44  ;;  %vm6571_vm14 = vmand %vm7934_vm3, %vm8227_vm13  ;;  %v2271_v10 = vstv %s6508_s13  ;;  %v2266_v44 = vpop.permute.xlu0 %2265  ;;  %s6721_s19 = sld [smem:[#allocation9 + $0x4f]]  ;;  %s6755_s13 = sld [smem:[#allocation9 + $0x1d]] }
 0x6bd   : > { %v2282_v31 = vmul.f32 %v2281_v18, %v2279_v28  ;;  %v2283_v48 = vmul.f32 %v2281_v18, %v2278_v49  ;;  %v2255_v25 = vadd.f32 %v2253_v63, %v2243_v13  ;;  %v2256_v33 = vadd.f32 %v2254_v4, %v2244_v55  ;;  %v8238_v13 = vld [vmem:[#allocation40_spill] sm:$0xff]  ;;  %v8239_v55 = vld [vmem:[#allocation41_spill] sm:$0xff] }
 0x6be   : > { %v2307_v42 = vsel %vm2296_vm15, %v8231_v14, %v8230_v8  ;;  %v2308_v2 = vsel %vm2296_vm15, %v8230_v8, %v8231_v14  ;;  %v2268_v57 = vsel %vm2267_vm7, %v2264_v36, %v2266_v44  ;;  %v2269_v18 = vsel %vm2267_vm7, %v2266_v44, %v2264_v36  ;;  %vm6607_vm7 = vmand %vm7933_vm10, %vm8232_vm6 }
 0x6bf   : > { %v2259_v35 = vsel %vm6571_vm14, %v2255_v25, 0.0  ;;  %v2260_v32 = vsel %vm1857_vm9, %v2256_v33, 0.0  ;;  %v2272_v16 = vmul.f32 %v2271_v10, %v2269_v18  ;;  %v2273_v15 = vmul.f32 %v2271_v10, %v2268_v57  ;;  %v2320_v58 = vpop.permute.xlu1 %2319  ;;  %v8243_v18 = vld [vmem:[#allocation42_spill] sm:$0xff] }
 0x6c0   : > { %v2401_v0 = vstv %s6532_s24  ;;  %v6598_v27 = vadd.f32 %v2259_v35, %v6469_v47  ;;  %v6601_v54 = vadd.f32 %v2260_v32, %v6472_v29  ;;  %v2300_v43 = vstv %s6538_s18  ;;  %v2295_v29 = vpop.permute.xlu0 %2294  ;;  %v8244_v35 = vld [vmem:[#allocation43_spill] sm:$0xff]  ;;  %s6787_s24 = sld [smem:[#allocation9 + $0x1e]]  ;;  %s6818_s18 = sld [smem:[#allocation9 + $0x1f]] }
 0x6c1   : > { %v2311_v51 = vmul.f32 %v2310_v17, %v2308_v2  ;;  %v2312_v60 = vmul.f32 %v2310_v17, %v2307_v42  ;;  %v2284_v62 = vadd.f32 %v2282_v31, %v2272_v16  ;;  %v2285_v47 = vadd.f32 %v2283_v48, %v2273_v15 }
 0x6c2   : > { %v2334_v61 = vsel %vm2323_vm0, %v8236_v5, %v8235_v23  ;;  %v2335_v56 = vsel %vm2323_vm0, %v8235_v23, %v8236_v5  ;;  %v2297_v17 = vsel %vm2296_vm15, %v2293_v11, %v2295_v29  ;;  %v2298_v63 = vsel %vm2296_vm15, %v2295_v29, %v2293_v11 }
 0x6c3   : > { %vm2414_vm2 = vcmp.lt.s32.totalorder %v4542_v19, 126  ;;  %v2288_v4 = vsel %vm6607_vm7, %v2284_v62, 0.0  ;;  %vm8237_vm4 = vcmp.lt.s32.totalorder %v4551_v24, 13  ;;  %v2301_v6 = vmul.f32 %v2300_v43, %v2298_v63  ;;  %v2347_v2 = vpop.permute.xlu1 %2346  ;;  %v8251_v63 = vld [vmem:[#allocation45_spill] sm:$0xff] }
 0x6c4   : > { %v2289_v38 = vsel %vm8237_vm4, %v2285_v47, 0.0  ;;  %v2302_v30 = vmul.f32 %v2300_v43, %v2297_v17  ;;  %v2428_v59 = vstv %s6559_s7  ;;  %v6635_v45 = vadd.f32 %v2288_v4, %v6502_v22  ;;  %v2322_v52 = vpop.permute.xlu0 %2321  ;;  %v8250_v17 = vld [vmem:[#allocation44_spill] sm:$0xff]  ;;  %s6877_s7 = sld [smem:[#allocation9 + $0x51]] }
 0x6c5   : > { %v6638_v12 = vadd.f32 %v2289_v38, %v6505_v41  ;;  %v2327_v49 = vstv %s6576_s14  ;;  %v2338_v28 = vmul.f32 %v2337_v39, %v2335_v56  ;;  %v2339_v7 = vmul.f32 %v2337_v39, %v2334_v61  ;;  %s6879_s14 = sld [smem:[#allocation9 + $0x52]] }
 0x6c6   : > { %v2313_v9 = vadd.f32 %v2311_v51, %v2301_v6  ;;  %v2314_v50 = vadd.f32 %v2312_v60, %v2302_v30  ;;  %vm8240_vm15 = vcmp.lt.s32.totalorder %v4542_v19, 1  ;;  %vm2441_vm8 = vcmp.lt.s32.totalorder %v4542_v19, 125 }
 0x6c7   : > { %v2360_v22 = vsel %vm8240_vm15, %v8239_v55, %v8238_v13  ;;  %vm8241_vm12 = vmmov %vm8240_vm15  ;;  %v2324_v39 = vsel %vm2323_vm0, %v2320_v58, %v2322_v52  ;;  %v2325_v26 = vsel %vm2323_vm0, %v2322_v52, %v2320_v58  ;;  %vm8242_vm1 = vcmp.ge.s32.totalorder %v4548_v21, 3  ;;  %v2385_v61 = vpop.permute.xlu1 %2384  ;;  %v8256_v52 = vld [vmem:[#allocation46_spill] sm:$0xff] }
 0x6c8   : > { %v2361_v41 = vsel %vm8241_vm12, %v8238_v13, %v8239_v55  ;;  %v2315_v34 = vsel %vm8242_vm1, %v2313_v9, 0.0  ;;  %v2316_v20 = vsel %vm7932_vm11, %v2314_v50, 0.0  ;;  %v2328_v10 = vmul.f32 %v2327_v49, %v2325_v26  ;;  %v2349_v57 = vpop.permute.xlu0 %2348  ;;  %vm8247_vm6 = vmmov %vm8241_vm12  ;;  %v8257_v13 = vld [vmem:[#allocation47_spill] sm:$0xff] }
 0x6c9   : > { %v2329_v31 = vmul.f32 %v2327_v49, %v2324_v39  ;;  %v2455_v48 = vstv %s6595_s12  ;;  %v2317_v25 = vadd.f32 %v2315_v34, %v6535_v53  ;;  %v2318_v33 = vadd.f32 %v2316_v20, %v6526_v37  ;;  %vm8248_vm7 = vmmov %vm8247_vm6  ;;  %s6881_s12 = sld [smem:[#allocation9 + $0x53]] }
 0x6ca   : > { %v2353_v36 = vstv %s6612_s22  ;;  %v2364_v44 = vmul.f32 %v2363_v40, %v2361_v41  ;;  %v2365_v8 = vmul.f32 %v2363_v40, %v2360_v22  ;;  %v2340_v14 = vadd.f32 %v2338_v28, %v2328_v10  ;;  %s6883_s22 = sld [smem:[#allocation9 + $0x54]] }
 0x6cb   : > { %v2341_v42 = vadd.f32 %v2339_v7, %v2329_v31  ;;  %vm8245_vm0 = vcmp.lt.s32.totalorder %v4542_v19, 127  ;;  %vm2468_vm14 = vcmp.lt.s32.totalorder %v4542_v19, 115  ;;  %v2350_v40 = vsel %vm8247_vm6, %v2347_v2, %v2349_v57  ;;  %v2411_v39 = vpop.permute.xlu1 %2410 }
 0x6cc   : > { %v2398_v53 = vsel %vm8245_vm0, %v8244_v35, %v8243_v18  ;;  %vm8246_vm13 = vmmov %vm8245_vm0  ;;  %v2351_v32 = vsel %vm8248_vm7, %v2349_v57, %v2347_v2  ;;  %vm2497_vm4 = vcmp.lt.s32.totalorder %v4542_v19, 114  ;;  %vm8249_vm15 = vcmp.ge.s32.totalorder %v4548_v21, 2  ;;  %v2387_v56 = vpop.permute.xlu0 %2386  ;;  %v8260_v57 = vld [vmem:[#allocation48_spill] sm:$0xff] }
 0x6cd   : > { %v2399_v37 = vsel %vm8246_vm13, %v8243_v18, %v8244_v35  ;;  %v2342_v16 = vsel %vm8249_vm15, %v2340_v14, 0.0  ;;  %v2343_v15 = vsel %vm7931_vm5, %v2341_v42, 0.0  ;;  %v2354_v46 = vmul.f32 %v2353_v36, %v2351_v32  ;;  %vm8252_vm12 = vmmov %vm8245_vm0  ;;  %v8261_v18 = vld [vmem:[#allocation49_spill] sm:$0xff]  ;;  %v8262_v32 = vld [vmem:[#allocation50_spill] sm:$0xff] }
 0x6ce   : > { %v2355_v43 = vmul.f32 %v2353_v36, %v2350_v40  ;;  %v2482_v51 = vstv %s6632_s29  ;;  %v2344_v60 = vadd.f32 %v2342_v16, %v6562_v1  ;;  %v2345_v62 = vadd.f32 %v2343_v15, %v6565_v3  ;;  %vm8253_vm1 = vmmov %vm8245_vm0  ;;  %v8263_v16 = vld [vmem:[#allocation51_spill] sm:$0xff]  ;;  %s6889_s29 = sld [smem:[#allocation9 + $0x55]] }
 0x6cf   : > { %v2391_v47 = vstv %s6641_s20  ;;  %v2402_v11 = vmul.f32 %v2401_v0, %v2398_v53  ;;  %v2403_v29 = vmul.f32 %v2401_v0, %v2399_v37  ;;  %v2366_v23 = vadd.f32 %v2364_v44, %v2354_v46  ;;  %v2438_v40 = vpop.permute.xlu1 %2437  ;;  %s6891_s20 = sld [smem:[#allocation9 + $0x56]] }
 0x6d0   : > { %v2367_v5 = vadd.f32 %v2365_v8, %v2355_v43  ;;  %v2425_v1 = vsel %vm2414_vm2, %v8251_v63, %v8250_v17  ;;  %v2426_v3 = vsel %vm2414_vm2, %v8250_v17, %v8251_v63  ;;  %v2388_v4 = vsel %vm8252_vm12, %v2385_v61, %v2387_v56  ;;  %v2413_v26 = vpop.permute.xlu0 %2412 }
 0x6d1   : > { %v2389_v0 = vsel %vm8253_vm1, %v2387_v56, %v2385_v61  ;;  %vm8254_vm0 = vcmp.ge.s32.totalorder %v4548_v21, 1  ;;  %vm8255_vm13 = vcmp.ge.s32.totalorder %v4551_v24, 1  ;;  %v2392_v30 = vmul.f32 %v2391_v47, %v2388_v4 }
 0x6d2   : > { %v2368_v38 = vsel %vm8254_vm0, %v2366_v23, 0.0  ;;  %v2369_v6 = vsel %vm8255_vm13, %v2367_v5, 0.0  ;;  %v2393_v49 = vmul.f32 %v2391_v47, %v2389_v0  ;;  %v2511_v28 = vstv %s6665_s26  ;;  %s6897_s26 = sld [smem:[#allocation9 + $0x57]] }
 0x6d3   : > { %v2370_v7 = vadd.f32 %v2368_v38, %v6598_v27  ;;  %v2371_v9 = vadd.f32 %v2369_v6, %v6601_v54  ;;  %v2418_v50 = vstv %s6670_s23  ;;  %v2429_v58 = vmul.f32 %v2428_v59, %v2425_v1  ;;  %v2465_v4 = vpop.permute.xlu1 %2464  ;;  %s6899_s23 = sld [smem:[#allocation9 + $0x58]] }
 0x6d4   : > { %v2452_v55 = vsel %vm2441_vm8, %v8257_v13, %v8256_v52  ;;  %v2404_v22 = vadd.f32 %v2402_v11, %v2392_v30  ;;  %v2405_v41 = vadd.f32 %v2403_v29, %v2393_v49  ;;  %v2430_v27 = vmul.f32 %v2428_v59, %v2426_v3 }
 0x6d5   : > { %v2453_v54 = vsel %vm2441_vm8, %v8256_v52, %v8257_v13  ;;  %v2415_v34 = vsel %vm2414_vm2, %v2411_v39, %v2413_v26  ;;  %v2416_v20 = vsel %vm2414_vm2, %v2413_v26, %v2411_v39  ;;  %vm8258_vm6 = vcmp.lt.s32.totalorder %v4548_v21, 15  ;;  %v8269_v39 = vld [vmem:[#allocation52_spill] sm:$0xff]  ;;  %v8270_v26 = vld [vmem:[#allocation53_spill] sm:$0xff] }
 0x6d6   : > { %v2406_v10 = vsel %vm8258_vm6, %v2404_v22, 0.0  ;;  %vm8259_vm7 = vcmp.lt.s32.totalorder %v4551_v24, 15  ;;  %v2419_v36 = vmul.f32 %v2418_v50, %v2415_v34  ;;  %v2420_v44 = vmul.f32 %v2418_v50, %v2416_v20  ;;  %v8273_v20 = vld [vmem:[#allocation88_spill] sm:$0xff] }
 0x6d7   : > { %v2407_v31 = vsel %vm8259_vm7, %v2405_v41, 0.0  ;;  %v2456_v59 = vmul.f32 %v2455_v48, %v2452_v55  ;;  %v6750_v8 = vadd.f32 %v2406_v10, %v2317_v25  ;;  %v2445_v42 = vstv %s6698_s10  ;;  %v2440_v25 = vpop.permute.xlu0 %2439  ;;  %s6907_s10 = sld [smem:[#allocation9 + $0x59]] }
 0x6d8   : > { %v6752_v14 = vadd.f32 %v2407_v31, %v2318_v33  ;;  %v2457_v2 = vmul.f32 %v2455_v48, %v2453_v54  ;;  %v2479_v35 = vsel %vm2468_vm14, %v8261_v18, %v8260_v57  ;;  %v2431_v53 = vadd.f32 %v2429_v58, %v2419_v36  ;;  %v2494_v54 = vpop.permute.xlu1 %2493  ;;  %v8274_v31 = vld [vmem:[#allocation89_spill] sm:$0xff] }
 0x6d9   : > { %v2432_v37 = vadd.f32 %v2430_v27, %v2420_v44  ;;  %v2480_v33 = vsel %vm2468_vm14, %v8260_v57, %v8261_v18  ;;  %v2508_v48 = vsel %vm2497_vm4, %v8263_v16, %v8262_v32  ;;  %v2442_v15 = vsel %vm2441_vm8, %v2438_v40, %v2440_v25 }
 0x6da   : > { %v2443_v46 = vsel %vm2441_vm8, %v2440_v25, %v2438_v40  ;;  %v2433_v43 = vsel %vm7934_vm3, %v2431_v53, 0.0  ;;  %v2446_v11 = vmul.f32 %v2445_v42, %v2442_v15  ;;  %v2539_v23 = vstv %s6721_s19  ;;  %v8279_v15 = vld [vmem:[#allocation54_spill] sm:$0xff]  ;;  %s6909_s19 = sld [smem:[#allocation9 + $0x5a]] }
 0x6db   : > { %v2434_v47 = vsel %vm1857_vm9, %v2432_v37, 0.0  ;;  %v2447_v29 = vmul.f32 %v2445_v42, %v2443_v46  ;;  %v6782_v5 = vadd.f32 %v2433_v43, %v2344_v60  ;;  %v2472_v56 = vstv %s6726_s11  ;;  %v2467_v0 = vpop.permute.xlu0 %2466  ;;  %v8280_v46 = vld [vmem:[#allocation55_spill] sm:$0xff]  ;;  %s6915_s11 = sld [smem:[#allocation9 + $0x5b]] }
 0x6dc   : > { %v6784_v61 = vadd.f32 %v2434_v47, %v2345_v62  ;;  %v2483_v17 = vmul.f32 %v2482_v51, %v2479_v35  ;;  %v2509_v63 = vsel %vm2497_vm4, %v8262_v32, %v8263_v16  ;;  %v2458_v1 = vadd.f32 %v2456_v59, %v2446_v11  ;;  %v2523_v16 = vpop.permute.xlu1 %2522 }
 0x6dd   : > { %v2459_v3 = vadd.f32 %v2457_v2, %v2447_v29  ;;  %v2484_v60 = vmul.f32 %v2482_v51, %v2480_v33  ;;  %v2512_v38 = vmul.f32 %v2511_v28, %v2508_v48  ;;  %v2469_v62 = vsel %vm2468_vm14, %v2465_v4, %v2467_v0  ;;  %v8265_v51 = vld [vmem:[#allocation18_spill] sm:$0xff] }
 0x6de   : > { %v2470_v6 = vsel %vm2468_vm14, %v2467_v0, %v2465_v4  ;;  %v2460_v30 = vsel %vm7933_vm10, %v2458_v1, 0.0  ;;  %vm8264_vm2 = vcmp.lt.s32.totalorder %v4551_v24, 13  ;;  %v2473_v50 = vmul.f32 %v2472_v56, %v2469_v62 }
 0x6df   : > { %v2461_v49 = vsel %vm8264_vm2, %v2459_v3, 0.0  ;;  %v2474_v58 = vmul.f32 %v2472_v56, %v2470_v6  ;;  %v2513_v52 = vmul.f32 %v2511_v28, %v2509_v63  ;;  %v6805_v13 = vadd.f32 %v2460_v30, %v2370_v7  ;;  %v2496_v34 = vpop.permute.xlu0 %2495 }
 0x6e0   : > { %v6807_v55 = vadd.f32 %v2461_v49, %v2371_v9  ;;  %vm8266_vm8 = vcmp.lt.s32.totalorder %v8265_v51, 240  ;;  %v2501_v41 = vstv %s6755_s13  ;;  %vm8271_vm14 = vcmp.lt.s32.totalorder %v4542_v19, 113  ;;  %s6917_s13 = sld [smem:[#allocation9 + $0x5c]] }
 0x6e1   : > { %vm6813_vm15 = vmand %vm7932_vm11, %vm8266_vm8  ;;  %v2536_v28 = vsel %vm8271_vm14, %v8270_v26, %v8269_v39  ;;  %v2485_v9 = vadd.f32 %v2483_v17, %v2473_v50  ;;  %v2486_v27 = vadd.f32 %v2484_v60, %v2474_v58  ;;  %v2383_v10 = vadd.f32 %v8273_v20, %v6638_v12  ;;  %v8289_v50 = vld [vmem:[#allocation20_spill] sm:$0xff] }
 0x6e2   : > { %vm8272_vm12 = vmmov %vm8271_vm14  ;;  %v2382_v36 = vadd.f32 %v8274_v31, %v6635_v45  ;;  %v2498_v44 = vsel %vm2497_vm4, %v2494_v54, %v2496_v34  ;;  %v2499_v59 = vsel %vm2497_vm4, %v2496_v34, %v2494_v54  ;;  %vm8275_vm1 = vcmp.ge.s32.totalorder %v4548_v21, 3 }
 0x6e3   : > { %v2537_v7 = vsel %vm8272_vm12, %v8269_v39, %v8270_v26  ;;  %v2489_v42 = vsel %vm8275_vm1, %v2485_v9, 0.0  ;;  %v2490_v2 = vsel %vm6813_vm15, %v2486_v27, 0.0  ;;  %v2502_v57 = vmul.f32 %v2501_v41, %v2498_v44  ;;  %vm8276_vm0 = vmmov %vm8266_vm8  ;;  %v2525_v48 = vpop.permute.xlu0 %2524 }
 0x6e4   : > { %v2503_v18 = vmul.f32 %v2501_v41, %v2499_v59  ;;  %v2565_v35 = vstv %s6780_s21  ;;  %v6841_v53 = vadd.f32 %v2489_v42, %v2382_v36  ;;  %v6843_v12 = vadd.f32 %v2490_v2, %v2383_v10  ;;  %vm6849_vm13 = vmand %vm7931_vm5, %vm8276_vm0  ;;  %s6919_s21 = sld [smem:[#allocation9 + $0x5d]] }
 0x6e5   : > { %v2529_v37 = vstv %s6787_s24  ;;  %v2540_v40 = vmul.f32 %v2539_v23, %v2536_v28  ;;  %v2541_v25 = vmul.f32 %v2539_v23, %v2537_v7  ;;  %v2514_v33 = vadd.f32 %v2512_v38, %v2502_v57  ;;  %vm8283_vm7 = vmmov %vm8272_vm12  ;;  %v2549_v38 = vpop.permute.xlu1 %2548  ;;  %s6921_s24 = sld [smem:[#allocation9 + $0x5e]] }
 0x6e6   : > { %v2515_v32 = vadd.f32 %v2513_v52, %v2503_v18  ;;  %vm8281_vm4 = vcmp.lt.s32.totalorder %v4542_v19, 112  ;;  %v2526_v11 = vsel %vm8283_vm7, %v2523_v16, %v2525_v48  ;;  %vm8284_vm2 = vmmov %vm8283_vm7  ;;  %vm8285_vm8 = vcmp.ge.s32.totalorder %v4548_v21, 2  ;;  %v8291_v18 = vld [vmem:[#allocation56_spill] sm:$0xff] }
 0x6e7   : > { %v2562_v43 = vsel %vm8281_vm4, %v8280_v46, %v8279_v15  ;;  %vm8282_vm6 = vmmov %vm8281_vm4  ;;  %v2527_v29 = vsel %vm8284_vm2, %v2525_v48, %v2523_v16  ;;  %v2518_v23 = vsel %vm8285_vm8, %v2514_v33, 0.0  ;;  %v2530_v17 = vmul.f32 %v2529_v37, %v2526_v11  ;;  %v2551_v62 = vpop.permute.xlu0 %2550  ;;  %v8295_v48 = vld [vmem:[#allocation58_spill] sm:$0xff] }
 0x6e8   : > { %v2563_v47 = vsel %vm8282_vm6, %v8279_v15, %v8280_v46  ;;  %v2519_v56 = vsel %vm6849_vm13, %v2515_v32, 0.0  ;;  %v2531_v63 = vmul.f32 %v2529_v37, %v2527_v29  ;;  %v6871_v1 = vadd.f32 %v2518_v23, %v6750_v8  ;;  %vm8286_vm15 = vmmov %vm8281_vm4  ;;  %v8296_v15 = vld [vmem:[#allocation59_spill] sm:$0xff]  ;;  %v8297_v29 = vld [vmem:[#allocation60_spill] sm:$0xff] }
 0x6e9   : > { %v6874_v3 = vadd.f32 %v2519_v56, %v6752_v14  ;;  %v2555_v4 = vstv %s6818_s18  ;;  %v2542_v0 = vadd.f32 %v2540_v40, %v2530_v17  ;;  %v2566_v6 = vmul.f32 %v2565_v35, %v2562_v43  ;;  %vm8287_vm14 = vmmov %vm8281_vm4  ;;  %v6911_v7 = vpop.permute.xlu1 %2574  ;;  %s6928_s18 = sld [smem:[#allocation9 + $0x5f]]  ;;  %v8298_v23 = vld [vmem:[#allocation61_spill] sm:$0xff] }
 0x6ea   : > { %v2543_v60 = vadd.f32 %v2541_v25, %v2531_v63  ;;  %v2567_v30 = vmul.f32 %v2565_v35, %v2563_v47  ;;  %v2552_v8 = vsel %vm8286_vm15, %v2549_v38, %v2551_v62  ;;  %v2553_v14 = vsel %vm8287_vm14, %v2551_v62, %v2549_v38  ;;  %v8292_v35 = vld [vmem:[#allocation57_spill] sm:$0xff]  ;;  %v8300_v38 = vld [vmem:[#allocation63_spill] sm:$0xff] }
 0x6eb   : > { %vm8288_vm12 = vcmp.ge.s32.totalorder %v4548_v21, 1  ;;  %vm8290_vm1 = vnez %v8289_v50  ;;  %v2556_v52 = vmul.f32 %v2555_v4, %v2552_v8  ;;  %v2557_v22 = vmul.f32 %v2555_v4, %v2553_v14  ;;  %v6913_v9 = vpop.permute.xlu0 %2576  ;;  %v8302_v8 = vld [vmem:[#allocation65_spill] sm:$0xff] }
 0x6ec   : > { %v2544_v49 = vsel %vm8288_vm12, %v2542_v0, 0.0  ;;  %v2545_v58 = vsel %vm8290_vm1, %v2543_v60, 0.0  ;;  %v2591_v54 = vstv %s6877_s7  ;;  %vm2604_vm13 = vcmp.lt.s32.totalorder %v4542_v19, 110  ;;  %v8299_v60 = vld [vmem:[#allocation62_spill] sm:$0xff]  ;;  %s7068_s7 = sld [smem:[#allocation9 + $0x20]] }
 0x6ed   : > { %v6902_v41 = vadd.f32 %v2544_v49, %v6782_v5  ;;  %v6905_v39 = vadd.f32 %v2545_v58, %v6784_v61  ;;  %v2568_v26 = vadd.f32 %v2566_v6, %v2556_v52  ;;  %v2569_v28 = vadd.f32 %v2567_v30, %v2557_v22  ;;  %v6938_v34 = vpop.permute.xlu1 %2600  ;;  %v8301_v30 = vld [vmem:[#allocation64_spill] sm:$0xff]  ;;  %v8303_v22 = vld [vmem:[#allocation66_spill] sm:$0xff] }
 0x6ee   : > { %vm2633_vm4 = vcmp.lt.s32.totalorder %v4542_v19, 109  ;;  %v2618_v20 = vstv %s6879_s14  ;;  %v2647_v10 = vstv %s6881_s12  ;;  %vm2662_vm6 = vcmp.lt.s32.totalorder %v4542_v19, 99  ;;  %s7098_s14 = sld [smem:[#allocation9 + $0x21]]  ;;  %s7110_s12 = sld [smem:[#allocation9 + $0x22]] }
 0x6ef   : > { %v2571_v5 = vsel %vm8276_vm0, %v2569_v28, 0.0  ;;  %v6926_v61 = vadd.f32 %v2568_v26, %v6805_v13  ;;  %v6940_v13 = vpop.permute.xlu0 %2602  ;;  %vm2693_vm7 = vcmp.lt.s32.totalorder %v4542_v19, 98  ;;  %v2707_v31 = vstv %s6889_s29  ;;  %v8304_v26 = vld [vmem:[#allocation67_spill] sm:$0xff]  ;;  %s7134_s29 = sld [smem:[#allocation9 + $0x24]] }
 0x6f0   : > { %v6931_v27 = vadd.f32 %v2571_v5, %v6807_v55  ;;  %v2676_v55 = vstv %s6883_s22  ;;  %vm2722_vm2 = vcmp.lt.s32.totalorder %v4542_v19, 97  ;;  %vm2751_vm8 = vcmp.lt.s32.totalorder %v4542_v19, 96  ;;  %s7132_s22 = sld [smem:[#allocation9 + $0x23]] }
 0x6f1   : > { %v2736_v36 = vstv %s6891_s20  ;;  %v2765_v44 = vstv %s6897_s26  ;;  %vm2778_vm15 = vcmp.lt.s32.totalorder %v4542_v19, 95  ;;  %vm2807_vm14 = vcmp.lt.s32.totalorder %v4542_v19, 94  ;;  %v6958_v2 = vpop.permute.xlu1 %2629  ;;  %s7152_s20 = sld [smem:[#allocation9 + $0x25]]  ;;  %s7154_s26 = sld [smem:[#allocation9 + $0x26]] }
 0x6f2   : > { %v2792_v59 = vstv %s6899_s23  ;;  %v2821_v42 = vstv %s6907_s10  ;;  %vm2836_vm12 = vcmp.lt.s32.totalorder %v4542_v19, 93  ;;  %vm2865_vm1 = vcmp.lt.s32.totalorder %v4542_v19, 83  ;;  %s7172_s23 = sld [smem:[#allocation9 + $0x27]]  ;;  %s7174_s10 = sld [smem:[#allocation9 + $0x28]] }
 0x6f3   : > { %v6960_v57 = vpop.permute.xlu0 %2631  ;;  %vm8293_vm0 = vcmp.lt.s32.totalorder %v4542_v19, 111  ;;  %v2850_v37 = vstv %s6909_s19  ;;  %v2879_v40 = vstv %s6915_s11  ;;  %vm2896_vm5 = vcmp.lt.s32.totalorder %v4542_v19, 82  ;;  %s7196_s19 = sld [smem:[#allocation9 + $0x29]]  ;;  %s7198_s11 = sld [smem:[#allocation9 + $0x2a]] }
 0x6f4   : > { %v2588_v45 = vsel %vm8293_vm0, %v8292_v35, %v8291_v18  ;;  %v2910_v25 = vstv %s6917_s13  ;;  %vm2925_vm11 = vcmp.lt.s32.totalorder %v4542_v19, 81  ;;  %v2939_v33 = vstv %s6919_s21  ;;  %vm8294_vm10 = vmmov %vm8293_vm0  ;;  %s7229_s13 = sld [smem:[#allocation9 + $0x2b]]  ;;  %s7246_s21 = sld [smem:[#allocation9 + $0x2d]] }
 0x6f5   : > { %v2589_v16 = vsel %vm8294_vm10, %v8291_v18, %v8292_v35  ;;  %v2615_v46 = vsel %vm2604_vm13, %v8296_v15, %v8295_v48  ;;  %v2616_v43 = vsel %vm2604_vm13, %v8295_v48, %v8296_v15  ;;  %v6986_v11 = vmul.f32 %v2591_v54, %v2588_v45  ;;  %v6998_v4 = vpop.permute.xlu1 %2658  ;;  %v8305_v35 = vld [vmem:[#allocation68_spill] sm:$0xff]  ;;  %v8306_v45 = vld [vmem:[#allocation69_spill] sm:$0xff] }
 0x6f6   : > { %v2644_v56 = vsel %vm2633_vm4, %v8298_v23, %v8297_v29  ;;  %v2645_v17 = vsel %vm2633_vm4, %v8297_v29, %v8298_v23  ;;  %vm7935_vm10 = vcmp.lt.s32.totalorder %v4542_v19, 80  ;;  %v2673_v62 = vsel %vm2662_vm6, %v8300_v38, %v8299_v60 }
 0x6f7   : > { %v7000_v0 = vpop.permute.xlu0 %2660  ;;  %v2674_v6 = vsel %vm2662_vm6, %v8299_v60, %v8300_v38  ;;  %v2704_v14 = vsel %vm2693_vm7, %v8302_v8, %v8301_v30  ;;  %v2705_v49 = vsel %vm2693_vm7, %v8301_v30, %v8302_v8  ;;  %vm7936_vm0 = vcmp.lt.s32.totalorder %v4542_v19, 79 }
 0x6f8   : > { %v7019_v50 = vmul.f32 %v2591_v54, %v2589_v16  ;;  %v7021_v58 = vmul.f32 %v2618_v20, %v2615_v46  ;;  %v7023_v52 = vmul.f32 %v2618_v20, %v2616_v43  ;;  %v2733_v28 = vsel %vm2722_vm2, %v8304_v26, %v8303_v22 }
 0x6f9   : > { %vm3010_vm3 = vcmp.lt.s32.totalorder %v4542_v19, 78  ;;  %v7030_v5 = vmul.f32 %v2647_v10, %v2644_v56  ;;  %v7032_v18 = vmul.f32 %v2647_v10, %v2645_v17  ;;  %v2734_v54 = vsel %vm2722_vm2, %v8303_v22, %v8304_v26  ;;  %v7050_v10 = vpop.permute.xlu1 %2689  ;;  %v8307_v56 = vld [vmem:[#allocation70_spill] sm:$0xff]  ;;  %v8308_v17 = vld [vmem:[#allocation71_spill] sm:$0xff]  ;;  %v8313_v26 = vld [vmem:[#allocation76_spill] sm:$0xff] }
 0x6fa   : > { %v2762_v20 = vsel %vm2751_vm8, %v8306_v45, %v8305_v35  ;;  %v7042_v16 = vmul.f32 %v2676_v55, %v2673_v62  ;;  %v7044_v48 = vmul.f32 %v2676_v55, %v2674_v6  ;;  %v7046_v15 = vmul.f32 %v2707_v31, %v2704_v14  ;;  %v8309_v62 = vld [vmem:[#allocation72_spill] sm:$0xff]  ;;  %v8310_v6 = vld [vmem:[#allocation73_spill] sm:$0xff]  ;;  %v8311_v14 = vld [vmem:[#allocation74_spill] sm:$0xff] }
 0x6fb   : > { %v7048_v46 = vmul.f32 %v2707_v31, %v2705_v49  ;;  %v7052_v43 = vpop.permute.xlu0 %2691  ;;  %v7054_v29 = vmul.f32 %v2736_v36, %v2733_v28  ;;  %v2763_v23 = vsel %vm2751_vm8, %v8305_v35, %v8306_v45  ;;  %v2789_v55 = vsel %vm2778_vm15, %v8308_v17, %v8307_v56  ;;  %v8312_v49 = vld [vmem:[#allocation75_spill] sm:$0xff]  ;;  %v8314_v28 = vld [vmem:[#allocation77_spill] sm:$0xff] }
 0x6fc   : > { %v2790_v31 = vsel %vm2778_vm15, %v8307_v56, %v8308_v17  ;;  %v7070_v60 = vmul.f32 %v2736_v36, %v2734_v54  ;;  %v7072_v38 = vmul.f32 %v2765_v44, %v2762_v20  ;;  %v2818_v30 = vsel %vm2807_vm14, %v8310_v6, %v8309_v62  ;;  %v8315_v17 = vld [vmem:[#allocation78_spill] sm:$0xff] }
 0x6fd   : > { %v2819_v8 = vsel %vm2807_vm14, %v8309_v62, %v8310_v6  ;;  %v2847_v36 = vsel %vm2836_vm12, %v8312_v49, %v8311_v14  ;;  %v2848_v22 = vsel %vm2836_vm12, %v8311_v14, %v8312_v49  ;;  %v2876_v54 = vsel %vm2865_vm1, %v8314_v28, %v8313_v26  ;;  %v8316_v62 = vld [vmem:[#allocation79_spill] sm:$0xff]  ;;  %v7112_v14 = vpop.permute.xlu1 %2718 }
 0x6fe   : > { %v2877_v35 = vsel %vm2865_vm1, %v8313_v26, %v8314_v28  ;;  %v7100_v45 = vmul.f32 %v2765_v44, %v2763_v23  ;;  %v7102_v20 = vmul.f32 %v2792_v59, %v2789_v55  ;;  %v7104_v56 = vmul.f32 %v2792_v59, %v2790_v31  ;;  %v8317_v55 = vld [vmem:[#allocation80_spill] sm:$0xff]  ;;  %v8318_v31 = vld [vmem:[#allocation81_spill] sm:$0xff] }
 0x6ff   : > { %v2907_v6 = vsel %vm2896_vm5, %v8316_v62, %v8315_v17  ;;  %v7114_v49 = vpop.permute.xlu0 %2720  ;;  %v7118_v44 = vmul.f32 %v2821_v42, %v2818_v30  ;;  %v7122_v23 = vmul.f32 %v2821_v42, %v2819_v8  ;;  %v2908_v59 = vsel %vm2896_vm5, %v8315_v17, %v8316_v62 }
 0x700   : > { %v2936_v26 = vsel %vm2925_vm11, %v8318_v31, %v8317_v55  ;;  %v7138_v30 = vmul.f32 %v2850_v37, %v2847_v36  ;;  %v7142_v42 = vmul.f32 %v2850_v37, %v2848_v22  ;;  %v7146_v8 = vmul.f32 %v2879_v40, %v2876_v54  ;;  %v8322_v36 = vld [vmem:[#allocation82_spill] sm:$0xff]  ;;  %v8323_v22 = vld [vmem:[#allocation83_spill] sm:$0xff] }
 0x701   : > { %v7150_v28 = vmul.f32 %v2879_v40, %v2877_v35  ;;  %v7158_v17 = vmul.f32 %v2910_v25, %v2907_v6  ;;  %v2937_v37 = vsel %vm2925_vm11, %v8317_v55, %v8318_v31  ;;  %v2965_v54 = vsel %vm7935_vm10, %v8323_v22, %v8322_v36  ;;  %v8326_v6 = vld [vmem:[#allocation84_spill] sm:$0xff]  ;;  %v8327_v55 = vld [vmem:[#allocation85_spill] sm:$0xff] }
 0x702   : > { %8319 = vst [vmem:[#allocation32_spill] sm:$0xff] %v7138_v30  ;;  %8320 = vst [vmem:[#allocation33_spill] sm:$0xff] %v7142_v42  ;;  %v2966_v40 = vsel %vm7935_vm10, %v8322_v36, %v8323_v22  ;;  %v7178_v35 = vmul.f32 %v2910_v25, %v2908_v59  ;;  %v7182_v62 = vmul.f32 %v2939_v33, %v2936_v26  ;;  %v7192_v22 = vpop.permute.xlu1 %2747  ;;  %v8328_v59 = vld [vmem:[#allocation86_spill] sm:$0xff]  ;;  %v8329_v26 = vld [vmem:[#allocation87_spill] sm:$0xff]  ;;  %v2581_v47 = vstv %s7068_s7  ;;  %s7231_s7 = sld [smem:[#allocation9 + $0x2c]] }
 0x703   : > { %8321 = vst [vmem:[#allocation34_spill] sm:$0xff] %v7158_v17  ;;  %v2992_v31 = vsel %vm7936_vm0, %v8327_v55, %v8326_v6  ;;  %v2993_v36 = vsel %vm7936_vm0, %v8326_v6, %v8327_v55  ;;  %v7194_v25 = vpop.permute.xlu0 %2749  ;;  %v3021_v63 = vsel %vm3010_vm3, %v8329_v26, %v8328_v59  ;;  %vm8330_vm10 = vcmp.lt.s32.totalorder %v4542_v19, 111 }
 0x704   : > { %8324 = vst [vmem:[#allocation35_spill] sm:$0xff] %v7178_v35  ;;  %8325 = vst [vmem:[#allocation19_spill] sm:$0xff] %v7182_v62  ;;  %v2578_v6 = vsel %vm8330_vm10, %v6911_v7, %v6913_v9  ;;  %v7215_v32 = vmul.f32 %v2939_v33, %v2937_v37  ;;  %v8333_v62 = vstv %s6921_s24  ;;  %v3022_v17 = vsel %vm3010_vm3, %v8328_v59, %v8329_v26  ;;  %s7248_s24 = sld [smem:[#allocation9 + $0x2e]] }
 0x705   : > { %vm8331_vm0 = vmmov %vm8330_vm10  ;;  %v7219_v42 = vmul.f32 %v8333_v62, %v2965_v54  ;;  %v8335_v30 = vmov %v8333_v62  ;;  %v2605_v54 = vsel %vm2604_vm13, %v6938_v34, %v6940_v13  ;;  %v2582_v59 = vmul.f32 %v2581_v47, %v2578_v6 }
 0x706   : > { %v2579_v55 = vsel %vm8331_vm0, %v6913_v9, %v6911_v7  ;;  %8332 = vst [vmem:[#allocation30_spill] sm:$0xff] %v7215_v32  ;;  %v7223_v35 = vmul.f32 %v8335_v30, %v2966_v40  ;;  %v8337_v7 = vstv %s6928_s18  ;;  %v2608_v30 = vstv %s7098_s14  ;;  %v7258_v26 = vpop.permute.xlu1 %2774  ;;  %s7269_s18 = sld [smem:[#allocation9 + $0x2f]]  ;;  %s7283_s14 = sld [smem:[#allocation9 + $0x61]] }
 0x707   : > { %8334 = vst [vmem:[#allocation31_spill] sm:$0xff] %v7219_v42  ;;  %v7235_v9 = vmul.f32 %v8337_v7, %v2992_v31  ;;  %v8339_v33 = vmov %v8337_v7  ;;  %v8341_v40 = vstv %s6936_s0  ;;  %v2583_v31 = vmul.f32 %v2581_v47, %v2579_v55  ;;  %v7260_v7 = vpop.permute.xlu0 %2776  ;;  %s7281_s0 = sld [smem:[#allocation9 + $0x30]] }
 0x708   : > { %8336 = vst [vmem:[#allocation36_spill] sm:$0xff] %v7223_v35  ;;  %v7239_v37 = vmul.f32 %v8339_v33, %v2993_v36  ;;  %v7252_v62 = vmul.f32 %v8341_v40, %v3021_v63  ;;  %v2606_v36 = vsel %vm2604_vm13, %v6940_v13, %v6938_v34  ;;  %v8343_v33 = vmov %v8341_v40 }
 0x709   : > { %8338 = vst [vmem:[#allocation37_spill] sm:$0xff] %v7235_v9  ;;  %v7264_v42 = vmul.f32 %v8343_v33, %v3022_v17  ;;  %v2637_v35 = vstv %s7110_s12  ;;  %v2666_v63 = vstv %s7132_s22  ;;  %v2697_v40 = vstv %s7134_s29  ;;  %s340_s12 = sand.u32 1, %s4200_s28   ;;  %s3370_s29 = sshll.u32 %s4332_s9, 10 }
 0x70a   : > { %8340 = vst [vmem:[#allocation38_spill] sm:$0xff] %v7239_v37  ;;  %8342 = vst [vmem:[#allocation39_spill] sm:$0xff] %v7252_v62  ;;  %v2609_v47 = vmul.f32 %v2608_v30, %v2605_v54  ;;  %v2634_v34 = vsel %vm2633_vm4, %v6958_v2, %v6960_v57  ;;  %v2635_v13 = vsel %vm2633_vm4, %v6960_v57, %v6958_v2  ;;  %vm2682_vm13 = vcmp.lt.s32.totalorder %v8265_v51, 224  ;;  %v7290_v2 = vpop.permute.xlu1 %2803  ;;  %s3242_s22 = sshll.u32 %s340_s12, 6 }
 0x70b   : > { %8344 = vst [vmem:[#allocation40_spill] sm:$0xff] %v7264_v42  ;;  %v2610_v6 = vmul.f32 %v2608_v30, %v2606_v36  ;;  %v2755_v55 = vstv %s7154_s26  ;;  %v2782_v54 = vstv %s7172_s23  ;;  %v2811_v33 = vstv %s7174_s10  ;;  %v7292_v57 = vpop.permute.xlu0 %2805  ;;  %s7713_s10 = scalar_lea.hbm %s7769_s8, %s3370_s29 }
 0x70c   : > { %v2594_v42 = vadd.f32 %v6986_v11, %v2582_v59  ;;  %v2595_v62 = vadd.f32 %v7019_v50, %v2583_v31  ;;  %v2869_v32 = vstv %s7198_s11  ;;  %v2638_v37 = vmul.f32 %v2637_v35, %v2634_v34  ;;  %s4264_s11 = smov [#allocation10]  }
 0x70d   : > { %v2639_v9 = vmul.f32 %v2637_v35, %v2635_v13  ;;  %v2663_v30 = vsel %vm2662_vm6, %v6998_v4, %v7000_v0  ;;  %v2664_v11 = vsel %vm2662_vm6, %v7000_v0, %v6998_v4  ;;  %v2621_v50 = vadd.f32 %v7021_v58, %v2609_v47  ;;  %v8346_v58 = vld [vmem:[#allocation21_spill] sm:$0xff] }
 0x70e   : > { %v2694_v59 = vsel %vm2693_vm7, %v7050_v10, %v7052_v43  ;;  %v2900_v31 = vstv %s7229_s13  ;;  %v2622_v36 = vadd.f32 %v7023_v52, %v2610_v6  ;;  %v2695_v34 = vsel %vm2693_vm7, %v7052_v43, %v7050_v10  ;;  %v7330_v43 = vpop.permute.xlu1 %2832  ;;  %s4138_s13 = sshll.u32 %s4264_s11, 4  ;;  %s4139_s13 = int_to_ptr.vmem [resolvable:$false] %s4138_s13 }
 0x70f   : > { %vm8345_vm4 = vcmp.lt.s32.totalorder %v4548_v21, 15  ;;  %vm8347_vm6 = vnez %v8346_v58  ;;  %vm8348_vm10 = vcmp.lt.s32.totalorder %v8265_v51, 240  ;;  %v2667_v6 = vmul.f32 %v2666_v63, %v2663_v30  ;;  %v7332_v13 = vpop.permute.xlu0 %2834 }
 0x710   : > { %v2596_v0 = vsel %vm8345_vm4, %v2594_v42, 0.0  ;;  %v2597_v47 = vsel %vm8347_vm6, %v2595_v62, 0.0  ;;  %vm7326_vm0 = vmand %vm1857_vm9, %vm8348_vm10  ;;  %v2668_v10 = vmul.f32 %v2666_v63, %v2664_v11  ;;  %v2650_v35 = vadd.f32 %v7030_v5, %v2638_v37 }
 0x711   : > { %v2651_v42 = vadd.f32 %v7032_v18, %v2639_v9  ;;  %v2698_v58 = vmul.f32 %v2697_v40, %v2694_v59  ;;  %v3014_v62 = vstv %s7269_s18  ;;  %vm8351_vm7 = vcmp.lt.s32.totalorder %v4548_v21, 14  ;;  %vm8352_vm4 = vmmov %vm8348_vm10 }
 0x712   : > { %v2625_v4 = vsel %vm8351_vm7, %v2621_v50, 0.0  ;;  %vm8353_vm6 = vcmp.lt.s32.totalorder %v4551_v24, 13  ;;  %v2699_v63 = vmul.f32 %v2697_v40, %v2695_v34  ;;  %v3043_v11 = vstv %s7281_s0  ;;  %v2862_v40 = vpop.permute.xlu1 %2861 }
 0x713   : > { %vm7343_vm10 = vmand %vm8353_vm6, %vm8352_vm4  ;;  %v3053_v17 = vstv %s7283_s14  ;;  %v2598_v5 = vadd.f32 %v2596_v0, %v6841_v53  ;;  %v2599_v18 = vadd.f32 %v2597_v47, %v6843_v12  ;;  %v2626_v9 = vsel %vm7326_vm0, %v2622_v36, 0.0  ;;  %v2864_v36 = vpop.permute.xlu0 %2863 }
 0x714   : > { %v2723_v37 = vsel %vm2722_vm2, %v7112_v14, %v7114_v49  ;;  %v2679_v50 = vadd.f32 %v7042_v16, %v2667_v6  ;;  %v2680_v59 = vadd.f32 %v7044_v48, %v2668_v10  ;;  %v2753_v53 = vsel %vm2751_vm8, %v7194_v25, %v7192_v22 }
 0x715   : > { %v2779_v12 = vsel %vm2778_vm15, %v7258_v26, %v7260_v7  ;;  %v2627_v34 = vadd.f32 %v2625_v4, %v6871_v1  ;;  %vm8356_vm0 = vcmp.lt.s32.totalorder %v4548_v21, 13  ;;  %v2655_v48 = vsel %vm7343_vm10, %v2651_v42, 0.0 }
 0x716   : > { %v2654_v16 = vsel %vm8356_vm0, %v2650_v35, 0.0  ;;  %vm8357_vm7 = vcmp.ge.s32.totalorder %v4551_v24, 3  ;;  %v2710_v47 = vadd.f32 %v7046_v15, %v2698_v58  ;;  %v2711_v52 = vadd.f32 %v7048_v46, %v2699_v63  ;;  %v2893_v58 = vpop.permute.xlu1 %2892 }
 0x717   : > { %vm7376_vm4 = vmand %vm8357_vm7, %vm2682_vm13  ;;  %v2724_v1 = vsel %vm2722_vm2, %v7114_v49, %v7112_v14  ;;  %v8360_v35 = vstv %s7152_s20  ;;  %v2780_v6 = vsel %vm2778_vm15, %v7260_v7, %v7258_v26  ;;  %v7393_v10 = vadd.f32 %v2626_v9, %v6874_v3  ;;  %v2895_v30 = vpop.permute.xlu0 %2894  ;;  %s342_s20 = scalar_lea.vmem [#allocation10], %s3242_s22 }
 0x718   : > { %v2727_v4 = vmul.f32 %v8360_v35, %v2723_v37  ;;  %vm8361_vm6 = vcmp.ge.s32.totalorder %v4551_v24, 2  ;;  %v2752_v46 = vsel %vm2751_vm8, %v7192_v22, %v7194_v25  ;;  %v2757_v14 = vmul.f32 %v2755_v55, %v2753_v53  ;;  %s3136_s26 = sshll.u32 %s342_s20, 4  ;;  %s7715_s26 = int_to_ptr.vmem [resolvable:$true] %s3136_s26 }
 0x719   : > { %vm7399_vm10 = vmand %vm8361_vm6, %vm2682_vm13  ;;  %v2783_v49 = vmul.f32 %v2782_v54, %v2779_v12  ;;  %v2656_v3 = vadd.f32 %v2654_v16, %v6902_v41  ;;  %v2657_v26 = vadd.f32 %v2655_v48, %v6905_v39  ;;  %vm8364_vm2 = vcmp.ge.s32.totalorder %v4548_v21, 3  ;;  %p4141_p8 = scmp.lt.s32.totalorder %s7715_s26, %s4139_s13 }
 0x71a   : > { %v2685_v7 = vsel %vm8364_vm2, %v2679_v50, 0.0  ;;  %v2686_v42 = vsel %vm7376_vm4, %v2680_v59, 0.0  ;;  %v8365_v63 = vmov %v8360_v35  ;;  %v2784_v25 = vmul.f32 %v2782_v54, %v2780_v6 }
 0x71b   : > { %v2728_v22 = vmul.f32 %v8365_v63, %v2724_v1  ;;  %v2808_v41 = vsel %vm2807_vm14, %v7290_v2, %v7292_v57  ;;  %vm2885_vm8 = vcmp.lt.s32.totalorder %v8265_v51, 208  ;;  %v2866_v39 = vsel %vm2865_vm1, %v2862_v40, %v2864_v36 }
 0x71c   : > { %vm8366_vm15 = vcmp.ge.s32.totalorder %v4548_v21, 2  ;;  %v2715_v37 = vsel %vm7399_vm10, %v2711_v52, 0.0  ;;  %v2739_v50 = vadd.f32 %v7054_v29, %v2727_v4  ;;  %v2756_v54 = vmul.f32 %v2755_v55, %v2752_v46  ;;  %v2922_v55 = vpop.permute.xlu1 %2921 }
 0x71d   : > { %v2714_v9 = vsel %vm8366_vm15, %v2710_v47, 0.0  ;;  %v2687_v59 = vadd.f32 %v2685_v7, %v6926_v61  ;;  %v2769_v53 = vadd.f32 %v7100_v45, %v2757_v14  ;;  %v2795_v12 = vadd.f32 %v7102_v20, %v2783_v49  ;;  %v2924_v45 = vpop.permute.xlu0 %2923 }
 0x71e   : > { %v2809_v16 = vsel %vm2807_vm14, %v7292_v57, %v7290_v2  ;;  %v2688_v48 = vadd.f32 %v2686_v42, %v6931_v27  ;;  %v2812_v0 = vmul.f32 %v2811_v33, %v2808_v41  ;;  %v2867_v29 = vsel %vm2865_vm1, %v2864_v36, %v2862_v40 }
 0x71f   : > { %v2870_v61 = vmul.f32 %v2869_v32, %v2866_v39  ;;  %v7449_v47 = vadd.f32 %v2714_v9, %v2598_v5  ;;  %v7451_v20 = vadd.f32 %v2715_v37, %v2599_v18  ;;  %vm8367_vm14 = vcmp.ge.s32.totalorder %v4551_v24, 1  ;;  %v8384_v9 = vld [vmem:[#allocation34_spill] sm:$0xff] }
 0x720   : > { %vm7457_vm0 = vmand %vm8367_vm14, %vm2682_vm13  ;;  %v7462_v2 = vadd.f32 %v7070_v60, %v2728_v22  ;;  %v2796_v57 = vadd.f32 %v7104_v56, %v2784_v25  ;;  %vm8370_vm1 = vcmp.ge.s32.totalorder %v4548_v21, 1  ;;  %v2768_v5 = vadd.f32 %v7072_v38, %v2756_v54 }
 0x721   : > { %v2743_v40 = vsel %vm8370_vm1, %v2739_v50, 0.0  ;;  %vm8371_vm7 = vcmp.lt.s32.totalorder %v4551_v24, 15  ;;  %v2813_v36 = vmul.f32 %v2811_v33, %v2809_v16  ;;  %v2897_v60 = vsel %vm2896_vm5, %v2893_v58, %v2895_v30  ;;  %v2953_v15 = vpop.permute.xlu0 %2952 }
 0x722   : > { %vm7472_vm4 = vmand %vm8371_vm7, %vm2682_vm13  ;;  %v2771_v56 = vsel %vm2682_vm13, %v2769_v53, 0.0  ;;  %vm8374_vm6 = vcmp.lt.s32.totalorder %v4548_v21, 15  ;;  %v2871_v52 = vmul.f32 %v2869_v32, %v2867_v29  ;;  %v2898_v1 = vsel %vm2896_vm5, %v2895_v30, %v2893_v58  ;;  %v2951_v32 = vpop.permute.xlu1 %2950 }
 0x723   : > { %v2799_v38 = vsel %vm8374_vm6, %v2795_v12, 0.0  ;;  %v2824_v35 = vadd.f32 %v7118_v44, %v2812_v0  ;;  %v2837_v33 = vsel %vm2836_vm12, %v7330_v43, %v7332_v13  ;;  %v2838_v4 = vsel %vm2836_vm12, %v7332_v13, %v7330_v43  ;;  %vm7516_vm5 = vmand %vm1857_vm9, %vm2682_vm13  ;;  %v8387_v12 = vld [vmem:[#allocation35_spill] sm:$0xff] }
 0x724   : > { %v2882_v6 = vadd.f32 %v7146_v8, %v2870_v61  ;;  %v2744_v44 = vsel %vm7457_vm0, %v7462_v2, 0.0  ;;  %v7501_v46 = vadd.f32 %v2743_v40, %v2627_v34  ;;  %v2800_v14 = vsel %vm7472_vm4, %v2796_v57, 0.0  ;;  %v8390_v57 = vld [vmem:[#allocation32_spill] sm:$0xff] }
 0x725   : > { %v2901_v49 = vmul.f32 %v2900_v31, %v2897_v60  ;;  %v2772_v7 = vadd.f32 %v2768_v5, %v2656_v3  ;;  %v2773_v42 = vadd.f32 %v2771_v56, %v2657_v26  ;;  %v7508_v58 = vadd.f32 %v7122_v23, %v2813_v36  ;;  %v2980_v39 = vpop.permute.xlu0 %2979  ;;  %v8391_v5 = vld [vmem:[#allocation33_spill] sm:$0xff] }
 0x726   : > { %v2902_v8 = vmul.f32 %v2900_v31, %v2898_v1  ;;  %v2801_v13 = vadd.f32 %v2799_v38, %v2687_v59  ;;  %v8377_v34 = vstv %s7196_s19  ;;  %v2883_v3 = vadd.f32 %v7150_v28, %v2871_v52  ;;  %v2978_v41 = vpop.permute.xlu1 %2977  ;;  %s4134_s19 = scalar_lea.vmem %s7715_s26, 1024 }
 0x727   : > { %v2841_v30 = vmul.f32 %v8377_v34, %v2837_v33  ;;  %v8378_v63 = vmov %v8377_v34  ;;  %v2802_v23 = vadd.f32 %v2800_v14, %v2688_v48  ;;  %vm8379_vm12 = vcmp.lt.s32.totalorder %v4548_v21, 14  ;;  %p4135_p3 = scmp.ne.s32.totalorder %s7715_s26, %s4134_s19 }
 0x728   : > { %v2842_v22 = vmul.f32 %v8378_v63, %v2838_v4  ;;  %v7527_v31 = vsel %vm8379_vm12, %v2824_v35, 0.0  ;;  %vm8380_vm10 = vcmp.ge.s32.totalorder %v4551_v24, 3  ;;  %vm8383_vm15 = vcmp.ge.s32.totalorder %v4548_v21, 3  ;;  %v8400_v35 = vld [vmem:[#allocation37_spill] sm:$0xff]  ;;  %v8401_v4 = vld [vmem:[#allocation38_spill] sm:$0xff] }
 0x729   : > { %vm7533_vm2 = vmand %vm8380_vm10, %vm2885_vm8  ;;  %v2888_v25 = vsel %vm8383_vm15, %v2882_v6, 0.0  ;;  %v2926_v28 = vsel %vm2925_vm11, %v2922_v55, %v2924_v45  ;;  %vm3039_vm14 = vcmp.lt.s32.totalorder %v4542_v19, 77  ;;  %v2913_v37 = vadd.f32 %v8384_v9, %v2901_v49  ;;  %v3009_v49 = vpop.permute.xlu0 %3008  ;;  %p4136_p4 = pnand %p4135_p3, %p4349_p5 }
 0x72a   : > { %v2927_v50 = vsel %vm2925_vm11, %v2924_v45, %v2922_v55  ;;  %vm8385_vm1 = vcmp.lt.s32.totalorder %v4542_v19, 79  ;;  %v2829_v53 = vsel %vm7516_vm5, %v7508_v58, 0.0  ;;  %v2914_v16 = vadd.f32 %v8387_v12, %v2902_v8  ;;  %v3007_v14 = vpop.permute.xlu1 %3006  ;;  %v8415_v12 = vld [vmem:[#allocation40_spill] sm:$0xff] }
 0x72b   : > { %v2982_v54 = vsel %vm8385_vm1, %v2978_v41, %v2980_v39  ;;  %vm8386_vm7 = vmmov %vm8385_vm1  ;;  %v8388_v48 = vstv %s7248_s24  ;;  %v2853_v40 = vadd.f32 %v8390_v57, %v2841_v30  ;;  %v7559_v55 = vadd.f32 %v8391_v5, %v2842_v22  ;;  %p4137_p7 = pneg %p4136_p4 }
 0x72c   : > { %v2983_v59 = vsel %vm8386_vm7, %v2980_v39, %v2978_v41  ;;  %v2986_v0 = vmul.f32 %v8388_v48, %v2982_v54  ;;  %v8389_v29 = vmov %v8388_v48  ;;  %v2889_v45 = vsel %vm7533_vm2, %v2883_v3, 0.0  ;;  %v8414_v54 = vld [vmem:[#allocation39_spill] sm:$0xff] }
 0x72d   : > { %v2987_v61 = vmul.f32 %v8389_v29, %v2983_v59  ;;  %vm8392_vm11 = vcmp.ge.s32.totalorder %v4551_v24, 2  ;;  %v8395_v36 = vstv %s7231_s7  ;;  %v2890_v56 = vadd.f32 %v2888_v25, %v2772_v7  ;;  %s4140_s7 = scalar_lea.vmem %s4139_s13, 2048 }
 0x72e   : > { %vm7567_vm4 = vmand %vm8392_vm11, %vm2885_vm8  ;;  %v2930_v60 = vmul.f32 %v8395_v36, %v2926_v28  ;;  %v8396_v38 = vmov %v8395_v36  ;;  %vm8397_vm6 = vcmp.lt.s32.totalorder %v4551_v24, 15  ;;  %v2998_v33 = vadd.f32 %v8400_v35, %v2986_v0  ;;  %v8405_v28 = vld [vmem:[#allocation19_spill] sm:$0xff]  ;;  %v3036_v48 = vpop.permute.xlu1 %3035  ;;  %v3038_v0 = vpop.permute.xlu0 %3037  ;;  %p4142_p11 = scmp.lt.s32.totalorder %s4140_s7, %s4134_s19 }
 0x72f   : > { %v2931_v52 = vmul.f32 %v8396_v38, %v2927_v50  ;;  %vm7579_vm12 = vmand %vm8397_vm6, %vm2885_vm8  ;;  %v2999_v6 = vadd.f32 %v8401_v4, %v2987_v61  ;;  %vm8402_vm10 = vcmp.ge.s32.totalorder %v4548_v21, 2  ;;  %vm8403_vm2 = vcmp.lt.s32.totalorder %v4542_v19, 80  ;;  %v8423_v4 = vld [vmem:[#allocation36_spill] sm:$0xff] }
 0x730   : > { %v2917_v7 = vsel %vm8402_vm10, %v2913_v37, 0.0  ;;  %v2956_v8 = vsel %vm8403_vm2, %v2953_v15, %v2951_v32  ;;  %v3011_v34 = vsel %vm3010_vm3, %v3007_v14, %v3009_v49  ;;  %v3012_v30 = vsel %vm3010_vm3, %v3009_v49, %v3007_v14  ;;  %vm8404_vm15 = vmmov %vm8403_vm2  ;;  %p4143_p13 = por %p4142_p11, %p4141_p8 }
 0x731   : > { %v2918_v63 = vsel %vm7567_vm4, %v2914_v16, 0.0  ;;  %v2955_v22 = vsel %vm8404_vm15, %v2951_v32, %v2953_v15  ;;  %v3015_v3 = vmul.f32 %v3014_v62, %v3011_v34  ;;  %v3016_v26 = vmul.f32 %v3014_v62, %v3012_v30  ;;  %vm7610_vm3 = vmand %vm1857_vm9, %vm2885_vm8  ;;  %v8412_v15 = vld [vmem:[#allocation30_spill] sm:$0xff] }
 0x732   : > { %v2891_v25 = vadd.f32 %v2889_v45, %v2773_v42  ;;  %v2942_v41 = vadd.f32 %v8405_v28, %v2930_v60  ;;  %vm8406_vm1 = vcmp.lt.s32.totalorder %v4548_v21, 15  ;;  %v3003_v9 = vsel %vm7579_vm12, %v2999_v6, 0.0  ;;  %v3047_v14 = vpop.permute.xlu1 %3046  ;;  %v3049_v49 = vpop.permute.xlu0 %3048  ;;  %p4144_p1 = pnand %p4143_p13, %p4137_p7 }
 0x733   : > { %v3002_v39 = vsel %vm8406_vm1, %v2998_v33, 0.0  ;;  %vm8409_vm7 = vcmp.lt.s32.totalorder %v4551_v24, 13  ;;  %v2943_v42 = vadd.f32 %v8412_v15, %v2931_v52  ;;  %v8413_v37 = vstv %s7246_s21 }
 0x734   : > { %vm7618_vm11 = vmand %vm8409_vm7, %vm2682_vm13  ;;  %v2960_v50 = vmul.f32 %v8413_v37, %v2956_v8  ;;  %v3027_v59 = vadd.f32 %v8414_v54, %v3015_v3  ;;  %v3028_v16 = vadd.f32 %v8415_v12, %v3016_v26  ;;  %vm8416_vm9 = vcmp.lt.s32.totalorder %v4548_v21, 13 }
 0x735   : > { %v2857_v29 = vsel %vm8416_vm9, %v2853_v40, 0.0  ;;  %v2919_v61 = vadd.f32 %v2917_v7, %v2801_v13  ;;  %v2920_v57 = vadd.f32 %v2918_v63, %v2802_v23  ;;  %vm8417_vm13 = vcmp.ge.s32.totalorder %v4551_v24, 1  ;;  %vm8426_vm0 = vmmov %vm8416_vm9 }
 0x736   : > { %vm7633_vm4 = vmand %vm8417_vm13, %vm2885_vm8  ;;  %v8420_v45 = vmov %v8413_v37  ;;  %v3004_v36 = vadd.f32 %v3002_v39, %v2890_v56  ;;  %v3005_v60 = vadd.f32 %v3003_v9, %v2891_v25  ;;  %vm8421_vm6 = vcmp.lt.s32.totalorder %v4548_v21, 14 }
 0x737   : > { %v2959_v18 = vmul.f32 %v8420_v45, %v2955_v22  ;;  %v3031_v38 = vsel %vm8421_vm6, %v3027_v59, 0.0  ;;  %v3032_v13 = vsel %vm7610_vm3, %v3028_v16, 0.0  ;;  %v3040_v52 = vsel %vm3039_vm14, %v3036_v48, %v3038_v0  ;;  %v8430_v45 = vld [vmem:[#allocation28_spill] sm:$0xff] }
 0x738   : > { %v3033_v23 = vadd.f32 %v3031_v38, %v2919_v61  ;;  %v3034_v40 = vadd.f32 %v3032_v13, %v2920_v57  ;;  %v3041_v1 = vsel %vm3039_vm14, %v3038_v0, %v3036_v48  ;;  %v2858_v56 = vsel %vm7618_vm11, %v7559_v55, 0.0  ;;  %v8429_v57 = vld [vmem:[#allocation22_spill] sm:$0xff]  ;;  %v8432_v38 = vld [vmem:[#allocation27_spill] sm:$0xff] }
 0x739   : > { %vm8422_vm12 = vcmp.ge.s32.totalorder %v4548_v21, 1  ;;  %v2947_v33 = vsel %vm7633_vm4, %v2943_v42, 0.0  ;;  %v2972_v6 = vadd.f32 %v8423_v4, %v2960_v50  ;;  %v3050_v34 = vsel %vm3039_vm14, %v3047_v14, %v3049_v49 }
 0x73a   : > { %v2946_v35 = vsel %vm8422_vm12, %v2942_v41, 0.0  ;;  %v3066_v7 = vadd.f32 %v3033_v23, %v3004_v36  ;;  %v3067_v8 = vadd.f32 %v3034_v40, %v3005_v60  ;;  %v3051_v30 = vsel %vm3039_vm14, %v3049_v49, %v3047_v14  ;;  %vm8425_vm14 = vmmov %vm8409_vm7  ;;  %v8431_v36 = vld [vmem:[#allocation24_spill] sm:$0xff]  ;;  %v8433_v23 = vld [vmem:[#allocation23_spill] sm:$0xff] }
 0x73b   : > { %v3044_v55 = vmul.f32 %v3043_v11, %v3040_v52  ;;  %v3045_v63 = vmul.f32 %v3043_v11, %v3041_v1  ;;  %v3054_v22 = vmul.f32 %v3053_v17, %v3050_v34  ;;  %v3055_v3 = vmul.f32 %v3053_v17, %v3051_v30  ;;  %v8424_v11 = vld [vmem:[#allocation31_spill] sm:$0xff]  ;;  %vm3059_vm10 = vmand %vm8425_vm14, %vm2885_vm8  ;;  %v8434_v52 = vld [vmem:[#allocation29_spill] sm:$0xff] }
 0x73c   : > { %v2746_v26 = vadd.f32 %v2744_v44, %v7393_v10  ;;  %v2830_v25 = vadd.f32 %v7527_v31, %v7449_v47  ;;  %v2831_v19 = vadd.f32 %v2829_v53, %v7451_v20  ;;  %v2971_v28 = vadd.f32 %v8424_v11, %v2959_v18  ;;  %v4057_v49 = vld [vmem:[%s4461_s25 + $0x20] sm:$0xff]  ;;  %v4059_v30 = vld [vmem:[%s4461_s25 + $0x8] sm:$0xff] }
 0x73d   : > { %v2974_v17 = vsel %vm2885_vm8, %v2972_v6, 0.0  ;;  %v3056_v10 = vadd.f32 %v3054_v22, %v3044_v55  ;;  %v3057_v27 = vadd.f32 %v3055_v3, %v3045_v63  ;;  %v2859_v47 = vadd.f32 %v2857_v29, %v7501_v46  ;;  %v8428_v29 = vld [vmem:[#allocation26_spill] sm:$0xff]  ;;  %v4056_v6 = vld [vmem:[%s4461_s25 + $0x10] sm:$0xff]  ;;  %v4060_v63 = vld [vmem:[%s4461_s25 + $0x18] sm:$0xff] }
 0x73e   : > { %v2860_v2 = vadd.f32 %v2858_v56, %v2746_v26  ;;  %v2948_v44 = vadd.f32 %v2946_v35, %v2830_v25  ;;  %v2949_v43 = vadd.f32 %v2947_v33, %v2831_v19  ;;  %v8427_v50 = vlaneseq  ;;  %v8435_v56 = vld [vmem:[#allocation25_spill] sm:$0xff]  ;;  %v4055_v33 = vld [vmem:[%s4461_s25] sm:$0xff]  ;;  %v4061_v3 = vld [vmem:[%s4461_s25 + $0x28] sm:$0xff] }
 0x73f   : > { %v3060_v20 = vsel %vm8426_vm0, %v3056_v10, 0.0  ;;  %v3061_v58 = vsel %vm3059_vm10, %v3057_v27, 0.0  ;;  %v2975_v31 = vadd.f32 %v2971_v28, %v2859_v47  ;;  %v4062_v25 = vld [vmem:[%s4461_s25 + $0x38] sm:$0xff] }
 0x740   : > { %v2976_v53 = vadd.f32 %v2974_v17, %v2860_v2  ;;  %v3062_v41 = vadd.f32 %v3060_v20, %v2948_v44  ;;  %v3063_v39 = vadd.f32 %v3061_v58, %v2949_v43  ;;  %v3083_v54 = vshrl.u32 %v8427_v50, 7 }
 0x742   : > { %v3064_v24 = vadd.f32 %v3062_v41, %v2975_v31  ;;  %v3065_v9 = vadd.f32 %v3063_v39, %v2976_v53  ;;  %v3084_v59 = vsub.s32 0, %v3083_v54 }
 0x744   : > { %v3068_v51 = vadd.f32 %v3066_v7, %v3064_v24  ;;  %v3069_v32 = vadd.f32 %v3067_v8, %v3065_v9  ;;  %v4058_v8 = vld [vmem:[%s4461_s25 + $0x30] sm:$0xff]  ;;  %s7719_s25 = scalar_lea.sflag [#allocation5], %s340_s12 }
 0x746   : > { %v3362_v62 = vmul.f32 -1.442695, %v3068_v51  ;;  %v3363_v15 = vmul.f32 -1.442695, %v3069_v32 }
 0x748   : > { %4047 = vpow2.f32 %v3362_v62 }
 0x749   : > { %4049 = vpow2.f32 %v3363_v15 }
 0x752   : > { %v4048_v46 = vpop.eup %4047 }
 0x753   : > { %v4050_v42 = vpop.eup %4049  ;;  %v3076_v37 = vadd.f32 1.0, %v4048_v46 }
 0x754   : > { %v3077_v21 = vadd.f32 1.0, %v4050_v42 }
 0x755   : > { %4051 = vrcp.f32 %v3076_v37 }
 0x756   : > { %4053 = vrcp.f32 %v3077_v21 }
 0x75f   : > { %v4052_v12 = vpop.eup %4051 }
 0x760   : > { %v4054_v16 = vpop.eup %4053  ;;  %v3085_v48 = vrot.slane %v4052_v12, %v3084_v59 }
 0x761   : > { %v3089_v0 = vrot.slane %v4054_v16, %v3084_v59 }
 0x762   : > { %v3090_v61 = vmul.f32 %v3085_v48, %v8428_v29  ;;  %v3092_v5 = vmul.f32 %v3085_v48, %v8429_v57  ;;  %v3094_v18 = vmul.f32 %v3085_v48, %v8430_v45  ;;  %v3096_v60 = vmul.f32 %v3085_v48, %v8431_v36 }
 0x763   : > { %v3091_v13 = vmul.f32 %v3089_v0, %v8432_v38  ;;  %v3093_v40 = vmul.f32 %v3089_v0, %v8433_v23  ;;  %v3095_v1 = vmul.f32 %v3089_v0, %v8434_v52  ;;  %v3097_v35 = vmul.f32 %v3089_v0, %v8435_v56 }
 0x764   : > { %v3098_v4 = vadd.f32 %v4055_v33, %v3090_v61  ;;  %v3100_v14 = vadd.f32 %v4056_v6, %v3092_v5  ;;  %v3102_v7 = vadd.f32 %v4057_v49, %v3094_v18  ;;  %v3104_v34 = vadd.f32 %v4058_v8, %v3096_v60 }
 0x765   : > { %v3099_v55 = vadd.f32 %v4059_v30, %v3091_v13  ;;  %v3101_v22 = vadd.f32 %v4060_v63, %v3093_v40  ;;  %v3103_v26 = vadd.f32 %v4061_v3, %v3095_v1  ;;  %v3105_v19 = vadd.f32 %v4062_v25, %v3097_v35 }
 0x766   : > { %v3106_v11 = vmax.f32 %v3098_v4, 0.0  ;;  %v3108_v28 = vmax.f32 %v3100_v14, 0.0  ;;  %v3110_v17 = vmax.f32 %v3102_v7, 0.0  ;;  %v3112_v10 = vmax.f32 %v3104_v34, 0.0 }
 0x767   : > { %v3107_v27 = vmax.f32 %v3099_v55, 0.0  ;;  %v3109_v47 = vmax.f32 %v3101_v22, 0.0  ;;  %v3111_v2 = vmax.f32 %v3103_v26, 0.0  ;;  %v3113_v44 = vmax.f32 %v3105_v19, 0.0 }
 0x768   : > { %3114 = vst [vmem:[%s342_s20] sm:$0xff] %v3106_v11  ;;  %3116 = vst [vmem:[%s342_s20 + $0x10] sm:$0xff] %v3108_v28 }
 0x769   : > { %3118 = vst [vmem:[%s342_s20 + $0x20] sm:$0xff] %v3110_v17  ;;  %3120 = vst [vmem:[%s342_s20 + $0x30] sm:$0xff] %v3112_v10 }
 0x76a   : > { %3115 = vst [vmem:[%s342_s20 + $0x8] sm:$0xff] %v3107_v27  ;;  %3117 = vst [vmem:[%s342_s20 + $0x18] sm:$0xff] %v3109_v47 }
 0x76b   : > { %3119 = vst [vmem:[%s342_s20 + $0x28] sm:$0xff] %v3111_v2  ;;  %3121 = vst [vmem:[%s342_s20 + $0x38] sm:$0xff] %v3113_v44 }
 0x76c   : > { %4147 = shalt.err (!%p4144_p1)
}
 0x76d   : > { %s4148_s21 = scalar_lea.hbm %s7713_s10, 1024  ;;  %s4152_s0 = scalar_lea.hbm %s7769_s8, 2048 }
 0x76e   : > { %p4149_p0 = scmp.ne.s32.totalorder %s7713_s10, %s4148_s21  ;;  %p4153_p2 = scmp.lt.u32.totalorder %s7713_s10, %s7769_s8 }
 0x76f   : > { %p4154_p12 = scmp.lt.u32.totalorder %s4152_s0, %s4148_s21  ;;  %p4156_p3 = scmp.lt.u32.totalorder %s4148_s21, %s7713_s10 }
 0x770   : > { %p4150_p6 = pnand %p4149_p0, %p4349_p5 }
 0x771   : > { %p4155_p10 = por %p4154_p12, %p4153_p2 }
 0x772   : > { %p4151_p9 = pneg %p4150_p6 }
 0x773   : > { %p4157_p4 = por %p4156_p3, %p4155_p10 }
 0x775   : > { %p4158_p7 = pnand %p4157_p4, %p4151_p9 }
 0x777   : > { %4161 = shalt.err (!%p4158_p7)
}
 0x778   : > { %s4265_s22 = smov 256  }
 0x779   : > { %3583 = dma.vmem_to_hbm [thread:$0]  (%p4349_p5), %s7715_s26, 1024, %s7713_s10, %s7719_s25, %s4265_s22, %s4265_s22, %s8104_s17  }
 0x77a PF: > { %p3605_p8 = scmp.ge.s32.totalorder %s4208_s30, 2  ;;  %s3151_s29 = sand.u32 1, %s4196_s27  }
 0x77b   : > { %p8436_p11 = scmp.ne.s32.totalorder %s7943_s16, 0  ;;  %s3152_s20 = scalar_lea.sflag [#allocation5], %s3151_s29 }
 0x77d   : > { %p3596_p13 = pnand %p3605_p8, %p8436_p11 }
 0x77f   : > { %4191 = dma.done.wait (!%p3596_p13), %s3152_s20, 1024  }
 0x780   : > { %4193 = vsyncadd (!%p3596_p13), %s3152_s20, 4294966272  ;;  %s8437_s30 = sld [smem:[#allocation16_spill]]  ;;  %s8438_s9 = sld [smem:[#allocation15_spill]] }
 0x781   : > { %s8439_s29 = sld [smem:[#allocation17_spill]]  ;;  %s8440_s27 = smov %s4200_s28 }
 0x786   : > { %p21_p1 = scmp.ge.s32.totalorder %s8437_s30, 4   ;;  %s8441_s28 = smov %s8438_s9 }
 0x788   :  { %23 = sbr.rel (!%p21_p1) target bundleno = 9 (0x9), region = 101 }
 0x78f   :  { %3157 = vsyncpa [#allocation4], 1 }
 0x790   :  { %3159 = vsyncpa [#allocation4 + $0x1], 1 }
 0x791   :  { %3160 = vsyncpa [#allocation8], 1 }
 0x792   :  { %3161 = vsyncpa [#allocation5], 1 }
 0x793   :  { %3163 = vsyncpa [#allocation5 + $0x1], 1 }
 0x794   :  { %3164 = vsyncpa [#allocation6], 1 }
 0x795   :  { %3166 = vsyncpa [#allocation6 + $0x1], 1 }

</bundles_post_ra>
